<compile_context>
chip_gen: v7x
topology: tpu7x:2x2x1
jax: 0.10.0
libtpu: 0.0.40
codegen_flags: <defaults>
</compile_context>

<pallas_src>
import functools

import jax
import jax.numpy as jnp
from jax.experimental import pallas as pl
from jax.experimental.pallas import tpu as pltpu


MM_DTYPE = jnp.bfloat16   # MXU operand dtype; accumulation is always f32.


# ----------------------------- shared math helpers -----------------------------

def _layernorm(x, g, b, eps=1e-5):
    mu = jnp.mean(x, axis=-1, keepdims=True)
    var = jnp.mean((x - mu) ** 2, axis=-1, keepdims=True)
    return (x - mu) * jax.lax.rsqrt(var + eps) * g + b


def _gelu_tanh(x):
    # TODO(synk): PyTorch nn.GELU() default is exact (erf); tanh approximation used
    # here for a Mosaic-safe elementwise lowering (difference is ~1e-3).
    c = 0.7978845608028654  # sqrt(2/pi)
    return 0.5 * x * (1.0 + jnp.tanh(c * (x + 0.044715 * x * x * x)))


# --------------------------------- Pallas kernel --------------------------------

def transformer_kernel(x_ref, mask_ref, cls_ref, win_ref, bin_ref,
                       ln1g_ref, ln1b_ref, wqkv_ref, wo_ref, bo_ref,
                       ln2g_ref, ln2b_ref, w1_ref, b1_ref, w2_ref, b2_ref,
                       gn_ref, bn_ref, gh_ref, bh_ref, wh_ref, bhl_ref,
                       out_ref, tok_ref,
                       *, depth, heads, dim_head, bblk):
    """One grid step processes `bblk` bags stacked along the token (sublane) axis.

    Token layout (grouped, not interleaved):
        rows [0, bblk)          : cls token of bag 0..bblk-1
        rows [bblk, bblk*(N+1)) : instances, bag-major
        rows [bblk*(N+1), S)    : zero padding (masked out of attention)
    """
    _, N, IN = x_ref.shape
    D = heads * dim_head
    dh = dim_head
    S = tok_ref.shape[0]
    V = bblk * (N + 1)                     # valid token rows

    # ---- input_projection (Linear + ReLU): all bags' instances, one fused matmul ----
    # NOTE: N=8 keeps this reshape sublane-trivial.
    xb = x_ref[...].reshape(bblk * N, IN).astype(MM_DTYPE)
    h = jnp.dot(xb, win_ref[...], preferred_element_type=jnp.float32) + bin_ref[...]
    h = jnp.maximum(h, 0.0)                # (bblk*N, D) f32

    # ---- token tile: 3 vectorized stores (cls rows, instance rows, pad rows) ----
    tok_ref[0:bblk, :] = jnp.broadcast_to(cls_ref[...], (bblk, D))
    tok_ref[bblk:V, :] = h
    if S > V:
        tok_ref[V:, :] = jnp.zeros((S - V, D), jnp.float32)
    t = tok_ref[...]                       # (S, D) f32 residual stream
    mask = mask_ref[...]                   # (S, S) additive mask (0 / -1e30), f32

    for l in range(depth):
        # ---------- PreNorm + multi-head self-attention (fused QKV / out-proj) ------
        tn = _layernorm(t, ln1g_ref[l], ln1b_ref[l])
        # single lane-dense QKV projection; softmax scale folded into the Wq columns
        qkv = jnp.dot(tn.astype(MM_DTYPE), wqkv_ref[l],
                      preferred_element_type=jnp.float32)            # (S, 3D)

        def per_head(base):
            # (H, S, dh) via cheap lane slices + leading-axis stack (no matmuls)
            return jnp.stack([qkv[:, base + hh * dh: base + (hh + 1) * dh]
                              for hh in range(heads)], axis=0)

        q = per_head(0)
        k = per_head(D)
        v = per_head(2 * D)

        s = jnp.einsum('hqe,hke->hqk', q, k,
                       preferred_element_type=jnp.float32)            # (H, S, S)
        s = s + mask[None]                 # per-bag visibility + key-padding mask
        s = s - jnp.max(s, axis=-1, keepdims=True)
        e = jnp.exp(s)
        p = e * pl.reciprocal(jnp.sum(e, axis=-1, keepdims=True), approx=True)
        o = jnp.einsum('hqk,hke->hqe', p, v,
                       preferred_element_type=jnp.float32)            # (H, S, dh)

        # merge heads onto lanes with sublane-aligned transposes, then ONE fused
        # (S, D) @ (D, D) output projection (no head reduce, no (H,S,D) intermediate)
        o2 = jnp.concatenate([o[hh].T for hh in range(heads)], axis=0).T   # (S, D)
        t = jnp.dot(o2.astype(MM_DTYPE), wo_ref[l],
                    preferred_element_type=jnp.float32) + bo_ref[l] + t

        # ---------- PreNorm + FeedForward + residual --------------------------------
        tn2 = _layernorm(t, ln2g_ref[l], ln2b_ref[l])
        f = jnp.dot(tn2.astype(MM_DTYPE), w1_ref[l],
                    preferred_element_type=jnp.float32) + b1_ref[l]
        f = _gelu_tanh(f)
        f = jnp.dot(f.astype(MM_DTYPE), w2_ref[l],
                    preferred_element_type=jnp.float32) + b2_ref[l]
        t = f + t

    # ---- cls pooling (leading slice) -> self.norm -> mlp_head (LayerNorm + Linear) --
    y = _layernorm(t[0:bblk, :], gn_ref[...], bn_ref[...])
    y = _layernorm(y, gh_ref[...], bh_ref[...])
    logits = jnp.dot(y.astype(MM_DTYPE), wh_ref[...],
                     preferred_element_type=jnp.float32) + bhl_ref[...]
    out_ref[0] = logits                    # lane-dense (bblk, 128-padded) slab


# ---------------------------------- wrapper --------------------------------------

def transformer_forward(x, p, *, depth, heads, dim_head, num_classes,
                        bags_per_step=None):
    B, N, IN = x.shape
    D = heads * dim_head

    # bags per grid step: stack bags until the token count approaches ~128 sublanes
    # (review item #1); must divide B.  Demo B=4 -> one grid step.
    if bags_per_step is None:
        bblk = min(B, max(1, 128 // (N + 1)))
        while B % bblk:
            bblk -= 1
    else:
        bblk = bags_per_step
        assert B % bblk == 0, "batch must be divisible by bags_per_step"
    G = B // bblk
    V = bblk * (N + 1)
    S = ((V + 15) // 16) * 16          # multiple of 16: bf16 sublane-pair friendly

    # additive attention mask under the grouped layout: a query may only see the
    # valid tokens (cls + N instances) of its own bag; pad rows never act as keys.
    idx = jnp.arange(S)
    bag = jnp.where(idx < bblk, idx, (idx - bblk) // N)
    valid = idx < V
    allow = (bag[:, None] == bag[None, :]) & valid[None, :]
    mask = jnp.where(allow, 0.0, -1e30).astype(jnp.float32)

    # Fold the softmax scale into the Wq columns; cast MXU operands to bf16 once.
    scale = dim_head ** -0.5
    col_scale = jnp.concatenate([jnp.full((D,), scale, jnp.float32),
                                 jnp.ones((2 * D,), jnp.float32)])
    wqkv = (p['wqkv'] * col_scale[None, None, :]).astype(MM_DTYPE)   # (L, D, 3D)
    wo = p['wo'].astype(MM_DTYPE)                                    # (L, D, D)

    # lane-dense logits: pad num_classes up to 128 lanes, slice back afterwards.
    c_pad = max(128, ((num_classes + 127) // 128) * 128)
    wh = jnp.zeros((D, c_pad), jnp.float32).at[:, :num_classes].set(p['wh'])
    bhl = jnp.zeros((1, c_pad), jnp.float32).at[:, :num_classes].set(p['bhl'])

    params = [
        mask, p['cls'].reshape(1, D),
        p['win'].astype(MM_DTYPE), p['bin'],
        p['ln1g'], p['ln1b'], wqkv, wo, p['bo'],
        p['ln2g'], p['ln2b'],
        p['w1'].astype(MM_DTYPE), p['b1'], p['w2'].astype(MM_DTYPE), p['b2'],
        p['gn'], p['bn'], p['gh'], p['bh'],
        wh.astype(MM_DTYPE), bhl,
    ]

    def full_spec(a):
        nd = a.ndim
        return pl.BlockSpec(a.shape, lambda g, _nd=nd: (0,) * _nd)

    kernel = functools.partial(transformer_kernel, depth=depth, heads=heads,
                               dim_head=dim_head, bblk=bblk)

    out = pl.pallas_call(
        kernel,
        out_shape=jax.ShapeDtypeStruct((G, bblk, c_pad), jnp.float32),
        grid=(G,),
        in_specs=[pl.BlockSpec((bblk, N, IN), lambda g: (g, 0, 0))]
                 + [full_spec(a) for a in params],
        out_specs=pl.BlockSpec((1, bblk, c_pad), lambda g: (g, 0, 0)),
        scratch_shapes=[pltpu.VMEM((S, D), jnp.float32)],
        compiler_params=pltpu.CompilerParams(
            dimension_semantics=("parallel",),
            vmem_limit_bytes=32 * 1024 * 1024),
    )(x, *params)
    return out[..., :num_classes].reshape(B, num_classes)


# ------------------------------ pure-JAX reference -------------------------------

def reference_forward(x, p, *, depth, heads, dim_head):
    B, N, IN = x.shape
    D = heads * dim_head
    inner = D
    scale = dim_head ** -0.5
    h = jnp.maximum(jnp.einsum('bni,id->bnd', x, p['win']) + p['bin'], 0.0)
    t = jnp.concatenate([jnp.broadcast_to(p['cls'], (B, 1, D)), h], axis=1)
    for l in range(depth):
        tn = _layernorm(t, p['ln1g'][l], p['ln1b'][l])
        qkv = jnp.einsum('btd,de->bte', tn, p['wqkv'][l])
        attn_out = jnp.zeros_like(t)
        for hh in range(heads):
            q = qkv[..., hh * dim_head:(hh + 1) * dim_head] * scale
            k = qkv[..., inner + hh * dim_head: inner + (hh + 1) * dim_head]
            v = qkv[..., 2 * inner + hh * dim_head: 2 * inner + (hh + 1) * dim_head]
            s = jnp.einsum('bqd,bkd->bqk', q, k)
            pr = jax.nn.softmax(s, axis=-1)
            oh = jnp.einsum('bqk,bkd->bqd', pr, v)
            attn_out = attn_out + jnp.einsum(
                'bqd,de->bqe', oh, p['wo'][l, hh * dim_head:(hh + 1) * dim_head, :])
        t = attn_out + p['bo'][l] + t
        tn2 = _layernorm(t, p['ln2g'][l], p['ln2b'][l])
        f = jnp.einsum('btd,dh->bth', tn2, p['w1'][l]) + p['b1'][l]
        f = _gelu_tanh(f)
        f = jnp.einsum('bth,hd->btd', f, p['w2'][l]) + p['b2'][l]
        t = f + t
    y = _layernorm(t[:, 0], p['gn'], p['bn'])
    y = _layernorm(y, p['gh'], p['bh'])
    return jnp.einsum('bd,dc->bc', y, p['wh']) + p['bhl']


# ------------------------------ parameter init ------------------------------------

def init_params(key, *, in_dim, depth, heads, dim_head, num_classes):
    D = heads * dim_head          # dim == heads * dim_head
    H = D                         # mlp_dim == dim (mlp_head LayerNorm(mlp_dim))
    inner = D
    ks = iter(jax.random.split(key, 32))

    def w(shape, scale=0.05):
        return (scale * jax.random.normal(next(ks), shape)).astype(jnp.float32)

    return {
        'cls':  w((1, 1, D), 1.0),                       # nn.Parameter(torch.randn(1,1,dim))
        'win':  w((in_dim, D)), 'bin': jnp.zeros((1, D), jnp.float32),
        'ln1g': jnp.ones((depth, 1, D), jnp.float32), 'ln1b': jnp.zeros((depth, 1, D), jnp.float32),
        'wqkv': w((depth, D, 3 * inner)),
        'wo':   w((depth, inner, D)), 'bo': jnp.zeros((depth, 1, D), jnp.float32),
        'ln2g': jnp.ones((depth, 1, D), jnp.float32), 'ln2b': jnp.zeros((depth, 1, D), jnp.float32),
        'w1':   w((depth, D, H)), 'b1': jnp.zeros((depth, 1, H), jnp.float32),
        'w2':   w((depth, H, D)), 'b2': jnp.zeros((depth, 1, D), jnp.float32),
        'gn':   jnp.ones((1, D), jnp.float32), 'bn': jnp.zeros((1, D), jnp.float32),
        'gh':   jnp.ones((1, D), jnp.float32), 'bh': jnp.zeros((1, D), jnp.float32),
        'wh':   w((D, num_classes)), 'bhl': jnp.zeros((1, num_classes), jnp.float32),
    }


# ------------------------------------ main ----------------------------------------

if __name__ == "__main__":
    B, N, IN_DIM = 4, 8, 16           # bag of N instance features per sample
    heads, dim_head, depth = 4, 8, 2  # dim = mlp_dim = 32
    num_classes = 3

    key = jax.random.PRNGKey(0)
    kx, kp = jax.random.split(key)
    x = jax.random.normal(kx, (B, N, IN_DIM), dtype=jnp.float32)
    params = init_params(kp, in_dim=IN_DIM, depth=depth, heads=heads,
                         dim_head=dim_head, num_classes=num_classes)

    logits = transformer_forward(x, params, depth=depth, heads=heads,
                                 dim_head=dim_head, num_classes=num_classes)
    logits = jax.block_until_ready(logits)

    ref = reference_forward(x, params, depth=depth, heads=heads, dim_head=dim_head)
    ref = jax.block_until_ready(ref)

    assert logits.shape == (B, num_classes)
    # tolerance covers bf16 MXU operands (f32 accumulation) + approx reciprocal softmax
    assert jnp.allclose(logits, ref, atol=2e-2, rtol=2e-2), (logits, ref)
    print("KERNEL_OK")
</pallas_src>

<mosaic_0001>
module attributes {stable_mosaic.version = 11 : i64} {
  func.func @transformer_kernel(%arg0: i32, %arg1: memref<4x8x16xf32, #tpu.memory_space<vmem>>, %arg2: memref<48x48xf32, #tpu.memory_space<vmem>>, %arg3: memref<1x32xf32, #tpu.memory_space<vmem>>, %arg4: memref<16x32xbf16, #tpu.memory_space<vmem>>, %arg5: memref<1x32xf32, #tpu.memory_space<vmem>>, %arg6: memref<2x1x32xf32, #tpu.memory_space<vmem>>, %arg7: memref<2x1x32xf32, #tpu.memory_space<vmem>>, %arg8: memref<2x32x96xbf16, #tpu.memory_space<vmem>>, %arg9: memref<2x32x32xbf16, #tpu.memory_space<vmem>>, %arg10: memref<2x1x32xf32, #tpu.memory_space<vmem>>, %arg11: memref<2x1x32xf32, #tpu.memory_space<vmem>>, %arg12: memref<2x1x32xf32, #tpu.memory_space<vmem>>, %arg13: memref<2x32x32xbf16, #tpu.memory_space<vmem>>, %arg14: memref<2x1x32xf32, #tpu.memory_space<vmem>>, %arg15: memref<2x32x32xbf16, #tpu.memory_space<vmem>>, %arg16: memref<2x1x32xf32, #tpu.memory_space<vmem>>, %arg17: memref<1x32xf32, #tpu.memory_space<vmem>>, %arg18: memref<1x32xf32, #tpu.memory_space<vmem>>, %arg19: memref<1x32xf32, #tpu.memory_space<vmem>>, %arg20: memref<1x32xf32, #tpu.memory_space<vmem>>, %arg21: memref<32x128xbf16, #tpu.memory_space<vmem>>, %arg22: memref<1x128xf32, #tpu.memory_space<vmem>>, %arg23: memref<1x4x128xf32, #tpu.memory_space<vmem>>, %arg24: memref<48x32xf32, #tpu.memory_space<vmem>>) attributes {dimension_semantics = [#tpu.dimension_semantics<parallel>], iteration_bounds = array<i64: 1>, scalar_prefetch = 0 : i64, scratch_operands = 1 : i64, tpu.core_type = #tpu.core_type<tc>, window_params = [{transform_indices = @transform_0, window_bounds = array<i64: 4, 8, 16>}, {pipeline_mode = #tpu.pipeline_mode<synchronous>, transform_indices = @transform_1, window_bounds = array<i64: 48, 48>}, {pipeline_mode = #tpu.pipeline_mode<synchronous>, transform_indices = @transform_2, window_bounds = array<i64: 1, 32>}, {pipeline_mode = #tpu.pipeline_mode<synchronous>, transform_indices = @transform_3, window_bounds = array<i64: 16, 32>}, {pipeline_mode = #tpu.pipeline_mode<synchronous>, transform_indices = @transform_4, window_bounds = array<i64: 1, 32>}, {pipeline_mode = #tpu.pipeline_mode<synchronous>, transform_indices = @transform_5, window_bounds = array<i64: 2, 1, 32>}, {pipeline_mode = #tpu.pipeline_mode<synchronous>, transform_indices = @transform_6, window_bounds = array<i64: 2, 1, 32>}, {pipeline_mode = #tpu.pipeline_mode<synchronous>, transform_indices = @transform_7, window_bounds = array<i64: 2, 32, 96>}, {pipeline_mode = #tpu.pipeline_mode<synchronous>, transform_indices = @transform_8, window_bounds = array<i64: 2, 32, 32>}, {pipeline_mode = #tpu.pipeline_mode<synchronous>, transform_indices = @transform_9, window_bounds = array<i64: 2, 1, 32>}, {pipeline_mode = #tpu.pipeline_mode<synchronous>, transform_indices = @transform_10, window_bounds = array<i64: 2, 1, 32>}, {pipeline_mode = #tpu.pipeline_mode<synchronous>, transform_indices = @transform_11, window_bounds = array<i64: 2, 1, 32>}, {pipeline_mode = #tpu.pipeline_mode<synchronous>, transform_indices = @transform_12, window_bounds = array<i64: 2, 32, 32>}, {pipeline_mode = #tpu.pipeline_mode<synchronous>, transform_indices = @transform_13, window_bounds = array<i64: 2, 1, 32>}, {pipeline_mode = #tpu.pipeline_mode<synchronous>, transform_indices = @transform_14, window_bounds = array<i64: 2, 32, 32>}, {pipeline_mode = #tpu.pipeline_mode<synchronous>, transform_indices = @transform_15, window_bounds = array<i64: 2, 1, 32>}, {pipeline_mode = #tpu.pipeline_mode<synchronous>, transform_indices = @transform_16, window_bounds = array<i64: 1, 32>}, {pipeline_mode = #tpu.pipeline_mode<synchronous>, transform_indices = @transform_17, window_bounds = array<i64: 1, 32>}, {pipeline_mode = #tpu.pipeline_mode<synchronous>, transform_indices = @transform_18, window_bounds = array<i64: 1, 32>}, {pipeline_mode = #tpu.pipeline_mode<synchronous>, transform_indices = @transform_19, window_bounds = array<i64: 1, 32>}, {pipeline_mode = #tpu.pipeline_mode<synchronous>, transform_indices = @transform_20, window_bounds = array<i64: 32, 128>}, {pipeline_mode = #tpu.pipeline_mode<synchronous>, transform_indices = @transform_21, window_bounds = array<i64: 1, 128>}, {transform_indices = @transform_22, window_bounds = array<i64: 1, 4, 128>}]} {
    %c0 = arith.constant 0 : index
    %c0_0 = arith.constant 0 : index
    %c0_1 = arith.constant 0 : index
    %0 = vector.load %arg1[%c0, %c0_0, %c0_1] : memref<4x8x16xf32, #tpu.memory_space<vmem>>, vector<4x8x16xf32>
    %1 = vector.shape_cast %0 : vector<4x8x16xf32> to vector<32x16xf32>
    %2 = arith.truncf %1 : vector<32x16xf32> to vector<32x16xbf16>
    %c0_2 = arith.constant 0 : index
    %c0_3 = arith.constant 0 : index
    %3 = vector.load %arg4[%c0_2, %c0_3] : memref<16x32xbf16, #tpu.memory_space<vmem>>, vector<16x32xbf16>
    %cst = arith.constant dense<0.000000e+00> : vector<32x32xf32>
    %4 = tpu.matmul %2, %3, %cst {dimension_numbers = #tpu.dot_dimension_numbers<[1], [0], [0], [1], [0, 0, 1, 1], [], []>} : vector<32x16xbf16>, vector<16x32xbf16>, vector<32x32xf32> -> vector<32x32xf32>
    %c0_4 = arith.constant 0 : index
    %c0_5 = arith.constant 0 : index
    %5 = vector.load %arg5[%c0_4, %c0_5] : memref<1x32xf32, #tpu.memory_space<vmem>>, vector<1x32xf32>
    %6 = vector.broadcast %5 : vector<1x32xf32> to vector<32x32xf32>
    %7 = arith.addf %4, %6 : vector<32x32xf32>
    %cst_6 = arith.constant 0.000000e+00 : f32
    %8 = vector.broadcast %cst_6 : f32 to vector<32x32xf32>
    %9 = arith.maximumf %7, %8 : vector<32x32xf32>
    %c0_7 = arith.constant 0 : index
    %c0_8 = arith.constant 0 : index
    %10 = vector.load %arg3[%c0_7, %c0_8] : memref<1x32xf32, #tpu.memory_space<vmem>>, vector<1x32xf32>
    %11 = vector.shape_cast %10 : vector<1x32xf32> to vector<1x32xf32>
    %12 = vector.broadcast %11 : vector<1x32xf32> to vector<4x32xf32>
    %c0_9 = arith.constant 0 : index
    %c0_10 = arith.constant 0 : index
    %13 = vector.load %arg24[%c0_9, %c0_10] : memref<48x32xf32, #tpu.memory_space<vmem>>, vector<4x32xf32>
    tpu.vector_store %arg24[%c0_9, %c0_10], %12 {strides = array<i32>} : memref<48x32xf32, #tpu.memory_space<vmem>>, vector<4x32xf32>,
    %c4 = arith.constant 4 : index
    %c0_11 = arith.constant 0 : index
    %14 = vector.load %arg24[%c4, %c0_11] : memref<48x32xf32, #tpu.memory_space<vmem>>, vector<32x32xf32>
    tpu.vector_store %arg24[%c4, %c0_11], %9 {strides = array<i32>} : memref<48x32xf32, #tpu.memory_space<vmem>>, vector<32x32xf32>,
    %cst_12 = arith.constant 0.000000e+00 : f32
    %15 = vector.broadcast %cst_12 : f32 to vector<12x32xf32>
    %c36 = arith.constant 36 : index
    %c0_13 = arith.constant 0 : index
    %16 = vector.load %arg24[%c36, %c0_13] : memref<48x32xf32, #tpu.memory_space<vmem>>, vector<12x32xf32>
    tpu.vector_store %arg24[%c36, %c0_13], %15 {strides = array<i32>} : memref<48x32xf32, #tpu.memory_space<vmem>>, vector<12x32xf32>,
    %c0_14 = arith.constant 0 : index
    %c0_15 = arith.constant 0 : index
    %17 = vector.load %arg24[%c0_14, %c0_15] : memref<48x32xf32, #tpu.memory_space<vmem>>, vector<48x32xf32>
    %c0_16 = arith.constant 0 : index
    %c0_17 = arith.constant 0 : index
    %18 = vector.load %arg2[%c0_16, %c0_17] : memref<48x48xf32, #tpu.memory_space<vmem>>, vector<48x48xf32>
    %c0_18 = arith.constant 0 : index
    %c0_19 = arith.constant 0 : index
    %c0_20 = arith.constant 0 : index
    %19 = vector.load %arg6[%c0_18, %c0_19, %c0_20] : memref<2x1x32xf32, #tpu.memory_space<vmem>>, vector<1x1x32xf32>
    %20 = vector.shape_cast %19 : vector<1x1x32xf32> to vector<1x32xf32>
    %c0_21 = arith.constant 0 : index
    %c0_22 = arith.constant 0 : index
    %c0_23 = arith.constant 0 : index
    %21 = vector.load %arg7[%c0_21, %c0_22, %c0_23] : memref<2x1x32xf32, #tpu.memory_space<vmem>>, vector<1x1x32xf32>
    %22 = vector.shape_cast %21 : vector<1x1x32xf32> to vector<1x32xf32>
    %cst_24 = arith.constant dense<0.000000e+00> : vector<48xf32>
    %23 = vector.multi_reduction <add>, %17, %cst_24 [1] : vector<48x32xf32> to vector<48xf32>
    %24 = vector.shape_cast %23 : vector<48xf32> to vector<48x1xf32>
    %cst_25 = arith.constant 3.200000e+01 : f32
    %25 = vector.broadcast %cst_25 : f32 to vector<48x1xf32>
    %26 = arith.divf %24, %25 : vector<48x1xf32>
    %27 = vector.broadcast %26 : vector<48x1xf32> to vector<48x32xf32>
    %28 = arith.subf %17, %27 : vector<48x32xf32>
    %29 = arith.mulf %28, %28 : vector<48x32xf32>
    %cst_26 = arith.constant dense<0.000000e+00> : vector<48xf32>
    %30 = vector.multi_reduction <add>, %29, %cst_26 [1] : vector<48x32xf32> to vector<48xf32>
    %31 = vector.shape_cast %30 : vector<48xf32> to vector<48x1xf32>
    %cst_27 = arith.constant 3.200000e+01 : f32
    %32 = vector.broadcast %cst_27 : f32 to vector<48x1xf32>
    %33 = arith.divf %31, %32 : vector<48x1xf32>
    %34 = vector.broadcast %26 : vector<48x1xf32> to vector<48x32xf32>
    %35 = arith.subf %17, %34 : vector<48x32xf32>
    %cst_28 = arith.constant 9.99999974E-6 : f32
    %36 = vector.broadcast %cst_28 : f32 to vector<48x1xf32>
    %37 = arith.addf %33, %36 : vector<48x1xf32>
    %38 = math.rsqrt %37 : vector<48x1xf32>
    %39 = vector.broadcast %38 : vector<48x1xf32> to vector<48x32xf32>
    %40 = arith.mulf %35, %39 : vector<48x32xf32>
    %41 = vector.broadcast %20 : vector<1x32xf32> to vector<48x32xf32>
    %42 = arith.mulf %40, %41 : vector<48x32xf32>
    %43 = vector.broadcast %22 : vector<1x32xf32> to vector<48x32xf32>
    %44 = arith.addf %42, %43 : vector<48x32xf32>
    %45 = arith.truncf %44 : vector<48x32xf32> to vector<48x32xbf16>
    %c0_29 = arith.constant 0 : index
    %c0_30 = arith.constant 0 : index
    %c0_31 = arith.constant 0 : index
    %46 = vector.load %arg8[%c0_29, %c0_30, %c0_31] : memref<2x32x96xbf16, #tpu.memory_space<vmem>>, vector<1x32x96xbf16>
    %47 = vector.shape_cast %46 : vector<1x32x96xbf16> to vector<32x96xbf16>
    %cst_32 = arith.constant dense<0.000000e+00> : vector<48x96xf32>
    %48 = tpu.matmul %45, %47, %cst_32 {dimension_numbers = #tpu.dot_dimension_numbers<[1], [0], [0], [1], [0, 0, 1, 1], [], []>} : vector<48x32xbf16>, vector<32x96xbf16>, vector<48x96xf32> -> vector<48x96xf32>
    %49 = vector.extract_strided_slice %48 {offsets = [0, 0], sizes = [48, 8], strides = [1, 1]} : vector<48x96xf32> to vector<48x8xf32>
    %50 = vector.extract_strided_slice %48 {offsets = [0, 8], sizes = [48, 8], strides = [1, 1]} : vector<48x96xf32> to vector<48x8xf32>
    %51 = vector.extract_strided_slice %48 {offsets = [0, 16], sizes = [48, 8], strides = [1, 1]} : vector<48x96xf32> to vector<48x8xf32>
    %52 = vector.extract_strided_slice %48 {offsets = [0, 24], sizes = [48, 8], strides = [1, 1]} : vector<48x96xf32> to vector<48x8xf32>
    %53 = vector.shape_cast %49 : vector<48x8xf32> to vector<1x48x8xf32>
    %54 = vector.shape_cast %50 : vector<48x8xf32> to vector<1x48x8xf32>
    %55 = vector.shape_cast %51 : vector<48x8xf32> to vector<1x48x8xf32>
    %56 = vector.shape_cast %52 : vector<48x8xf32> to vector<1x48x8xf32>
    %57 = tpu.concatenate %53, %54, %55, %56 in 0 : vector<1x48x8xf32>, vector<1x48x8xf32>, vector<1x48x8xf32>, vector<1x48x8xf32> -> vector<4x48x8xf32>
    %58 = vector.extract_strided_slice %48 {offsets = [0, 32], sizes = [48, 8], strides = [1, 1]} : vector<48x96xf32> to vector<48x8xf32>
    %59 = vector.extract_strided_slice %48 {offsets = [0, 40], sizes = [48, 8], strides = [1, 1]} : vector<48x96xf32> to vector<48x8xf32>
    %60 = vector.extract_strided_slice %48 {offsets = [0, 48], sizes = [48, 8], strides = [1, 1]} : vector<48x96xf32> to vector<48x8xf32>
    %61 = vector.extract_strided_slice %48 {offsets = [0, 56], sizes = [48, 8], strides = [1, 1]} : vector<48x96xf32> to vector<48x8xf32>
    %62 = vector.shape_cast %58 : vector<48x8xf32> to vector<1x48x8xf32>
    %63 = vector.shape_cast %59 : vector<48x8xf32> to vector<1x48x8xf32>
    %64 = vector.shape_cast %60 : vector<48x8xf32> to vector<1x48x8xf32>
    %65 = vector.shape_cast %61 : vector<48x8xf32> to vector<1x48x8xf32>
    %66 = tpu.concatenate %62, %63, %64, %65 in 0 : vector<1x48x8xf32>, vector<1x48x8xf32>, vector<1x48x8xf32>, vector<1x48x8xf32> -> vector<4x48x8xf32>
    %67 = vector.extract_strided_slice %48 {offsets = [0, 64], sizes = [48, 8], strides = [1, 1]} : vector<48x96xf32> to vector<48x8xf32>
    %68 = vector.extract_strided_slice %48 {offsets = [0, 72], sizes = [48, 8], strides = [1, 1]} : vector<48x96xf32> to vector<48x8xf32>
    %69 = vector.extract_strided_slice %48 {offsets = [0, 80], sizes = [48, 8], strides = [1, 1]} : vector<48x96xf32> to vector<48x8xf32>
    %70 = vector.extract_strided_slice %48 {offsets = [0, 88], sizes = [48, 8], strides = [1, 1]} : vector<48x96xf32> to vector<48x8xf32>
    %71 = vector.shape_cast %67 : vector<48x8xf32> to vector<1x48x8xf32>
    %72 = vector.shape_cast %68 : vector<48x8xf32> to vector<1x48x8xf32>
    %73 = vector.shape_cast %69 : vector<48x8xf32> to vector<1x48x8xf32>
    %74 = vector.shape_cast %70 : vector<48x8xf32> to vector<1x48x8xf32>
    %75 = tpu.concatenate %71, %72, %73, %74 in 0 : vector<1x48x8xf32>, vector<1x48x8xf32>, vector<1x48x8xf32>, vector<1x48x8xf32> -> vector<4x48x8xf32>
    "tpu.trace_start"() <{level = 10 : i32, message = "hqe,hke->hqk"}> : () -> ()
    %cst_33 = arith.constant dense<0.000000e+00> : vector<4x48x48xf32>
    %76 = tpu.matmul %57, %66, %cst_33 {dimension_numbers = #tpu.dot_dimension_numbers<[2], [2], [1], [1], [0, 0, 0, 1, 1, 1], [0], [0]>} : vector<4x48x8xf32>, vector<4x48x8xf32>, vector<4x48x48xf32> -> vector<4x48x48xf32>
    "tpu.trace_stop"() : () -> ()
    %77 = vector.shape_cast %18 : vector<48x48xf32> to vector<1x48x48xf32>
    %78 = vector.broadcast %77 : vector<1x48x48xf32> to vector<4x48x48xf32>
    %79 = arith.addf %76, %78 : vector<4x48x48xf32>
    %cst_34 = arith.constant dense<0xFF800000> : vector<4x48xf32>
    %80 = vector.multi_reduction <maximumf>, %79, %cst_34 [2] : vector<4x48x48xf32> to vector<4x48xf32>
    %81 = vector.shape_cast %80 : vector<4x48xf32> to vector<4x48x1xf32>
    %82 = vector.broadcast %81 : vector<4x48x1xf32> to vector<4x48x48xf32>
    %83 = arith.subf %79, %82 : vector<4x48x48xf32>
    %84 = math.exp %83 : vector<4x48x48xf32>
    %cst_35 = arith.constant dense<0.000000e+00> : vector<4x48xf32>
    %85 = vector.multi_reduction <add>, %84, %cst_35 [2] : vector<4x48x48xf32> to vector<4x48xf32>
    %86 = vector.shape_cast %85 : vector<4x48xf32> to vector<4x48x1xf32>
    %87 = tpu.reciprocal %86 {approx = true} : vector<4x48x1xf32> -> vector<4x48x1xf32>
    %88 = vector.broadcast %87 : vector<4x48x1xf32> to vector<4x48x48xf32>
    %89 = arith.mulf %84, %88 : vector<4x48x48xf32>
    "tpu.trace_start"() <{level = 10 : i32, message = "hqk,hke->hqe"}> : () -> ()
    %cst_36 = arith.constant dense<0.000000e+00> : vector<4x48x8xf32>
    %90 = tpu.matmul %89, %75, %cst_36 {dimension_numbers = #tpu.dot_dimension_numbers<[2], [1], [1], [2], [0, 0, 0, 1, 1, 2], [0], [0]>} : vector<4x48x48xf32>, vector<4x48x8xf32>, vector<4x48x8xf32> -> vector<4x48x8xf32>
    "tpu.trace_stop"() : () -> ()
    %91 = vector.extract_strided_slice %90 {offsets = [0, 0, 0], sizes = [1, 48, 8], strides = [1, 1, 1]} : vector<4x48x8xf32> to vector<1x48x8xf32>
    %92 = vector.shape_cast %91 : vector<1x48x8xf32> to vector<48x8xf32>
    %93 = tpu.transpose %92, [1, 0] : vector<48x8xf32> -> vector<8x48xf32>
    %94 = vector.extract_strided_slice %90 {offsets = [1, 0, 0], sizes = [1, 48, 8], strides = [1, 1, 1]} : vector<4x48x8xf32> to vector<1x48x8xf32>
    %95 = vector.shape_cast %94 : vector<1x48x8xf32> to vector<48x8xf32>
    %96 = tpu.transpose %95, [1, 0] : vector<48x8xf32> -> vector<8x48xf32>
    %97 = vector.extract_strided_slice %90 {offsets = [2, 0, 0], sizes = [1, 48, 8], strides = [1, 1, 1]} : vector<4x48x8xf32> to vector<1x48x8xf32>
    %98 = vector.shape_cast %97 : vector<1x48x8xf32> to vector<48x8xf32>
    %99 = tpu.transpose %98, [1, 0] : vector<48x8xf32> -> vector<8x48xf32>
    %100 = vector.extract_strided_slice %90 {offsets = [3, 0, 0], sizes = [1, 48, 8], strides = [1, 1, 1]} : vector<4x48x8xf32> to vector<1x48x8xf32>
    %101 = vector.shape_cast %100 : vector<1x48x8xf32> to vector<48x8xf32>
    %102 = tpu.transpose %101, [1, 0] : vector<48x8xf32> -> vector<8x48xf32>
    %103 = tpu.concatenate %93, %96, %99, %102 in 0 : vector<8x48xf32>, vector<8x48xf32>, vector<8x48xf32>, vector<8x48xf32> -> vector<32x48xf32>
    %104 = tpu.transpose %103, [1, 0] : vector<32x48xf32> -> vector<48x32xf32>
    %105 = arith.truncf %104 : vector<48x32xf32> to vector<48x32xbf16>
    %c0_37 = arith.constant 0 : index
    %c0_38 = arith.constant 0 : index
    %c0_39 = arith.constant 0 : index
    %106 = vector.load %arg9[%c0_37, %c0_38, %c0_39] : memref<2x32x32xbf16, #tpu.memory_space<vmem>>, vector<1x32x32xbf16>
    %107 = vector.shape_cast %106 : vector<1x32x32xbf16> to vector<32x32xbf16>
    %cst_40 = arith.constant dense<0.000000e+00> : vector<48x32xf32>
    %108 = tpu.matmul %105, %107, %cst_40 {dimension_numbers = #tpu.dot_dimension_numbers<[1], [0], [0], [1], [0, 0, 1, 1], [], []>} : vector<48x32xbf16>, vector<32x32xbf16>, vector<48x32xf32> -> vector<48x32xf32>
    %c0_41 = arith.constant 0 : index
    %c0_42 = arith.constant 0 : index
    %c0_43 = arith.constant 0 : index
    %109 = vector.load %arg10[%c0_41, %c0_42, %c0_43] : memref<2x1x32xf32, #tpu.memory_space<vmem>>, vector<1x1x32xf32>
    %110 = vector.shape_cast %109 : vector<1x1x32xf32> to vector<1x32xf32>
    %111 = vector.broadcast %110 : vector<1x32xf32> to vector<48x32xf32>
    %112 = arith.addf %108, %111 : vector<48x32xf32>
    %113 = arith.addf %112, %17 : vector<48x32xf32>
    %c0_44 = arith.constant 0 : index
    %c0_45 = arith.constant 0 : index
    %c0_46 = arith.constant 0 : index
    %114 = vector.load %arg11[%c0_44, %c0_45, %c0_46] : memref<2x1x32xf32, #tpu.memory_space<vmem>>, vector<1x1x32xf32>
    %115 = vector.shape_cast %114 : vector<1x1x32xf32> to vector<1x32xf32>
    %c0_47 = arith.constant 0 : index
    %c0_48 = arith.constant 0 : index
    %c0_49 = arith.constant 0 : index
    %116 = vector.load %arg12[%c0_47, %c0_48, %c0_49] : memref<2x1x32xf32, #tpu.memory_space<vmem>>, vector<1x1x32xf32>
    %117 = vector.shape_cast %116 : vector<1x1x32xf32> to vector<1x32xf32>
    %cst_50 = arith.constant dense<0.000000e+00> : vector<48xf32>
    %118 = vector.multi_reduction <add>, %113, %cst_50 [1] : vector<48x32xf32> to vector<48xf32>
    %119 = vector.shape_cast %118 : vector<48xf32> to vector<48x1xf32>
    %cst_51 = arith.constant 3.200000e+01 : f32
    %120 = vector.broadcast %cst_51 : f32 to vector<48x1xf32>
    %121 = arith.divf %119, %120 : vector<48x1xf32>
    %122 = vector.broadcast %121 : vector<48x1xf32> to vector<48x32xf32>
    %123 = arith.subf %113, %122 : vector<48x32xf32>
    %124 = arith.mulf %123, %123 : vector<48x32xf32>
    %cst_52 = arith.constant dense<0.000000e+00> : vector<48xf32>
    %125 = vector.multi_reduction <add>, %124, %cst_52 [1] : vector<48x32xf32> to vector<48xf32>
    %126 = vector.shape_cast %125 : vector<48xf32> to vector<48x1xf32>
    %cst_53 = arith.constant 3.200000e+01 : f32
    %127 = vector.broadcast %cst_53 : f32 to vector<48x1xf32>
    %128 = arith.divf %126, %127 : vector<48x1xf32>
    %129 = vector.broadcast %121 : vector<48x1xf32> to vector<48x32xf32>
    %130 = arith.subf %113, %129 : vector<48x32xf32>
    %cst_54 = arith.constant 9.99999974E-6 : f32
    %131 = vector.broadcast %cst_54 : f32 to vector<48x1xf32>
    %132 = arith.addf %128, %131 : vector<48x1xf32>
    %133 = math.rsqrt %132 : vector<48x1xf32>
    %134 = vector.broadcast %133 : vector<48x1xf32> to vector<48x32xf32>
    %135 = arith.mulf %130, %134 : vector<48x32xf32>
    %136 = vector.broadcast %115 : vector<1x32xf32> to vector<48x32xf32>
    %137 = arith.mulf %135, %136 : vector<48x32xf32>
    %138 = vector.broadcast %117 : vector<1x32xf32> to vector<48x32xf32>
    %139 = arith.addf %137, %138 : vector<48x32xf32>
    %140 = arith.truncf %139 : vector<48x32xf32> to vector<48x32xbf16>
    %c0_55 = arith.constant 0 : index
    %c0_56 = arith.constant 0 : index
    %c0_57 = arith.constant 0 : index
    %141 = vector.load %arg13[%c0_55, %c0_56, %c0_57] : memref<2x32x32xbf16, #tpu.memory_space<vmem>>, vector<1x32x32xbf16>
    %142 = vector.shape_cast %141 : vector<1x32x32xbf16> to vector<32x32xbf16>
    %cst_58 = arith.constant dense<0.000000e+00> : vector<48x32xf32>
    %143 = tpu.matmul %140, %142, %cst_58 {dimension_numbers = #tpu.dot_dimension_numbers<[1], [0], [0], [1], [0, 0, 1, 1], [], []>} : vector<48x32xbf16>, vector<32x32xbf16>, vector<48x32xf32> -> vector<48x32xf32>
    %c0_59 = arith.constant 0 : index
    %c0_60 = arith.constant 0 : index
    %c0_61 = arith.constant 0 : index
    %144 = vector.load %arg14[%c0_59, %c0_60, %c0_61] : memref<2x1x32xf32, #tpu.memory_space<vmem>>, vector<1x1x32xf32>
    %145 = vector.shape_cast %144 : vector<1x1x32xf32> to vector<1x32xf32>
    %146 = vector.broadcast %145 : vector<1x32xf32> to vector<48x32xf32>
    %147 = arith.addf %143, %146 : vector<48x32xf32>
    %cst_62 = arith.constant 5.000000e-01 : f32
    %148 = vector.broadcast %cst_62 : f32 to vector<48x32xf32>
    %149 = arith.mulf %148, %147 : vector<48x32xf32>
    %cst_63 = arith.constant 4.471500e-02 : f32
    %150 = vector.broadcast %cst_63 : f32 to vector<48x32xf32>
    %151 = arith.mulf %150, %147 : vector<48x32xf32>
    %152 = arith.mulf %151, %147 : vector<48x32xf32>
    %153 = arith.mulf %152, %147 : vector<48x32xf32>
    %154 = arith.addf %147, %153 : vector<48x32xf32>
    %cst_64 = arith.constant 0.797884583 : f32
    %155 = vector.broadcast %cst_64 : f32 to vector<48x32xf32>
    %156 = arith.mulf %155, %154 : vector<48x32xf32>
    %157 = math.tanh %156 : vector<48x32xf32>
    %cst_65 = arith.constant 1.000000e+00 : f32
    %158 = vector.broadcast %cst_65 : f32 to vector<48x32xf32>
    %159 = arith.addf %158, %157 : vector<48x32xf32>
    %160 = arith.mulf %149, %159 : vector<48x32xf32>
    %161 = arith.truncf %160 : vector<48x32xf32> to vector<48x32xbf16>
    %c0_66 = arith.constant 0 : index
    %c0_67 = arith.constant 0 : index
    %c0_68 = arith.constant 0 : index
    %162 = vector.load %arg15[%c0_66, %c0_67, %c0_68] : memref<2x32x32xbf16, #tpu.memory_space<vmem>>, vector<1x32x32xbf16>
    %163 = vector.shape_cast %162 : vector<1x32x32xbf16> to vector<32x32xbf16>
    %cst_69 = arith.constant dense<0.000000e+00> : vector<48x32xf32>
    %164 = tpu.matmul %161, %163, %cst_69 {dimension_numbers = #tpu.dot_dimension_numbers<[1], [0], [0], [1], [0, 0, 1, 1], [], []>} : vector<48x32xbf16>, vector<32x32xbf16>, vector<48x32xf32> -> vector<48x32xf32>
    %c0_70 = arith.constant 0 : index
    %c0_71 = arith.constant 0 : index
    %c0_72 = arith.constant 0 : index
    %165 = vector.load %arg16[%c0_70, %c0_71, %c0_72] : memref<2x1x32xf32, #tpu.memory_space<vmem>>, vector<1x1x32xf32>
    %166 = vector.shape_cast %165 : vector<1x1x32xf32> to vector<1x32xf32>
    %167 = vector.broadcast %166 : vector<1x32xf32> to vector<48x32xf32>
    %168 = arith.addf %164, %167 : vector<48x32xf32>
    %169 = arith.addf %168, %113 : vector<48x32xf32>
    %c1 = arith.constant 1 : index
    %c0_73 = arith.constant 0 : index
    %c0_74 = arith.constant 0 : index
    %170 = vector.load %arg6[%c1, %c0_73, %c0_74] : memref<2x1x32xf32, #tpu.memory_space<vmem>>, vector<1x1x32xf32>
    %171 = vector.shape_cast %170 : vector<1x1x32xf32> to vector<1x32xf32>
    %c1_75 = arith.constant 1 : index
    %c0_76 = arith.constant 0 : index
    %c0_77 = arith.constant 0 : index
    %172 = vector.load %arg7[%c1_75, %c0_76, %c0_77] : memref<2x1x32xf32, #tpu.memory_space<vmem>>, vector<1x1x32xf32>
    %173 = vector.shape_cast %172 : vector<1x1x32xf32> to vector<1x32xf32>
    %cst_78 = arith.constant dense<0.000000e+00> : vector<48xf32>
    %174 = vector.multi_reduction <add>, %169, %cst_78 [1] : vector<48x32xf32> to vector<48xf32>
    %175 = vector.shape_cast %174 : vector<48xf32> to vector<48x1xf32>
    %cst_79 = arith.constant 3.200000e+01 : f32
    %176 = vector.broadcast %cst_79 : f32 to vector<48x1xf32>
    %177 = arith.divf %175, %176 : vector<48x1xf32>
    %178 = vector.broadcast %177 : vector<48x1xf32> to vector<48x32xf32>
    %179 = arith.subf %169, %178 : vector<48x32xf32>
    %180 = arith.mulf %179, %179 : vector<48x32xf32>
    %cst_80 = arith.constant dense<0.000000e+00> : vector<48xf32>
    %181 = vector.multi_reduction <add>, %180, %cst_80 [1] : vector<48x32xf32> to vector<48xf32>
    %182 = vector.shape_cast %181 : vector<48xf32> to vector<48x1xf32>
    %cst_81 = arith.constant 3.200000e+01 : f32
    %183 = vector.broadcast %cst_81 : f32 to vector<48x1xf32>
    %184 = arith.divf %182, %183 : vector<48x1xf32>
    %185 = vector.broadcast %177 : vector<48x1xf32> to vector<48x32xf32>
    %186 = arith.subf %169, %185 : vector<48x32xf32>
    %cst_82 = arith.constant 9.99999974E-6 : f32
    %187 = vector.broadcast %cst_82 : f32 to vector<48x1xf32>
    %188 = arith.addf %184, %187 : vector<48x1xf32>
    %189 = math.rsqrt %188 : vector<48x1xf32>
    %190 = vector.broadcast %189 : vector<48x1xf32> to vector<48x32xf32>
    %191 = arith.mulf %186, %190 : vector<48x32xf32>
    %192 = vector.broadcast %171 : vector<1x32xf32> to vector<48x32xf32>
    %193 = arith.mulf %191, %192 : vector<48x32xf32>
    %194 = vector.broadcast %173 : vector<1x32xf32> to vector<48x32xf32>
    %195 = arith.addf %193, %194 : vector<48x32xf32>
    %196 = arith.truncf %195 : vector<48x32xf32> to vector<48x32xbf16>
    %c1_83 = arith.constant 1 : index
    %c0_84 = arith.constant 0 : index
    %c0_85 = arith.constant 0 : index
    %197 = vector.load %arg8[%c1_83, %c0_84, %c0_85] : memref<2x32x96xbf16, #tpu.memory_space<vmem>>, vector<1x32x96xbf16>
    %198 = vector.shape_cast %197 : vector<1x32x96xbf16> to vector<32x96xbf16>
    %cst_86 = arith.constant dense<0.000000e+00> : vector<48x96xf32>
    %199 = tpu.matmul %196, %198, %cst_86 {dimension_numbers = #tpu.dot_dimension_numbers<[1], [0], [0], [1], [0, 0, 1, 1], [], []>} : vector<48x32xbf16>, vector<32x96xbf16>, vector<48x96xf32> -> vector<48x96xf32>
    %200 = vector.extract_strided_slice %199 {offsets = [0, 0], sizes = [48, 8], strides = [1, 1]} : vector<48x96xf32> to vector<48x8xf32>
    %201 = vector.extract_strided_slice %199 {offsets = [0, 8], sizes = [48, 8], strides = [1, 1]} : vector<48x96xf32> to vector<48x8xf32>
    %202 = vector.extract_strided_slice %199 {offsets = [0, 16], sizes = [48, 8], strides = [1, 1]} : vector<48x96xf32> to vector<48x8xf32>
    %203 = vector.extract_strided_slice %199 {offsets = [0, 24], sizes = [48, 8], strides = [1, 1]} : vector<48x96xf32> to vector<48x8xf32>
    %204 = vector.shape_cast %200 : vector<48x8xf32> to vector<1x48x8xf32>
    %205 = vector.shape_cast %201 : vector<48x8xf32> to vector<1x48x8xf32>
    %206 = vector.shape_cast %202 : vector<48x8xf32> to vector<1x48x8xf32>
    %207 = vector.shape_cast %203 : vector<48x8xf32> to vector<1x48x8xf32>
    %208 = tpu.concatenate %204, %205, %206, %207 in 0 : vector<1x48x8xf32>, vector<1x48x8xf32>, vector<1x48x8xf32>, vector<1x48x8xf32> -> vector<4x48x8xf32>
    %209 = vector.extract_strided_slice %199 {offsets = [0, 32], sizes = [48, 8], strides = [1, 1]} : vector<48x96xf32> to vector<48x8xf32>
    %210 = vector.extract_strided_slice %199 {offsets = [0, 40], sizes = [48, 8], strides = [1, 1]} : vector<48x96xf32> to vector<48x8xf32>
    %211 = vector.extract_strided_slice %199 {offsets = [0, 48], sizes = [48, 8], strides = [1, 1]} : vector<48x96xf32> to vector<48x8xf32>
    %212 = vector.extract_strided_slice %199 {offsets = [0, 56], sizes = [48, 8], strides = [1, 1]} : vector<48x96xf32> to vector<48x8xf32>
    %213 = vector.shape_cast %209 : vector<48x8xf32> to vector<1x48x8xf32>
    %214 = vector.shape_cast %210 : vector<48x8xf32> to vector<1x48x8xf32>
    %215 = vector.shape_cast %211 : vector<48x8xf32> to vector<1x48x8xf32>
    %216 = vector.shape_cast %212 : vector<48x8xf32> to vector<1x48x8xf32>
    %217 = tpu.concatenate %213, %214, %215, %216 in 0 : vector<1x48x8xf32>, vector<1x48x8xf32>, vector<1x48x8xf32>, vector<1x48x8xf32> -> vector<4x48x8xf32>
    %218 = vector.extract_strided_slice %199 {offsets = [0, 64], sizes = [48, 8], strides = [1, 1]} : vector<48x96xf32> to vector<48x8xf32>
    %219 = vector.extract_strided_slice %199 {offsets = [0, 72], sizes = [48, 8], strides = [1, 1]} : vector<48x96xf32> to vector<48x8xf32>
    %220 = vector.extract_strided_slice %199 {offsets = [0, 80], sizes = [48, 8], strides = [1, 1]} : vector<48x96xf32> to vector<48x8xf32>
    %221 = vector.extract_strided_slice %199 {offsets = [0, 88], sizes = [48, 8], strides = [1, 1]} : vector<48x96xf32> to vector<48x8xf32>
    %222 = vector.shape_cast %218 : vector<48x8xf32> to vector<1x48x8xf32>
    %223 = vector.shape_cast %219 : vector<48x8xf32> to vector<1x48x8xf32>
    %224 = vector.shape_cast %220 : vector<48x8xf32> to vector<1x48x8xf32>
    %225 = vector.shape_cast %221 : vector<48x8xf32> to vector<1x48x8xf32>
    %226 = tpu.concatenate %222, %223, %224, %225 in 0 : vector<1x48x8xf32>, vector<1x48x8xf32>, vector<1x48x8xf32>, vector<1x48x8xf32> -> vector<4x48x8xf32>
    "tpu.trace_start"() <{level = 10 : i32, message = "hqe,hke->hqk"}> : () -> ()
    %cst_87 = arith.constant dense<0.000000e+00> : vector<4x48x48xf32>
    %227 = tpu.matmul %208, %217, %cst_87 {dimension_numbers = #tpu.dot_dimension_numbers<[2], [2], [1], [1], [0, 0, 0, 1, 1, 1], [0], [0]>} : vector<4x48x8xf32>, vector<4x48x8xf32>, vector<4x48x48xf32> -> vector<4x48x48xf32>
    "tpu.trace_stop"() : () -> ()
    %228 = vector.shape_cast %18 : vector<48x48xf32> to vector<1x48x48xf32>
    %229 = vector.broadcast %228 : vector<1x48x48xf32> to vector<4x48x48xf32>
    %230 = arith.addf %227, %229 : vector<4x48x48xf32>
    %cst_88 = arith.constant dense<0xFF800000> : vector<4x48xf32>
    %231 = vector.multi_reduction <maximumf>, %230, %cst_88 [2] : vector<4x48x48xf32> to vector<4x48xf32>
    %232 = vector.shape_cast %231 : vector<4x48xf32> to vector<4x48x1xf32>
    %233 = vector.broadcast %232 : vector<4x48x1xf32> to vector<4x48x48xf32>
    %234 = arith.subf %230, %233 : vector<4x48x48xf32>
    %235 = math.exp %234 : vector<4x48x48xf32>
    %cst_89 = arith.constant dense<0.000000e+00> : vector<4x48xf32>
    %236 = vector.multi_reduction <add>, %235, %cst_89 [2] : vector<4x48x48xf32> to vector<4x48xf32>
    %237 = vector.shape_cast %236 : vector<4x48xf32> to vector<4x48x1xf32>
    %238 = tpu.reciprocal %237 {approx = true} : vector<4x48x1xf32> -> vector<4x48x1xf32>
    %239 = vector.broadcast %238 : vector<4x48x1xf32> to vector<4x48x48xf32>
    %240 = arith.mulf %235, %239 : vector<4x48x48xf32>
    "tpu.trace_start"() <{level = 10 : i32, message = "hqk,hke->hqe"}> : () -> ()
    %cst_90 = arith.constant dense<0.000000e+00> : vector<4x48x8xf32>
    %241 = tpu.matmul %240, %226, %cst_90 {dimension_numbers = #tpu.dot_dimension_numbers<[2], [1], [1], [2], [0, 0, 0, 1, 1, 2], [0], [0]>} : vector<4x48x48xf32>, vector<4x48x8xf32>, vector<4x48x8xf32> -> vector<4x48x8xf32>
    "tpu.trace_stop"() : () -> ()
    %242 = vector.extract_strided_slice %241 {offsets = [0, 0, 0], sizes = [1, 48, 8], strides = [1, 1, 1]} : vector<4x48x8xf32> to vector<1x48x8xf32>
    %243 = vector.shape_cast %242 : vector<1x48x8xf32> to vector<48x8xf32>
    %244 = tpu.transpose %243, [1, 0] : vector<48x8xf32> -> vector<8x48xf32>
    %245 = vector.extract_strided_slice %241 {offsets = [1, 0, 0], sizes = [1, 48, 8], strides = [1, 1, 1]} : vector<4x48x8xf32> to vector<1x48x8xf32>
    %246 = vector.shape_cast %245 : vector<1x48x8xf32> to vector<48x8xf32>
    %247 = tpu.transpose %246, [1, 0] : vector<48x8xf32> -> vector<8x48xf32>
    %248 = vector.extract_strided_slice %241 {offsets = [2, 0, 0], sizes = [1, 48, 8], strides = [1, 1, 1]} : vector<4x48x8xf32> to vector<1x48x8xf32>
    %249 = vector.shape_cast %248 : vector<1x48x8xf32> to vector<48x8xf32>
    %250 = tpu.transpose %249, [1, 0] : vector<48x8xf32> -> vector<8x48xf32>
    %251 = vector.extract_strided_slice %241 {offsets = [3, 0, 0], sizes = [1, 48, 8], strides = [1, 1, 1]} : vector<4x48x8xf32> to vector<1x48x8xf32>
    %252 = vector.shape_cast %251 : vector<1x48x8xf32> to vector<48x8xf32>
    %253 = tpu.transpose %252, [1, 0] : vector<48x8xf32> -> vector<8x48xf32>
    %254 = tpu.concatenate %244, %247, %250, %253 in 0 : vector<8x48xf32>, vector<8x48xf32>, vector<8x48xf32>, vector<8x48xf32> -> vector<32x48xf32>
    %255 = tpu.transpose %254, [1, 0] : vector<32x48xf32> -> vector<48x32xf32>
    %256 = arith.truncf %255 : vector<48x32xf32> to vector<48x32xbf16>
    %c1_91 = arith.constant 1 : index
    %c0_92 = arith.constant 0 : index
    %c0_93 = arith.constant 0 : index
    %257 = vector.load %arg9[%c1_91, %c0_92, %c0_93] : memref<2x32x32xbf16, #tpu.memory_space<vmem>>, vector<1x32x32xbf16>
    %258 = vector.shape_cast %257 : vector<1x32x32xbf16> to vector<32x32xbf16>
    %cst_94 = arith.constant dense<0.000000e+00> : vector<48x32xf32>
    %259 = tpu.matmul %256, %258, %cst_94 {dimension_numbers = #tpu.dot_dimension_numbers<[1], [0], [0], [1], [0, 0, 1, 1], [], []>} : vector<48x32xbf16>, vector<32x32xbf16>, vector<48x32xf32> -> vector<48x32xf32>
    %c1_95 = arith.constant 1 : index
    %c0_96 = arith.constant 0 : index
    %c0_97 = arith.constant 0 : index
    %260 = vector.load %arg10[%c1_95, %c0_96, %c0_97] : memref<2x1x32xf32, #tpu.memory_space<vmem>>, vector<1x1x32xf32>
    %261 = vector.shape_cast %260 : vector<1x1x32xf32> to vector<1x32xf32>
    %262 = vector.broadcast %261 : vector<1x32xf32> to vector<48x32xf32>
    %263 = arith.addf %259, %262 : vector<48x32xf32>
    %264 = arith.addf %263, %169 : vector<48x32xf32>
    %c1_98 = arith.constant 1 : index
    %c0_99 = arith.constant 0 : index
    %c0_100 = arith.constant 0 : index
    %265 = vector.load %arg11[%c1_98, %c0_99, %c0_100] : memref<2x1x32xf32, #tpu.memory_space<vmem>>, vector<1x1x32xf32>
    %266 = vector.shape_cast %265 : vector<1x1x32xf32> to vector<1x32xf32>
    %c1_101 = arith.constant 1 : index
    %c0_102 = arith.constant 0 : index
    %c0_103 = arith.constant 0 : index
    %267 = vector.load %arg12[%c1_101, %c0_102, %c0_103] : memref<2x1x32xf32, #tpu.memory_space<vmem>>, vector<1x1x32xf32>
    %268 = vector.shape_cast %267 : vector<1x1x32xf32> to vector<1x32xf32>
    %cst_104 = arith.constant dense<0.000000e+00> : vector<48xf32>
    %269 = vector.multi_reduction <add>, %264, %cst_104 [1] : vector<48x32xf32> to vector<48xf32>
    %270 = vector.shape_cast %269 : vector<48xf32> to vector<48x1xf32>
    %cst_105 = arith.constant 3.200000e+01 : f32
    %271 = vector.broadcast %cst_105 : f32 to vector<48x1xf32>
    %272 = arith.divf %270, %271 : vector<48x1xf32>
    %273 = vector.broadcast %272 : vector<48x1xf32> to vector<48x32xf32>
    %274 = arith.subf %264, %273 : vector<48x32xf32>
    %275 = arith.mulf %274, %274 : vector<48x32xf32>
    %cst_106 = arith.constant dense<0.000000e+00> : vector<48xf32>
    %276 = vector.multi_reduction <add>, %275, %cst_106 [1] : vector<48x32xf32> to vector<48xf32>
    %277 = vector.shape_cast %276 : vector<48xf32> to vector<48x1xf32>
    %cst_107 = arith.constant 3.200000e+01 : f32
    %278 = vector.broadcast %cst_107 : f32 to vector<48x1xf32>
    %279 = arith.divf %277, %278 : vector<48x1xf32>
    %280 = vector.broadcast %272 : vector<48x1xf32> to vector<48x32xf32>
    %281 = arith.subf %264, %280 : vector<48x32xf32>
    %cst_108 = arith.constant 9.99999974E-6 : f32
    %282 = vector.broadcast %cst_108 : f32 to vector<48x1xf32>
    %283 = arith.addf %279, %282 : vector<48x1xf32>
    %284 = math.rsqrt %283 : vector<48x1xf32>
    %285 = vector.broadcast %284 : vector<48x1xf32> to vector<48x32xf32>
    %286 = arith.mulf %281, %285 : vector<48x32xf32>
    %287 = vector.broadcast %266 : vector<1x32xf32> to vector<48x32xf32>
    %288 = arith.mulf %286, %287 : vector<48x32xf32>
    %289 = vector.broadcast %268 : vector<1x32xf32> to vector<48x32xf32>
    %290 = arith.addf %288, %289 : vector<48x32xf32>
    %291 = arith.truncf %290 : vector<48x32xf32> to vector<48x32xbf16>
    %c1_109 = arith.constant 1 : index
    %c0_110 = arith.constant 0 : index
    %c0_111 = arith.constant 0 : index
    %292 = vector.load %arg13[%c1_109, %c0_110, %c0_111] : memref<2x32x32xbf16, #tpu.memory_space<vmem>>, vector<1x32x32xbf16>
    %293 = vector.shape_cast %292 : vector<1x32x32xbf16> to vector<32x32xbf16>
    %cst_112 = arith.constant dense<0.000000e+00> : vector<48x32xf32>
    %294 = tpu.matmul %291, %293, %cst_112 {dimension_numbers = #tpu.dot_dimension_numbers<[1], [0], [0], [1], [0, 0, 1, 1], [], []>} : vector<48x32xbf16>, vector<32x32xbf16>, vector<48x32xf32> -> vector<48x32xf32>
    %c1_113 = arith.constant 1 : index
    %c0_114 = arith.constant 0 : index
    %c0_115 = arith.constant 0 : index
    %295 = vector.load %arg14[%c1_113, %c0_114, %c0_115] : memref<2x1x32xf32, #tpu.memory_space<vmem>>, vector<1x1x32xf32>
    %296 = vector.shape_cast %295 : vector<1x1x32xf32> to vector<1x32xf32>
    %297 = vector.broadcast %296 : vector<1x32xf32> to vector<48x32xf32>
    %298 = arith.addf %294, %297 : vector<48x32xf32>
    %cst_116 = arith.constant 5.000000e-01 : f32
    %299 = vector.broadcast %cst_116 : f32 to vector<48x32xf32>
    %300 = arith.mulf %299, %298 : vector<48x32xf32>
    %cst_117 = arith.constant 4.471500e-02 : f32
    %301 = vector.broadcast %cst_117 : f32 to vector<48x32xf32>
    %302 = arith.mulf %301, %298 : vector<48x32xf32>
    %303 = arith.mulf %302, %298 : vector<48x32xf32>
    %304 = arith.mulf %303, %298 : vector<48x32xf32>
    %305 = arith.addf %298, %304 : vector<48x32xf32>
    %cst_118 = arith.constant 0.797884583 : f32
    %306 = vector.broadcast %cst_118 : f32 to vector<48x32xf32>
    %307 = arith.mulf %306, %305 : vector<48x32xf32>
    %308 = math.tanh %307 : vector<48x32xf32>
    %cst_119 = arith.constant 1.000000e+00 : f32
    %309 = vector.broadcast %cst_119 : f32 to vector<48x32xf32>
    %310 = arith.addf %309, %308 : vector<48x32xf32>
    %311 = arith.mulf %300, %310 : vector<48x32xf32>
    %312 = arith.truncf %311 : vector<48x32xf32> to vector<48x32xbf16>
    %c1_120 = arith.constant 1 : index
    %c0_121 = arith.constant 0 : index
    %c0_122 = arith.constant 0 : index
    %313 = vector.load %arg15[%c1_120, %c0_121, %c0_122] : memref<2x32x32xbf16, #tpu.memory_space<vmem>>, vector<1x32x32xbf16>
    %314 = vector.shape_cast %313 : vector<1x32x32xbf16> to vector<32x32xbf16>
    %cst_123 = arith.constant dense<0.000000e+00> : vector<48x32xf32>
    %315 = tpu.matmul %312, %314, %cst_123 {dimension_numbers = #tpu.dot_dimension_numbers<[1], [0], [0], [1], [0, 0, 1, 1], [], []>} : vector<48x32xbf16>, vector<32x32xbf16>, vector<48x32xf32> -> vector<48x32xf32>
    %c1_124 = arith.constant 1 : index
    %c0_125 = arith.constant 0 : index
    %c0_126 = arith.constant 0 : index
    %316 = vector.load %arg16[%c1_124, %c0_125, %c0_126] : memref<2x1x32xf32, #tpu.memory_space<vmem>>, vector<1x1x32xf32>
    %317 = vector.shape_cast %316 : vector<1x1x32xf32> to vector<1x32xf32>
    %318 = vector.broadcast %317 : vector<1x32xf32> to vector<48x32xf32>
    %319 = arith.addf %315, %318 : vector<48x32xf32>
    %320 = arith.addf %319, %264 : vector<48x32xf32>
    %321 = vector.extract_strided_slice %320 {offsets = [0, 0], sizes = [4, 32], strides = [1, 1]} : vector<48x32xf32> to vector<4x32xf32>
    %c0_127 = arith.constant 0 : index
    %c0_128 = arith.constant 0 : index
    %322 = vector.load %arg17[%c0_127, %c0_128] : memref<1x32xf32, #tpu.memory_space<vmem>>, vector<1x32xf32>
    %c0_129 = arith.constant 0 : index
    %c0_130 = arith.constant 0 : index
    %323 = vector.load %arg18[%c0_129, %c0_130] : memref<1x32xf32, #tpu.memory_space<vmem>>, vector<1x32xf32>
    %cst_131 = arith.constant dense<0.000000e+00> : vector<4xf32>
    %324 = vector.multi_reduction <add>, %321, %cst_131 [1] : vector<4x32xf32> to vector<4xf32>
    %325 = vector.shape_cast %324 : vector<4xf32> to vector<4x1xf32>
    %cst_132 = arith.constant 3.200000e+01 : f32
    %326 = vector.broadcast %cst_132 : f32 to vector<4x1xf32>
    %327 = arith.divf %325, %326 : vector<4x1xf32>
    %328 = vector.broadcast %327 : vector<4x1xf32> to vector<4x32xf32>
    %329 = arith.subf %321, %328 : vector<4x32xf32>
    %330 = arith.mulf %329, %329 : vector<4x32xf32>
    %cst_133 = arith.constant dense<0.000000e+00> : vector<4xf32>
    %331 = vector.multi_reduction <add>, %330, %cst_133 [1] : vector<4x32xf32> to vector<4xf32>
    %332 = vector.shape_cast %331 : vector<4xf32> to vector<4x1xf32>
    %cst_134 = arith.constant 3.200000e+01 : f32
    %333 = vector.broadcast %cst_134 : f32 to vector<4x1xf32>
    %334 = arith.divf %332, %333 : vector<4x1xf32>
    %335 = vector.broadcast %327 : vector<4x1xf32> to vector<4x32xf32>
    %336 = arith.subf %321, %335 : vector<4x32xf32>
    %cst_135 = arith.constant 9.99999974E-6 : f32
    %337 = vector.broadcast %cst_135 : f32 to vector<4x1xf32>
    %338 = arith.addf %334, %337 : vector<4x1xf32>
    %339 = math.rsqrt %338 : vector<4x1xf32>
    %340 = vector.broadcast %339 : vector<4x1xf32> to vector<4x32xf32>
    %341 = arith.mulf %336, %340 : vector<4x32xf32>
    %342 = vector.broadcast %322 : vector<1x32xf32> to vector<4x32xf32>
    %343 = arith.mulf %341, %342 : vector<4x32xf32>
    %344 = vector.broadcast %323 : vector<1x32xf32> to vector<4x32xf32>
    %345 = arith.addf %343, %344 : vector<4x32xf32>
    %c0_136 = arith.constant 0 : index
    %c0_137 = arith.constant 0 : index
    %346 = vector.load %arg19[%c0_136, %c0_137] : memref<1x32xf32, #tpu.memory_space<vmem>>, vector<1x32xf32>
    %c0_138 = arith.constant 0 : index
    %c0_139 = arith.constant 0 : index
    %347 = vector.load %arg20[%c0_138, %c0_139] : memref<1x32xf32, #tpu.memory_space<vmem>>, vector<1x32xf32>
    %cst_140 = arith.constant dense<0.000000e+00> : vector<4xf32>
    %348 = vector.multi_reduction <add>, %345, %cst_140 [1] : vector<4x32xf32> to vector<4xf32>
    %349 = vector.shape_cast %348 : vector<4xf32> to vector<4x1xf32>
    %cst_141 = arith.constant 3.200000e+01 : f32
    %350 = vector.broadcast %cst_141 : f32 to vector<4x1xf32>
    %351 = arith.divf %349, %350 : vector<4x1xf32>
    %352 = vector.broadcast %351 : vector<4x1xf32> to vector<4x32xf32>
    %353 = arith.subf %345, %352 : vector<4x32xf32>
    %354 = arith.mulf %353, %353 : vector<4x32xf32>
    %cst_142 = arith.constant dense<0.000000e+00> : vector<4xf32>
    %355 = vector.multi_reduction <add>, %354, %cst_142 [1] : vector<4x32xf32> to vector<4xf32>
    %356 = vector.shape_cast %355 : vector<4xf32> to vector<4x1xf32>
    %cst_143 = arith.constant 3.200000e+01 : f32
    %357 = vector.broadcast %cst_143 : f32 to vector<4x1xf32>
    %358 = arith.divf %356, %357 : vector<4x1xf32>
    %359 = vector.broadcast %351 : vector<4x1xf32> to vector<4x32xf32>
    %360 = arith.subf %345, %359 : vector<4x32xf32>
    %cst_144 = arith.constant 9.99999974E-6 : f32
    %361 = vector.broadcast %cst_144 : f32 to vector<4x1xf32>
    %362 = arith.addf %358, %361 : vector<4x1xf32>
    %363 = math.rsqrt %362 : vector<4x1xf32>
    %364 = vector.broadcast %363 : vector<4x1xf32> to vector<4x32xf32>
    %365 = arith.mulf %360, %364 : vector<4x32xf32>
    %366 = vector.broadcast %346 : vector<1x32xf32> to vector<4x32xf32>
    %367 = arith.mulf %365, %366 : vector<4x32xf32>
    %368 = vector.broadcast %347 : vector<1x32xf32> to vector<4x32xf32>
    %369 = arith.addf %367, %368 : vector<4x32xf32>
    %370 = arith.truncf %369 : vector<4x32xf32> to vector<4x32xbf16>
    %c0_145 = arith.constant 0 : index
    %c0_146 = arith.constant 0 : index
    %371 = vector.load %arg21[%c0_145, %c0_146] : memref<32x128xbf16, #tpu.memory_space<vmem>>, vector<32x128xbf16>
    %cst_147 = arith.constant dense<0.000000e+00> : vector<4x128xf32>
    %372 = tpu.matmul %370, %371, %cst_147 {dimension_numbers = #tpu.dot_dimension_numbers<[1], [0], [0], [1], [0, 0, 1, 1], [], []>} : vector<4x32xbf16>, vector<32x128xbf16>, vector<4x128xf32> -> vector<4x128xf32>
    %c0_148 = arith.constant 0 : index
    %c0_149 = arith.constant 0 : index
    %373 = vector.load %arg22[%c0_148, %c0_149] : memref<1x128xf32, #tpu.memory_space<vmem>>, vector<1x128xf32>
    %374 = vector.broadcast %373 : vector<1x128xf32> to vector<4x128xf32>
    %375 = arith.addf %372, %374 : vector<4x128xf32>
    %c0_150 = arith.constant 0 : index
    %c0_151 = arith.constant 0 : index
    %c0_152 = arith.constant 0 : index
    %376 = vector.load %arg23[%c0_150, %c0_151, %c0_152] : memref<1x4x128xf32, #tpu.memory_space<vmem>>, vector<1x4x128xf32>
    %377 = vector.shape_cast %376 : vector<1x4x128xf32> to vector<4x128xf32>
    %378 = vector.shape_cast %375 : vector<4x128xf32> to vector<1x4x128xf32>
    tpu.vector_store %arg23[%c0_150, %c0_151, %c0_152], %378 {strides = array<i32>} : memref<1x4x128xf32, #tpu.memory_space<vmem>>, vector<1x4x128xf32>,
    return
  }
  func.func @transform_0(%arg0: i32) -> (i32, i32, i32) {
    %c0_i32 = arith.constant 0 : i32
    %c0_i32_0 = arith.constant 0 : i32
    %c0_i32_1 = arith.constant 0 : i32
    return %arg0, %c0_i32, %c0_i32_0 : i32, i32, i32
  }
  func.func @transform_1(%arg0: i32) -> (i32, i32) {
    %c0_i32 = arith.constant 0 : i32
    %c0_i32_0 = arith.constant 0 : i32
    %c0_i32_1 = arith.constant 0 : i32
    return %c0_i32, %c0_i32_0 : i32, i32
  }
  func.func @transform_2(%arg0: i32) -> (i32, i32) {
    %c0_i32 = arith.constant 0 : i32
    %c0_i32_0 = arith.constant 0 : i32
    %c0_i32_1 = arith.constant 0 : i32
    return %c0_i32, %c0_i32_0 : i32, i32
  }
  func.func @transform_3(%arg0: i32) -> (i32, i32) {
    %c0_i32 = arith.constant 0 : i32
    %c0_i32_0 = arith.constant 0 : i32
    %c0_i32_1 = arith.constant 0 : i32
    return %c0_i32, %c0_i32_0 : i32, i32
  }
  func.func @transform_4(%arg0: i32) -> (i32, i32) {
    %c0_i32 = arith.constant 0 : i32
    %c0_i32_0 = arith.constant 0 : i32
    %c0_i32_1 = arith.constant 0 : i32
    return %c0_i32, %c0_i32_0 : i32, i32
  }
  func.func @transform_5(%arg0: i32) -> (i32, i32, i32) {
    %c0_i32 = arith.constant 0 : i32
    %c0_i32_0 = arith.constant 0 : i32
    %c0_i32_1 = arith.constant 0 : i32
    %c0_i32_2 = arith.constant 0 : i32
    return %c0_i32, %c0_i32_0, %c0_i32_1 : i32, i32, i32
  }
  func.func @transform_6(%arg0: i32) -> (i32, i32, i32) {
    %c0_i32 = arith.constant 0 : i32
    %c0_i32_0 = arith.constant 0 : i32
    %c0_i32_1 = arith.constant 0 : i32
    %c0_i32_2 = arith.constant 0 : i32
    return %c0_i32, %c0_i32_0, %c0_i32_1 : i32, i32, i32
  }
  func.func @transform_7(%arg0: i32) -> (i32, i32, i32) {
    %c0_i32 = arith.constant 0 : i32
    %c0_i32_0 = arith.constant 0 : i32
    %c0_i32_1 = arith.constant 0 : i32
    %c0_i32_2 = arith.constant 0 : i32
    return %c0_i32, %c0_i32_0, %c0_i32_1 : i32, i32, i32
  }
  func.func @transform_8(%arg0: i32) -> (i32, i32, i32) {
    %c0_i32 = arith.constant 0 : i32
    %c0_i32_0 = arith.constant 0 : i32
    %c0_i32_1 = arith.constant 0 : i32
    %c0_i32_2 = arith.constant 0 : i32
    return %c0_i32, %c0_i32_0, %c0_i32_1 : i32, i32, i32
  }
  func.func @transform_9(%arg0: i32) -> (i32, i32, i32) {
    %c0_i32 = arith.constant 0 : i32
    %c0_i32_0 = arith.constant 0 : i32
    %c0_i32_1 = arith.constant 0 : i32
    %c0_i32_2 = arith.constant 0 : i32
    return %c0_i32, %c0_i32_0, %c0_i32_1 : i32, i32, i32
  }
  func.func @transform_10(%arg0: i32) -> (i32, i32, i32) {
    %c0_i32 = arith.constant 0 : i32
    %c0_i32_0 = arith.constant 0 : i32
    %c0_i32_1 = arith.constant 0 : i32
    %c0_i32_2 = arith.constant 0 : i32
    return %c0_i32, %c0_i32_0, %c0_i32_1 : i32, i32, i32
  }
  func.func @transform_11(%arg0: i32) -> (i32, i32, i32) {
    %c0_i32 = arith.constant 0 : i32
    %c0_i32_0 = arith.constant 0 : i32
    %c0_i32_1 = arith.constant 0 : i32
    %c0_i32_2 = arith.constant 0 : i32
    return %c0_i32, %c0_i32_0, %c0_i32_1 : i32, i32, i32
  }
  func.func @transform_12(%arg0: i32) -> (i32, i32, i32) {
    %c0_i32 = arith.constant 0 : i32
    %c0_i32_0 = arith.constant 0 : i32
    %c0_i32_1 = arith.constant 0 : i32
    %c0_i32_2 = arith.constant 0 : i32
    return %c0_i32, %c0_i32_0, %c0_i32_1 : i32, i32, i32
  }
  func.func @transform_13(%arg0: i32) -> (i32, i32, i32) {
    %c0_i32 = arith.constant 0 : i32
    %c0_i32_0 = arith.constant 0 : i32
    %c0_i32_1 = arith.constant 0 : i32
    %c0_i32_2 = arith.constant 0 : i32
    return %c0_i32, %c0_i32_0, %c0_i32_1 : i32, i32, i32
  }
  func.func @transform_14(%arg0: i32) -> (i32, i32, i32) {
    %c0_i32 = arith.constant 0 : i32
    %c0_i32_0 = arith.constant 0 : i32
    %c0_i32_1 = arith.constant 0 : i32
    %c0_i32_2 = arith.constant 0 : i32
    return %c0_i32, %c0_i32_0, %c0_i32_1 : i32, i32, i32
  }
  func.func @transform_15(%arg0: i32) -> (i32, i32, i32) {
    %c0_i32 = arith.constant 0 : i32
    %c0_i32_0 = arith.constant 0 : i32
    %c0_i32_1 = arith.constant 0 : i32
    %c0_i32_2 = arith.constant 0 : i32
    return %c0_i32, %c0_i32_0, %c0_i32_1 : i32, i32, i32
  }
  func.func @transform_16(%arg0: i32) -> (i32, i32) {
    %c0_i32 = arith.constant 0 : i32
    %c0_i32_0 = arith.constant 0 : i32
    %c0_i32_1 = arith.constant 0 : i32
    return %c0_i32, %c0_i32_0 : i32, i32
  }
  func.func @transform_17(%arg0: i32) -> (i32, i32) {
    %c0_i32 = arith.constant 0 : i32
    %c0_i32_0 = arith.constant 0 : i32
    %c0_i32_1 = arith.constant 0 : i32
    return %c0_i32, %c0_i32_0 : i32, i32
  }
  func.func @transform_18(%arg0: i32) -> (i32, i32) {
    %c0_i32 = arith.constant 0 : i32
    %c0_i32_0 = arith.constant 0 : i32
    %c0_i32_1 = arith.constant 0 : i32
    return %c0_i32, %c0_i32_0 : i32, i32
  }
  func.func @transform_19(%arg0: i32) -> (i32, i32) {
    %c0_i32 = arith.constant 0 : i32
    %c0_i32_0 = arith.constant 0 : i32
    %c0_i32_1 = arith.constant 0 : i32
    return %c0_i32, %c0_i32_0 : i32, i32
  }
  func.func @transform_20(%arg0: i32) -> (i32, i32) {
    %c0_i32 = arith.constant 0 : i32
    %c0_i32_0 = arith.constant 0 : i32
    %c0_i32_1 = arith.constant 0 : i32
    return %c0_i32, %c0_i32_0 : i32, i32
  }
  func.func @transform_21(%arg0: i32) -> (i32, i32) {
    %c0_i32 = arith.constant 0 : i32
    %c0_i32_0 = arith.constant 0 : i32
    %c0_i32_1 = arith.constant 0 : i32
    return %c0_i32, %c0_i32_0 : i32, i32
  }
  func.func @transform_22(%arg0: i32) -> (i32, i32, i32) {
    %c0_i32 = arith.constant 0 : i32
    %c0_i32_0 = arith.constant 0 : i32
    %c0_i32_1 = arith.constant 0 : i32
    return %arg0, %c0_i32, %c0_i32_0 : i32, i32, i32
  }
}

</mosaic_0001>

<bundles_post_ra>
// kernel: tpu_custom_call.1
= control target key start
LH: loop header
LB: loop body
LE: loop exit
PB: predicated region body
PF: predicated region fallthrough
CT: control target
= control target key end

     0   :  { %s8742_s0 = inlined_call_operand.hbm [shape: f32[4,8,16], index: 0, kind: input, shape index: {}]   ;;  %s8743_s1 = inlined_call_operand.hbm [shape: f32[48,48], index: 1, kind: input, shape index: {}]   ;;  %s8744_s2 = inlined_call_operand.vmem [shape: f32[1,32], index: 2, kind: input, shape index: {}]   ;;  %s8745_s3 = inlined_call_operand.hbm [shape: bf16[16,32], index: 3, kind: input, shape index: {}]   ;;  %s8746_s4 = inlined_call_operand.hbm [shape: f32[1,32], index: 4, kind: input, shape index: {}]   ;;  %s8747_s5 = inlined_call_operand.hbm [shape: f32[2,1,32], index: 5, kind: input, shape index: {}]   ;;  %s8748_s6 = inlined_call_operand.hbm [shape: f32[2,1,32], index: 6, kind: input, shape index: {}]   ;;  %s8749_s7 = inlined_call_operand.hbm [shape: bf16[2,32,96], index: 7, kind: input, shape index: {}]   ;;  %s8750_s8 = inlined_call_operand.hbm [shape: bf16[2,32,32], index: 8, kind: input, shape index: {}]   ;;  %s8751_s9 = inlined_call_operand.hbm [shape: f32[2,1,32], index: 9, kind: input, shape index: {}]   ;;  %s8752_s10 = inlined_call_operand.hbm [shape: f32[2,1,32], index: 10, kind: input, shape index: {}]   ;;  %s8753_s11 = inlined_call_operand.hbm [shape: f32[2,1,32], index: 11, kind: input, shape index: {}]   ;;  %s8754_s12 = inlined_call_operand.vmem [shape: bf16[2,32,32], index: 12, kind: input, shape index: {}]   ;;  %s8755_s13 = inlined_call_operand.hbm [shape: f32[2,1,32], index: 13, kind: input, shape index: {}]   ;;  %s8756_s14 = inlined_call_operand.hbm [shape: bf16[2,32,32], index: 14, kind: input, shape index: {}]   ;;  %s8757_s15 = inlined_call_operand.vmem [shape: f32[2,1,32], index: 15, kind: input, shape index: {}]   ;;  %s8758_s16 = inlined_call_operand.vmem [shape: f32[1,32], index: 16, kind: input, shape index: {}]   ;;  %s8759_s17 = inlined_call_operand.vmem [shape: f32[1,32], index: 17, kind: input, shape index: {}]   ;;  %s8760_s18 = inlined_call_operand.vmem [shape: f32[1,32], index: 18, kind: input, shape index: {}]   ;;  %s8761_s19 = inlined_call_operand.vmem [shape: f32[1,32], index: 19, kind: input, shape index: {}]   ;;  %s8762_s20 = inlined_call_operand.vmem [shape: bf16[32,128], index: 20, kind: input, shape index: {}]   ;;  %s8763_s21 = inlined_call_operand.vmem [shape: f32[1,128], index: 21, kind: input, shape index: {}]   ;;  %s8764_s22 = inlined_call_operand.hbm [shape: f32[1,4,128], index: 22, kind: output, shape index: {}]  }
   0x1   :  { %8778 = sst [smem:[#allocation33_spill]] %s8742_s0 }
   0x2   :  { %8779 = sst [smem:[#allocation34_spill]] %s8743_s1 }
   0x3   :  { %8780 = sst [smem:[#allocation35_spill]] %s8744_s2 }
   0x4   :  { %8781 = sst [smem:[#allocation36_spill]] %s8745_s3 }
   0x5   :  { %8782 = sst [smem:[#allocation37_spill]] %s8746_s4 }
   0x6   :  { %8783 = sst [smem:[#allocation38_spill]] %s8747_s5 }
   0x7   :  { %8784 = sst [smem:[#allocation39_spill]] %s8748_s6 }
   0x8   :  { %8785 = sst [smem:[#allocation40_spill]] %s8763_s21 }
   0x9   :  { %8786 = sst [smem:[#allocation41_spill]] %s8764_s22 }
   0xa   :  { %27 = vsyncpa [#allocation4], 0 }
   0xb   :  { %28 = vsyncpa [#allocation7], 0 }
   0xc   :  { %29 = vsyncpa [#allocation10], 0 }
   0xd   :  { %30 = vsyncpa [#allocation13], 0 }
   0xe   :  { %31 = vsyncpa [#allocation16], 0 }
   0xf   :  { %32 = vsyncpa [#allocation19], 0 }
  0x10   :  { %33 = vsyncpa [#allocation22], 0 }
  0x11   :  { %34 = vsyncpa [#allocation5], 0  ;;  %s6934_s3 = smov [#allocation6]   ;;  %s6935_s29 = smov [#allocation9]  }
  0x12   :  { %s52_s28 = sshll.u32 %s6934_s3, 4  ;;  %s79_s30 = sshll.u32 %s6935_s29, 4  ;;  %s53_s28 = int_to_ptr.vmem [resolvable:$true] %s52_s28  ;;  %s7075_s30 = int_to_ptr.vmem [resolvable:$true] %s79_s30 }
  0x13   :  { %s8787_s23 = sld [smem:[#allocation34_spill]] }
  0x19   :  { %s6610_s1 = scalar_lea.hbm %s8787_s23, 768 }
  0x1a   :  { %p6611_p0 = scmp.ne.s32.totalorder %s8787_s23, %s6610_s1  ;;  %p6614_p1 = scmp.lt.u32.totalorder %s6610_s1, %s8787_s23 }
  0x1c   :  { %p6616_p2 = pnand %p6614_p1, %p6611_p0 }
  0x1e   :  { %6619 = shalt.err (!%p6616_p2)
}
  0x1f   :  { %s6620_s26 = scalar_lea.vmem %s53_s28, 768  ;;  %p6625_p4 = scmp.lt.s32.totalorder %s53_s28, %s53_s28 }
  0x20   :  { %p6621_p3 = scmp.ne.s32.totalorder %s53_s28, %s6620_s26  ;;  %p6626_p5 = scmp.lt.s32.totalorder %s6620_s26, %s6620_s26 }
  0x22   :  { %p6627_p6 = por %p6626_p5, %p6625_p4 }
  0x24   :  { %p6628_p7 = pnand %p6627_p6, %p6621_p3 }
  0x26   :  { %6631 = shalt.err (!%p6628_p7)
}
  0x27   :  { %s8771_s2 = smov 128   ;;  %s8772_s27 = smov 8  }
  0x28   :  { %58 = dma.hbm_to_vmem [thread:$0]  %s8787_s23, 768, %s53_s28, [#allocation7], %s8771_s2, %s8771_s2, %s8772_s27  }
  0x29   :  { %s8788_s1 = sld [smem:[#allocation37_spill]] }
  0x2f   :  { %s6632_s5 = scalar_lea.hbm %s8788_s1, 16 }
  0x30   :  { %p6633_p8 = scmp.ne.s32.totalorder %s8788_s1, %s6632_s5  ;;  %p6636_p9 = scmp.lt.u32.totalorder %s6632_s5, %s8788_s1 }
  0x32   :  { %p6638_p10 = pnand %p6636_p9, %p6633_p8 }
  0x34   :  { %6641 = shalt.err (!%p6638_p10)
}
  0x35   :  { %s6642_s3 = scalar_lea.vmem %s7075_s30, 16  ;;  %s6646_s28 = scalar_lea.vmem %s7075_s30, 32 }
  0x36   :  { %p6643_p11 = scmp.ne.s32.totalorder %s7075_s30, %s6642_s3  ;;  %p6647_p12 = scmp.lt.s32.totalorder %s7075_s30, %s7075_s30 }
  0x37   :  { %p6648_p13 = scmp.lt.s32.totalorder %s6646_s28, %s6642_s3 }
  0x39   :  { %p6649_p0 = por %p6648_p13, %p6647_p12 }
  0x3b   :  { %p6650_p1 = pnand %p6649_p0, %p6643_p11 }
  0x3d   :  { %6653 = shalt.err (!%p6650_p1)
}
  0x3e   :  { %82 = dma.hbm_to_vmem [thread:$0]  %s8788_s1, 16, %s7075_s30, [#allocation10]  }
  0x3f   :  { %s6938_s4 = smov [#allocation12]   ;;  %s8789_s6 = sld [smem:[#allocation39_spill]] }
  0x40   :  { %s100_s0 = sshll.u32 %s6938_s4, 4  ;;  %s101_s0 = int_to_ptr.vmem [resolvable:$true] %s100_s0 }
  0x45   :  { %s6654_s25 = scalar_lea.hbm %s8789_s6, 32 }
  0x46   :  { %p6655_p2 = scmp.ne.s32.totalorder %s8789_s6, %s6654_s25  ;;  %p6658_p3 = scmp.lt.u32.totalorder %s6654_s25, %s8789_s6 }
  0x48   :  { %p6660_p4 = pnand %p6658_p3, %p6655_p2 }
  0x4a   :  { %6663 = shalt.err (!%p6660_p4)
}
  0x4b   :  { %s6664_s27 = scalar_lea.vmem %s101_s0, 32  ;;  %p6669_p6 = scmp.lt.s32.totalorder %s101_s0, %s101_s0 }
  0x4c   :  { %p6665_p5 = scmp.ne.s32.totalorder %s101_s0, %s6664_s27  ;;  %p6670_p7 = scmp.lt.s32.totalorder %s6664_s27, %s6664_s27 }
  0x4e   :  { %p6671_p8 = por %p6670_p7, %p6669_p6 }
  0x50   :  { %p6672_p9 = pnand %p6671_p8, %p6665_p5 }
  0x52   :  { %6675 = shalt.err (!%p6672_p9)
}
  0x53   :  { %s8774_s30 = smov 16   ;;  %s8776_s1 = smov 1  }
  0x54   :  { %106 = dma.hbm_to_vmem [thread:$0]  %s8789_s6, 32, %s101_s0, [#allocation13], %s8774_s30, %s8774_s30, %s8776_s1  }
  0x55   :  { %s6941_s29 = smov [#allocation15]   ;;  %s6942_s5 = smov [#allocation18]  }
  0x56   :  { %s124_s4 = sshll.u32 %s6941_s29, 4  ;;  %s148_s24 = sshll.u32 %s6942_s5, 4  ;;  %s125_s4 = int_to_ptr.vmem [resolvable:$true] %s124_s4  ;;  %s149_s24 = int_to_ptr.vmem [resolvable:$true] %s148_s24 }
  0x57   :  { %s6676_s27 = scalar_lea.hbm %s8750_s8, 512 }
  0x58   :  { %p6677_p10 = scmp.ne.s32.totalorder %s8750_s8, %s6676_s27  ;;  %p6680_p11 = scmp.lt.u32.totalorder %s6676_s27, %s8750_s8 }
  0x5a   :  { %p6682_p12 = pnand %p6680_p11, %p6677_p10 }
  0x5c   :  { %6685 = shalt.err (!%p6682_p12)
}
  0x5d   :  { %s6686_s0 = scalar_lea.vmem %s125_s4, 512  ;;  %p6691_p0 = scmp.lt.s32.totalorder %s125_s4, %s125_s4 }
  0x5e   :  { %p6687_p13 = scmp.ne.s32.totalorder %s125_s4, %s6686_s0  ;;  %p6692_p1 = scmp.lt.s32.totalorder %s6686_s0, %s6686_s0 }
  0x60   :  { %p6693_p2 = por %p6692_p1, %p6691_p0 }
  0x62   :  { %p6694_p3 = pnand %p6693_p2, %p6687_p13 }
  0x64   :  { %6697 = shalt.err (!%p6694_p3)
}
  0x65   :  { %s6943_s6 = smov 64   ;;  %s6944_s2 = smov 4  }
  0x66   :  { %130 = dma.hbm_to_vmem [thread:$0]  %s8750_s8, 512, %s125_s4, [#allocation16], %s6943_s6, %s6943_s6, %s6944_s2  }
  0x67   :  { %s6698_s5 = scalar_lea.hbm %s8752_s10, 32 }
  0x68   :  { %p6699_p4 = scmp.ne.s32.totalorder %s8752_s10, %s6698_s5  ;;  %p6702_p5 = scmp.lt.u32.totalorder %s6698_s5, %s8752_s10 }
  0x6a   :  { %p6704_p6 = pnand %p6702_p5, %p6699_p4 }
  0x6c   :  { %6707 = shalt.err (!%p6704_p6)
}
  0x6d   :  { %s6708_s28 = scalar_lea.vmem %s149_s24, 32  ;;  %p6713_p8 = scmp.lt.s32.totalorder %s149_s24, %s149_s24 }
  0x6e   :  { %p6709_p7 = scmp.ne.s32.totalorder %s149_s24, %s6708_s28  ;;  %p6714_p9 = scmp.lt.s32.totalorder %s6708_s28, %s6708_s28 }
  0x70   :  { %p6715_p10 = por %p6714_p9, %p6713_p8 }
  0x72   :  { %p6716_p11 = pnand %p6715_p10, %p6709_p7 }
  0x74   :  { %6719 = shalt.err (!%p6716_p11)
}
  0x75   :  { %154 = dma.hbm_to_vmem [thread:$0]  %s8752_s10, 32, %s149_s24, [#allocation19], %s8774_s30, %s8774_s30, %s8776_s1  }
  0x76   :  { %s6945_s0 = smov [#allocation21]   ;;  %s6946_s29 = smov [#allocation3]  }
  0x77   :  { %s174_s23 = sshll.u32 %s6945_s0, 4  ;;  %s40_s21 = sshll.u32 %s6946_s29, 4  ;;  %s175_s23 = int_to_ptr.vmem [resolvable:$true] %s174_s23  ;;  %s41_s21 = int_to_ptr.vmem [resolvable:$true] %s40_s21 }
  0x78   :  { %s6720_s25 = scalar_lea.hbm %s8755_s13, 32 }
  0x79   :  { %p6721_p12 = scmp.ne.s32.totalorder %s8755_s13, %s6720_s25  ;;  %p6724_p13 = scmp.lt.u32.totalorder %s6720_s25, %s8755_s13 }
  0x7b   :  { %p6726_p0 = pnand %p6724_p13, %p6721_p12 }
  0x7d   :  { %6729 = shalt.err (!%p6726_p0)
}
  0x7e   :  { %s6730_s10 = scalar_lea.vmem %s175_s23, 32  ;;  %p6735_p2 = scmp.lt.s32.totalorder %s175_s23, %s175_s23 }
  0x7f   :  { %p6731_p1 = scmp.ne.s32.totalorder %s175_s23, %s6730_s10  ;;  %p6736_p3 = scmp.lt.s32.totalorder %s6730_s10, %s6730_s10 }
  0x81   :  { %p6737_p4 = por %p6736_p3, %p6735_p2 }
  0x83   :  { %p6738_p5 = pnand %p6737_p4, %p6731_p1 }
  0x85   :  { %6741 = shalt.err (!%p6738_p5)
}
  0x86   :  { %180 = dma.hbm_to_vmem [thread:$0]  %s8755_s13, 32, %s175_s23, [#allocation22], %s8774_s30, %s8774_s30, %s8776_s1  }
  0x87   :  { %s8790_s29 = sld [smem:[#allocation33_spill]] }
  0x8d   :  { %s6742_s22 = scalar_lea.hbm %s8790_s29, 512 }
  0x8e   :  { %p6743_p6 = scmp.ne.s32.totalorder %s8790_s29, %s6742_s22  ;;  %p6746_p7 = scmp.lt.u32.totalorder %s6742_s22, %s8790_s29 }
  0x90   :  { %p6748_p8 = pnand %p6746_p7, %p6743_p6 }
  0x92   :  { %6751 = shalt.err (!%p6748_p8)
}
  0x93   :  { %s6752_s3 = scalar_lea.vmem %s41_s21, 512  ;;  %p6757_p10 = scmp.lt.s32.totalorder %s41_s21, %s41_s21 }
  0x94   :  { %p6753_p9 = scmp.ne.s32.totalorder %s41_s21, %s6752_s3  ;;  %p6758_p11 = scmp.lt.s32.totalorder %s6752_s3, %s6752_s3 }
  0x96   :  { %p6759_p12 = por %p6758_p11, %p6757_p10 }
  0x98   :  { %p6760_p13 = pnand %p6759_p12, %p6753_p9 }
  0x9a   :  { %6763 = shalt.err (!%p6760_p13)
}
  0x9b   :  { %s8791_s13 = smov 8   ;;  %s8792_s23 = smov 128  }
  0x9c   :  { %46 = dma.hbm_to_vmem [thread:$0]  %s8790_s29, 512, %s41_s21, [#allocation4], %s8792_s23, %s8792_s23, %s8791_s13  }
  0x9d   :  { %s6947_s24 = smov [#allocation8]   ;;  %s6948_s4 = smov [#allocation11]  }
  0x9e   :  { %s66_s8 = sshll.u32 %s6947_s24, 4  ;;  %s88_s0 = sshll.u32 %s6948_s4, 4  ;;  %s67_s8 = int_to_ptr.vmem [resolvable:$true] %s66_s8  ;;  %s89_s0 = int_to_ptr.vmem [resolvable:$true] %s88_s0 }
  0x9f   :  { %s8793_s25 = sld [smem:[#allocation36_spill]] }
  0xa5   :  { %s6764_s26 = scalar_lea.hbm %s8793_s25, 128 }
  0xa6   :  { %p6765_p0 = scmp.ne.s32.totalorder %s8793_s25, %s6764_s26  ;;  %p6768_p1 = scmp.lt.u32.totalorder %s6764_s26, %s8793_s25 }
  0xa8   :  { %p6770_p2 = pnand %p6768_p1, %p6765_p0 }
  0xaa   :  { %6773 = shalt.err (!%p6770_p2)
}
  0xab   :  { %s6774_s21 = scalar_lea.vmem %s67_s8, 128  ;;  %p6779_p4 = scmp.lt.s32.totalorder %s67_s8, %s67_s8 }
  0xac   :  { %p6775_p3 = scmp.ne.s32.totalorder %s67_s8, %s6774_s21  ;;  %p6780_p5 = scmp.lt.s32.totalorder %s6774_s21, %s6774_s21 }
  0xae   :  { %p6781_p6 = por %p6780_p5, %p6779_p4 }
  0xb0   :  { %p6782_p7 = pnand %p6781_p6, %p6775_p3 }
  0xb2   :  { %6785 = shalt.err (!%p6782_p7)
}
  0xb3   :  { %72 = dma.hbm_to_vmem [thread:$0]  %s8793_s25, 128, %s67_s8, [#allocation7], %s6943_s6, %s6943_s6, %s6944_s2  }
  0xb4   :  { %s8794_s1 = sld [smem:[#allocation38_spill]] }
  0xba   :  { %s6786_s28 = scalar_lea.hbm %s8794_s1, 32 }
  0xbb   :  { %p6787_p8 = scmp.ne.s32.totalorder %s8794_s1, %s6786_s28  ;;  %p6790_p9 = scmp.lt.u32.totalorder %s6786_s28, %s8794_s1 }
  0xbd   :  { %p6792_p10 = pnand %p6790_p9, %p6787_p8 }
  0xbf   :  { %6795 = shalt.err (!%p6792_p10)
}
  0xc0   :  { %s6796_s5 = scalar_lea.vmem %s89_s0, 32  ;;  %p6801_p12 = scmp.lt.s32.totalorder %s89_s0, %s89_s0 }
  0xc1   :  { %p6797_p11 = scmp.ne.s32.totalorder %s89_s0, %s6796_s5  ;;  %p6802_p13 = scmp.lt.s32.totalorder %s6796_s5, %s6796_s5 }
  0xc3   :  { %p6803_p0 = por %p6802_p13, %p6801_p12 }
  0xc5   :  { %p6804_p1 = pnand %p6803_p0, %p6797_p11 }
  0xc7   :  { %6807 = shalt.err (!%p6804_p1)
}
  0xc8   :  { %s8795_s8 = smov 1   ;;  %s8796_s25 = smov 16  }
  0xc9   :  { %94 = dma.hbm_to_vmem [thread:$0]  %s8794_s1, 32, %s89_s0, [#allocation10], %s8796_s25, %s8796_s25, %s8795_s8  }
  0xca   :  { %s6949_s3 = smov [#allocation14]   ;;  %s6950_s29 = smov [#allocation17]  }
  0xcb   :  { %s112_s21 = sshll.u32 %s6949_s3, 4  ;;  %s136_s13 = sshll.u32 %s6950_s29, 4  ;;  %s113_s21 = int_to_ptr.vmem [resolvable:$true] %s112_s21  ;;  %s137_s13 = int_to_ptr.vmem [resolvable:$true] %s136_s13 }
  0xcc   :  { %s6808_s28 = scalar_lea.hbm %s8749_s7, 512 }
  0xcd   :  { %p6809_p2 = scmp.ne.s32.totalorder %s8749_s7, %s6808_s28  ;;  %p6812_p3 = scmp.lt.u32.totalorder %s6808_s28, %s8749_s7 }
  0xcf   :  { %p6814_p4 = pnand %p6812_p3, %p6809_p2 }
  0xd1   :  { %6817 = shalt.err (!%p6814_p4)
}
  0xd2   :  { %s6818_s0 = scalar_lea.vmem %s113_s21, 512  ;;  %p6823_p6 = scmp.lt.s32.totalorder %s113_s21, %s113_s21 }
  0xd3   :  { %p6819_p5 = scmp.ne.s32.totalorder %s113_s21, %s6818_s0  ;;  %p6824_p7 = scmp.lt.s32.totalorder %s6818_s0, %s6818_s0 }
  0xd5   :  { %p6825_p8 = por %p6824_p7, %p6823_p6 }
  0xd7   :  { %p6826_p9 = pnand %p6825_p8, %p6819_p5 }
  0xd9   :  { %6829 = shalt.err (!%p6826_p9)
}
  0xda   :  { %118 = dma.hbm_to_vmem [thread:$0]  %s8749_s7, 512, %s113_s21, [#allocation13], %s6943_s6, %s6943_s6, %s6944_s2  }
  0xdb   :  { %s6830_s3 = scalar_lea.hbm %s8751_s9, 32 }
  0xdc   :  { %p6831_p10 = scmp.ne.s32.totalorder %s8751_s9, %s6830_s3  ;;  %p6834_p11 = scmp.lt.u32.totalorder %s6830_s3, %s8751_s9 }
  0xde   :  { %p6836_p12 = pnand %p6834_p11, %p6831_p10 }
  0xe0   :  { %6839 = shalt.err (!%p6836_p12)
}
  0xe1   :  { %s6840_s10 = scalar_lea.vmem %s137_s13, 32  ;;  %p6845_p0 = scmp.lt.s32.totalorder %s137_s13, %s137_s13 }
  0xe2   :  { %p6841_p13 = scmp.ne.s32.totalorder %s137_s13, %s6840_s10  ;;  %p6846_p1 = scmp.lt.s32.totalorder %s6840_s10, %s6840_s10 }
  0xe4   :  { %p6847_p2 = por %p6846_p1, %p6845_p0 }
  0xe6   :  { %p6848_p3 = pnand %p6847_p2, %p6841_p13 }
  0xe8   :  { %6851 = shalt.err (!%p6848_p3)
}
  0xe9   :  { %142 = dma.hbm_to_vmem [thread:$0]  %s8751_s9, 32, %s137_s13, [#allocation16], %s8796_s25, %s8796_s25, %s8795_s8  }
  0xea   :  { %s6951_s24 = smov [#allocation20]   ;;  %s6952_s22 = smov [#allocation23]  }
  0xeb   :  { %s160_s4 = sshll.u32 %s6951_s24, 4  ;;  %s186_s0 = sshll.u32 %s6952_s22, 4  ;;  %s161_s4 = int_to_ptr.vmem [resolvable:$true] %s160_s4  ;;  %s187_s0 = int_to_ptr.vmem [resolvable:$true] %s186_s0 }
  0xec   :  { %s6852_s26 = scalar_lea.hbm %s8753_s11, 32 }
  0xed   :  { %p6853_p4 = scmp.ne.s32.totalorder %s8753_s11, %s6852_s26  ;;  %p6856_p5 = scmp.lt.u32.totalorder %s6852_s26, %s8753_s11 }
  0xef   :  { %p6858_p6 = pnand %p6856_p5, %p6853_p4 }
  0xf1   :  { %6861 = shalt.err (!%p6858_p6)
}
  0xf2   :  { %s6862_s9 = scalar_lea.vmem %s161_s4, 32  ;;  %p6867_p8 = scmp.lt.s32.totalorder %s161_s4, %s161_s4 }
  0xf3   :  { %p6863_p7 = scmp.ne.s32.totalorder %s161_s4, %s6862_s9  ;;  %p6868_p9 = scmp.lt.s32.totalorder %s6862_s9, %s6862_s9 }
  0xf5   :  { %p6869_p10 = por %p6868_p9, %p6867_p8 }
  0xf7   :  { %p6870_p11 = pnand %p6869_p10, %p6863_p7 }
  0xf9   :  { %6873 = shalt.err (!%p6870_p11)
}
  0xfa   :  { %166 = dma.hbm_to_vmem [thread:$0]  %s8753_s11, 32, %s161_s4, [#allocation19], %s8796_s25, %s8796_s25, %s8795_s8  }
  0xfb   :  { %s6874_s7 = scalar_lea.hbm %s8756_s14, 512 }
  0xfc   :  { %p6875_p12 = scmp.ne.s32.totalorder %s8756_s14, %s6874_s7  ;;  %p6878_p13 = scmp.lt.u32.totalorder %s6874_s7, %s8756_s14 }
  0xfe   :  { %p6880_p0 = pnand %p6878_p13, %p6875_p12 }
 0x100   :  { %6883 = shalt.err (!%p6880_p0)
}
 0x101   :  { %s6884_s5 = scalar_lea.vmem %s187_s0, 512  ;;  %p6889_p2 = scmp.lt.s32.totalorder %s187_s0, %s187_s0 }
 0x102   :  { %p6885_p1 = scmp.ne.s32.totalorder %s187_s0, %s6884_s5  ;;  %p6890_p3 = scmp.lt.s32.totalorder %s6884_s5, %s6884_s5 }
 0x104   :  { %p6891_p4 = por %p6890_p3, %p6889_p2 }
 0x106   :  { %p6892_p5 = pnand %p6891_p4, %p6885_p1 }
 0x108   :  { %6895 = shalt.err (!%p6892_p5)
}
 0x109   :  { %192 = dma.hbm_to_vmem [thread:$0]  %s8756_s14, 512, %s187_s0, [#allocation22], %s6943_s6, %s6943_s6, %s6944_s2  }
 0x10a   :  { %6918 = dma.done.wait [#allocation4], 512  }
 0x10b   :  { %6919 = vsyncadd [#allocation4], 4294966784 }
 0x10c   :  { %6920 = dma.done.wait [#allocation7], 896  }
 0x10d   :  { %6921 = vsyncadd [#allocation7], 4294966400 }
 0x10e   :  { %6922 = dma.done.wait [#allocation10], 48  }
 0x10f   :  { %6923 = vsyncadd [#allocation10], 4294967248 }
 0x110   :  { %6924 = dma.done.wait [#allocation13], 544  }
 0x111   :  { %6925 = vsyncadd [#allocation13], 4294966752 }
 0x112   :  { %6926 = dma.done.wait [#allocation16], 544  }
 0x113   :  { %6927 = vsyncadd [#allocation16], 4294966752 }
 0x114   :  { %6928 = dma.done.wait [#allocation19], 64  }
 0x115   :  { %6929 = vsyncadd [#allocation19], 4294967232 }
 0x116   :  { %6930 = dma.done.wait [#allocation22], 544  }
 0x117   :  { %6931 = vsyncadd [#allocation22], 4294966752  ;;  %v6311_v0 = vld [vmem:[#allocation8] sm:$0xff]   ;;  %v247_v1 = vld [vmem:[#allocation3] sm:$0xff]  ;;  %vm268_vm0 = vcmask 130048   ;;  %s8797_s25 = sld [smem:[#allocation35_spill]] }
 0x118   :  { %v248_v2 = vld [vmem:[#allocation3 + $0x8] sm:$0xff]  ;;  %v249_v3 = vld [vmem:[#allocation3 + $0x10] sm:$0xff]  ;;  %5259 = vmatprep.subr.bf16.mxu1 %v6311_v0  ;;  %v250_v5 = vld [vmem:[#allocation3 + $0x18] sm:$0xff]  ;;  %vm335_vm1 = vcmask 257024   ;;  %vm337_vm2 = vcmask 261120   ;;  %v6953_v8 = vmov 0.0  }
 0x119   :  { %v251_v4 = vpack.c.bf16 %v248_v2, %v247_v1  ;;  %5260 = vmatpush3.bf16.msra.mxu1 %v6311_v0  ;;  %v252_v6 = vpack.c.bf16 %v250_v5, %v249_v3  ;;  %342 = vst.msk [vmem:[#allocation2 + $0x24] sm:$0xff] %vm337_vm2, %v6953_v8  ;;  %v4805_v9 = vld [vmem:[#allocation9] ss:$0 sm:$0xff]  ;;  %v6312_v0 = vld [vmem:[#allocation14] sm:$0xff]   ;;  %v6313_v1 = vld [vmem:[#allocation14 + $0x8] sm:$0xff]   ;;  %vm6954_vm3 = vmmov 0  }
 0x11a   :  { %343 = vst.msk [vmem:[#allocation2 + $0x2c] sm:$0xf] %vm335_vm1, %v6953_v8  ;;  %5265 = vmatprep.subr.bf16.mxu1 %v6953_v8  ;;  %vm600_vm4 = vcmask 64512   ;;  %s6955_s4 = smov 120   ;;  %s6956_s0 = smov 112   ;;  %vm1113_vm6 = vcmask 392192  }
 0x11b   :  { %5261 = vmatprep.mubr.msk.bf16.mxu1 %vm268_vm0, %v251_v4  ;;  %s6957_s26 = smov 104   ;;  %s6958_s27 = smov 96   ;;  %vm7473_vm5 = vmpackc.low %vm600_vm4, %vm600_vm4 }
 0x11c   :  { %5262 = vmatmul.mubr.msk.bf16.vlgmr.msra.gmra.mrb[0].mxu1 %vm268_vm0, %v252_v6 }
 0x11d   :  { %v4809_v7 = vld [vmem:[%s8797_s25] ss:$0 sm:$0xff]  ;;  %5266 = vmatpush3.bf16.msra.mxu1 %v6312_v0  ;;  %5269 = vmatprep.mubr.msk.bf16.mxu1 %vm6954_vm3, %v6953_v8 }
 0x11e   :  { %336 = vst.msk [vmem:[#allocation2] sm:$0xf] %vm335_vm1, %v4809_v7  ;;  %5267 = vmatprep.subr.bf16.mxu1 %v6953_v8 }
 0x121   :  { %v349_v30 = vld [vmem:[#allocation2 + $0x28] sm:$0xff]  ;;  %5268 = vmatpush3.bf16.msra.mxu1 %v6313_v1 }
 0x122   :  { %v373_v33 = vsel %vm337_vm2, %v349_v30, 0.0 }
 0x1ef   :  { %v5263_v10 = vpop.f32.mrb[0].mxu1 }
 0x1f0   :  { %v318_v11 = vadd.f32 %v5263_v10, %v4805_v9  ;;  %v309_v12 = vpop.f32.mrb[1].mxu1 }
 0x1f1   :  { %v310_v13 = vadd.f32 %v4805_v9, %v309_v12  ;;  %v5264_v14 = vpop.f32.mrb[2].mxu1 }
 0x1f2   :  { %v326_v15 = vmax.f32 %v318_v11, 0.0  ;;  %v321_v16 = vadd.f32 %v5264_v14, %v4805_v9  ;;  %v312_v17 = vpop.f32.mrb[3].mxu1 }
 0x1f3   :  { %v324_v18 = vmax.f32 %v310_v13, 0.0  ;;  %v313_v19 = vadd.f32 %v4805_v9, %v312_v17 }
 0x1f4   :  { %340 = vst.msk [vmem:[#allocation2 + $0x14] sm:$0xff] %vm337_vm2, %v326_v15  ;;  %v327_v20 = vmax.f32 %v321_v16, 0.0 }
 0x1f5   :  { %338 = vst.msk [vmem:[#allocation2 + $0x4] sm:$0xff] %vm337_vm2, %v324_v18  ;;  %v325_v21 = vmax.f32 %v313_v19, 0.0 }
 0x1f6   :  { %341 = vst.msk [vmem:[#allocation2 + $0x1c] sm:$0xff] %vm337_vm2, %v327_v20 }
 0x1f7   :  { %339 = vst.msk [vmem:[#allocation2 + $0xc] sm:$0xff] %vm337_vm2, %v325_v21 }
 0x1fc   :  { %v344_v22 = vld [vmem:[#allocation2] sm:$0xff] }
 0x1fd   :  { %v358_v23 = vsel %vm337_vm2, %v344_v22, 0.0  ;;  %v347_v27 = vld [vmem:[#allocation2 + $0x18] sm:$0xff]  ;;  %v348_v29 = vld [vmem:[#allocation2 + $0x20] sm:$0xff] }
 0x1fe   :  { %359 = vadd.xlane.f32.xlu0 %v358_v23  ;;  %v346_v24 = vld [vmem:[#allocation2 + $0x10] sm:$0xff]  ;;  %v345_v25 = vld [vmem:[#allocation2 + $0x8] sm:$0xff]  ;;  %v367_v31 = vsel %vm337_vm2, %v347_v27, 0.0  ;;  %v370_v32 = vsel %vm337_vm2, %v348_v29, 0.0 }
 0x1ff   :  { %v364_v26 = vsel %vm337_vm2, %v346_v24, 0.0  ;;  %v361_v28 = vsel %vm337_vm2, %v345_v25, 0.0  ;;  %v4810_v23 = vld [vmem:[#allocation11] ss:$0 sm:$0xff] }
 0x200   :  { %365 = vadd.xlane.f32.xlu1 %v364_v26 }
 0x202   :  { %362 = vadd.xlane.f32.xlu0 %v361_v28  ;;  %v4811_v28 = vld [vmem:[#allocation12] ss:$0 sm:$0xff] }
 0x204   :  { %368 = vadd.xlane.f32.xlu1 %v367_v31 }
 0x206   :  { %371 = vadd.xlane.f32.xlu0 %v370_v32 }
 0x208   :  { %374 = vadd.xlane.f32.xlu1 %v373_v33 }
 0x28b   :  { %v360_v34 = vpop.xlane.xlu0 %359 }
 0x28c   :  { %v377_v35 = vmul.f32 0.03125, %v360_v34 }
 0x28d   :  { %v366_v36 = vpop.xlane.xlu1 %365 }
 0x28e   :  { %v7294_v37 = vsub.f32 %v344_v22, %v377_v35  ;;  %v379_v38 = vmul.f32 0.03125, %v366_v36 }
 0x28f   :  { %v363_v39 = vpop.xlane.xlu0 %362 }
 0x290   :  { %v7296_v40 = vsub.f32 %v346_v24, %v379_v38  ;;  %v378_v41 = vmul.f32 0.03125, %v363_v39  ;;  %v389_v42 = vmul.f32 %v7294_v37, %v7294_v37 }
 0x291   :  { %v369_v43 = vpop.xlane.xlu1 %368 }
 0x292   :  { %v384_v44 = vsub.f32 %v345_v25, %v378_v41  ;;  %v380_v45 = vmul.f32 0.03125, %v369_v43  ;;  %v395_v46 = vsel %vm337_vm2, %v389_v42, 0.0  ;;  %v391_v47 = vmul.f32 %v7296_v40, %v7296_v40 }
 0x293   :  { %396 = vadd.xlane.f32.xlu0 %v395_v46  ;;  %v372_v48 = vpop.xlane.xlu0 %371 }
 0x294   :  { %v7303_v49 = vsub.f32 %v347_v27, %v380_v45  ;;  %v381_v50 = vmul.f32 0.03125, %v372_v48  ;;  %v390_v51 = vmul.f32 %v384_v44, %v384_v44  ;;  %v401_v53 = vsel %vm337_vm2, %v391_v47, 0.0 }
 0x295   :  { %v375_v52 = vpop.xlane.xlu1 %374 }
 0x296   :  { %v7306_v54 = vsub.f32 %v348_v29, %v381_v50  ;;  %v382_v55 = vmul.f32 0.03125, %v375_v52  ;;  %v398_v56 = vsel %vm337_vm2, %v390_v51, 0.0  ;;  %v392_v57 = vmul.f32 %v7303_v49, %v7303_v49 }
 0x297   :  { %402 = vadd.xlane.f32.xlu0 %v401_v53  ;;  %399 = vadd.xlane.f32.xlu1 %v398_v56 }
 0x298   :  { %v388_v58 = vsub.f32 %v349_v30, %v382_v55  ;;  %v393_v59 = vmul.f32 %v7306_v54, %v7306_v54  ;;  %v404_v60 = vsel %vm337_vm2, %v392_v57, 0.0 }
 0x29a   :  { %v407_v61 = vsel %vm337_vm2, %v393_v59, 0.0  ;;  %v394_v62 = vmul.f32 %v388_v58, %v388_v58 }
 0x29b   :  { %405 = vadd.xlane.f32.xlu1 %v404_v60  ;;  %408 = vadd.xlane.f32.xlu0 %v407_v61 }
 0x29c   :  { %v410_v63 = vsel %vm337_vm2, %v394_v62, 0.0 }
 0x29f   :  { %411 = vadd.xlane.f32.xlu1 %v410_v63 }
 0x320   :  { %v397_v2 = vpop.xlane.xlu0 %396 }
 0x321   :  { %v413_v3 = vmul.f32 0.03125, %v397_v2 }
 0x323   :  { %v419_v4 = vadd.f32 1e-05, %v413_v3 }
 0x324   :  { %v400_v5 = vpop.xlane.xlu1 %399  ;;  %v403_v6 = vpop.xlane.xlu0 %402 }
 0x325   :  { %6330 = vrsqrt.f32 %v419_v4  ;;  %v414_v7 = vmul.f32 0.03125, %v400_v5  ;;  %v415_v9 = vmul.f32 0.03125, %v403_v6 }
 0x327   :  { %v420_v10 = vadd.f32 1e-05, %v414_v7  ;;  %v421_v11 = vadd.f32 1e-05, %v415_v9 }
 0x328   :  { %v406_v12 = vpop.xlane.xlu1 %405  ;;  %v409_v13 = vpop.xlane.xlu0 %408 }
 0x329   :  { %6332 = vrsqrt.f32 %v420_v10  ;;  %v416_v14 = vmul.f32 0.03125, %v406_v12  ;;  %v417_v16 = vmul.f32 0.03125, %v409_v13 }
 0x32a   :  { %6334 = vrsqrt.f32 %v421_v11 }
 0x32b   :  { %v422_v15 = vadd.f32 1e-05, %v416_v14  ;;  %v423_v20 = vadd.f32 1e-05, %v417_v16 }
 0x32c   :  { %v412_v17 = vpop.xlane.xlu1 %411 }
 0x32d   :  { %6336 = vrsqrt.f32 %v422_v15  ;;  %v418_v18 = vmul.f32 0.03125, %v412_v17 }
 0x32f   :  { %v6331_v19 = vpop.eup %6330  ;;  %v424_v21 = vadd.f32 1e-05, %v418_v18 }
 0x330   :  { %v431_v22 = vmul.f32 %v6331_v19, %v7294_v37 }
 0x331   :  { %6338 = vrsqrt.f32 %v424_v21 }
 0x332   :  { %6340 = vrsqrt.f32 %v423_v20  ;;  %v443_v25 = vmul.f32 %v4810_v23, %v431_v22 }
 0x333   :  { %v6333_v24 = vpop.eup %6332 }
 0x334   :  { %v432_v26 = vmul.f32 %v6333_v24, %v384_v44  ;;  %v6335_v27 = vpop.eup %6334  ;;  %v455_v32 = vadd.f32 %v4811_v28, %v443_v25 }
 0x335   :  { %v433_v31 = vmul.f32 %v6335_v27, %v7296_v40 }
 0x336   :  { %v444_v29 = vmul.f32 %v4810_v23, %v432_v26 }
 0x337   :  { %v6337_v30 = vpop.eup %6336  ;;  %v445_v37 = vmul.f32 %v4810_v23, %v433_v31 }
 0x338   :  { %v456_v33 = vadd.f32 %v4811_v28, %v444_v29  ;;  %v434_v34 = vmul.f32 %v6337_v30, %v7303_v49 }
 0x339   :  { %v457_v44 = vadd.f32 %v4811_v28, %v445_v37 }
 0x33a   :  { %v461_v35 = vpack.c.bf16 %v456_v33, %v455_v32  ;;  %v446_v36 = vmul.f32 %v4810_v23, %v434_v34 }
 0x33b   :  { %v6339_v38 = vpop.eup %6338 }
 0x33c   :  { %5270 = vmatmul.mubr.msk.bf16.vlgmr.msra.gmra.mrb[4].mxu1 %vm337_vm2, %v461_v35  ;;  %v6341_v39 = vpop.eup %6340  ;;  %v458_v41 = vadd.f32 %v4811_v28, %v446_v36  ;;  %v436_v42 = vmul.f32 %v6339_v38, %v388_v58 }
 0x33d   :  { %5273 = vmatprep.mubr.msk.bf16.mxu1 %vm6954_vm3, %v6953_v8  ;;  %v435_v43 = vmul.f32 %v6341_v39, %v7306_v54 }
 0x33e   :  { %v462_v40 = vpack.c.bf16 %v458_v41, %v457_v44  ;;  %v448_v45 = vmul.f32 %v4810_v23, %v436_v42 }
 0x33f   :  { %v447_v46 = vmul.f32 %v4810_v23, %v435_v43 }
 0x340   :  { %v460_v47 = vadd.f32 %v4811_v28, %v448_v45 }
 0x341   :  { %v459_v48 = vadd.f32 %v4811_v28, %v447_v46 }
 0x343   :  { %v463_v49 = vpack.c.bf16 %v460_v47, %v459_v48 }
 0x344   :  { %5274 = vmatmul.mubr.msk.bf16.gmra.mrb[8].mxu1 %vm337_vm2, %v462_v40 }
 0x345   :  { %5277 = vmatprep.mubr.msk.bf16.mxu1 %vm6954_vm3, %v6953_v8 }
 0x34c   :  { %5278 = vmatmul.mubr.msk.bf16.gmra.mrb[12].mxu1 %vm337_vm2, %v463_v49 }
 0x40f   :  { %v523_v50 = vpop.f32.mrb[4].mxu1 }
 0x410   :  { %552 = vrot.lane.b32.xlu0 %v523_v50, %s6955_s4  ;;  %v5271_v51 = vpop.f32.mrb[5].mxu1  ;;  %5293 = vmatprep.mubr.msk.f32.mxu0 %vm600_vm4, %v523_v50 }
 0x411   :  { %v7332_v52 = vpop.f32.mrb[6].mxu1 }
 0x412   :  { %554 = vrot.lane.b32.xlu1 %v7332_v52, %s6955_s4  ;;  %v5272_v53 = vpop.f32.mrb[7].mxu1  ;;  %v7337_v54 = vpack.i.bf16 %v7332_v52, %v523_v50 }
 0x417   :  { %v7339_v55 = vpop.f32.mrb[8].mxu1 }
 0x418   :  { %556 = vrot.lane.b32.xlu1 %v7339_v55, %s6955_s4  ;;  %v5275_v56 = vpop.f32.mrb[9].mxu1 }
 0x419   :  { %v7343_v57 = vpop.f32.mrb[10].mxu1 }
 0x41a   :  { %v5276_v58 = vpop.f32.mrb[11].mxu1  ;;  %v7347_v59 = vpack.i.bf16 %v7343_v57, %v7339_v55 }
 0x41c   :  { %558 = vrot.lane.b32.xlu1 %v7343_v57, %s6955_s4 }
 0x41f   :  { %v7351_v60 = vpop.f32.mrb[12].mxu1 }
 0x420   :  { %560 = vrot.lane.b32.xlu0 %v7351_v60, %s6955_s4  ;;  %v5279_v61 = vpop.f32.mrb[13].mxu1 }
 0x421   :  { %v7355_v62 = vpop.f32.mrb[14].mxu1 }
 0x422   :  { %562 = vrot.lane.b32.xlu1 %v7355_v62, %s6955_s4  ;;  %v5280_v63 = vpop.f32.mrb[15].mxu1  ;;  %v7361_v0 = vpack.i.bf16 %v7355_v62, %v7351_v60 }
 0x424   :  { %564 = vrot.lane.b32.xlu0 %v523_v50, %s6956_s0 }
 0x426   :  { %566 = vrot.lane.b32.xlu1 %v7332_v52, %s6956_s0 }
 0x428   :  { %576 = vrot.lane.b32.xlu0 %v523_v50, %s6957_s26 }
 0x42a   :  { %578 = vrot.lane.b32.xlu1 %v7332_v52, %s6957_s26 }
 0x42c   :  { %568 = vrot.lane.b32.xlu0 %v7339_v55, %s6956_s0 }
 0x42e   :  { %570 = vrot.lane.b32.xlu1 %v7343_v57, %s6956_s0 }
 0x430   :  { %580 = vrot.lane.b32.xlu0 %v7339_v55, %s6957_s26 }
 0x432   :  { %582 = vrot.lane.b32.xlu1 %v7343_v57, %s6957_s26 }
 0x434   :  { %572 = vrot.lane.b32.xlu0 %v7351_v60, %s6956_s0 }
 0x436   :  { %574 = vrot.lane.b32.xlu1 %v7355_v62, %s6956_s0 }
 0x438   :  { %584 = vrot.lane.b32.xlu0 %v7351_v60, %s6957_s26 }
 0x43a   :  { %586 = vrot.lane.b32.xlu1 %v7355_v62, %s6957_s26 }
 0x43c   :  { %6004 = vrot.lane.b32.xlu0 %v7337_v54, %s6958_s27 }
 0x440   :  { %6014 = vrot.lane.b32.xlu0 %v7347_v59, %s6958_s27 }
 0x444   :  { %6024 = vrot.lane.b32.xlu0 %v7361_v0, %s6958_s27 }
 0x482   :  { %v553_v1 = vpop.permute.xlu0 %552 }
 0x483   :  { %5314 = vmatprep.mubr.msk.f32.mxu1 %vm600_vm4, %v553_v1 }
 0x484   :  { %v7392_v2 = vpop.permute.xlu1 %554 }
 0x485   :  { %v6008_v3 = vpack.i.bf16 %v7392_v2, %v553_v1 }
 0x487   :  { %6009 = vrot.lane.b32.xlu1 %v6008_v3, %s6958_s27 }
 0x48a   :  { %v7396_v4 = vpop.permute.xlu1 %556 }
 0x48e   :  { %v7398_v5 = vpop.permute.xlu1 %558 }
 0x48f   :  { %v6018_v6 = vpack.i.bf16 %v7398_v5, %v7396_v4 }
 0x491   :  { %6019 = vrot.lane.b32.xlu1 %v6018_v6, %s6958_s27 }
 0x492   :  { %v7403_v7 = vpop.permute.xlu0 %560 }
 0x494   :  { %v7405_v9 = vpop.permute.xlu1 %562 }
 0x495   :  { %v7409_v10 = vpack.i.bf16 %v7405_v9, %v7403_v7 }
 0x496   :  { %v565_v11 = vpop.permute.xlu0 %564 }
 0x497   :  { %6029 = vrot.lane.b32.xlu1 %v7409_v10, %s6958_s27 }
 0x498   :  { %v7413_v12 = vpop.permute.xlu1 %566 }
 0x499   :  { %v7416_v13 = vpack.i.bf16 %v7413_v12, %v565_v11 }
 0x49a   :  { %v7418_v14 = vpop.permute.xlu0 %576 }
 0x49b   :  { %6034 = vrot.lane.b32.xlu0 %v7416_v13, %s6958_s27 }
 0x49c   :  { %v7422_v15 = vpop.permute.xlu1 %578 }
 0x49d   :  { %v7426_v16 = vpack.i.bf16 %v7422_v15, %v7418_v14 }
 0x49e   :  { %v7428_v17 = vpop.permute.xlu0 %568 }
 0x49f   :  { %6039 = vrot.lane.b32.xlu1 %v7426_v16, %s6958_s27 }
 0x4a0   :  { %v7432_v18 = vpop.permute.xlu1 %570 }
 0x4a1   :  { %v7436_v19 = vpack.i.bf16 %v7432_v18, %v7428_v17 }
 0x4a2   :  { %v7438_v20 = vpop.permute.xlu0 %580 }
 0x4a3   :  { %6044 = vrot.lane.b32.xlu0 %v7436_v19, %s6958_s27 }
 0x4a4   :  { %v7442_v21 = vpop.permute.xlu1 %582 }
 0x4a5   :  { %v7446_v22 = vpack.i.bf16 %v7442_v21, %v7438_v20 }
 0x4a6   :  { %v7448_v23 = vpop.permute.xlu0 %572 }
 0x4a7   :  { %6049 = vrot.lane.b32.xlu1 %v7446_v22, %s6958_s27 }
 0x4a8   :  { %v7452_v24 = vpop.permute.xlu1 %574 }
 0x4a9   :  { %v7456_v25 = vpack.i.bf16 %v7452_v24, %v7448_v23 }
 0x4aa   :  { %v7458_v26 = vpop.permute.xlu0 %584 }
 0x4ab   :  { %6054 = vrot.lane.b32.xlu0 %v7456_v25, %s6958_s27 }
 0x4ac   :  { %v7462_v27 = vpop.permute.xlu1 %586 }
 0x4ad   :  { %v7466_v28 = vpack.i.bf16 %v7462_v27, %v7458_v26 }
 0x4ae   :  { %v6005_v29 = vpop.permute.xlu0 %6004 }
 0x4af   :  { %6069 = vrot.lane.b32.xlu0 %v6008_v3, %s6943_s6  ;;  %6059 = vrot.lane.b32.xlu1 %v7466_v28, %s6958_s27  ;;  %v6007_v30 = vunpack.i.h.bf16 %v6005_v29  ;;  %v6006_v31 = vunpack.i.l.bf16 %v6005_v29 }
 0x4b1   :  { %v5737_v33 = vpack.c.bf16 %v6007_v30, %v6006_v31 }
 0x4b2   :  { %v6015_v34 = vpop.permute.xlu0 %6014 }
 0x4b3   :  { %v6017_v35 = vunpack.i.h.bf16 %v6015_v34  ;;  %v6016_v36 = vunpack.i.l.bf16 %v6015_v34  ;;  %6064 = vrot.lane.b32.xlu1 %v7337_v54, %s6943_s6  ;;  %5739 = vmatprep.subr.msk.bf16.mxu0 %vm7473_vm5, %v5737_v33 }
 0x4b4   :  { %5742 = vmatpush3.bf16.xpose.msk.msra.mxu0 %vm7473_vm5, %v5737_v33 }
 0x4b5   :  { %v5743_v38 = vpack.c.bf16 %v6017_v35, %v6016_v36 }
 0x4b6   :  { %v6025_v37 = vpop.permute.xlu0 %6024 }
 0x4b7   :  { %v6027_v39 = vunpack.i.h.bf16 %v6025_v37  ;;  %v6026_v41 = vunpack.i.l.bf16 %v6025_v37  ;;  %6074 = vrot.lane.b32.xlu1 %v7347_v59, %s6943_s6  ;;  %5745 = vmatprep.subr.msk.bf16.mxu0 %vm7473_vm5, %v5743_v38 }
 0x4b9   :  { %v5749_v42 = vpack.c.bf16 %v6027_v39, %v6026_v41 }
 0x4bb   :  { %6079 = vrot.lane.b32.xlu1 %v6018_v6, %s6943_s6 }
 0x4bc   :  { %5748 = vmatpush3.bf16.xpose.msk.msra.mxu0 %vm7473_vm5, %v5743_v38 }
 0x4bd   :  { %5751 = vmatprep.subr.msk.bf16.mxu0 %vm7473_vm5, %v5749_v42 }
 0x4c4   :  { %5754 = vmatpush3.bf16.xpose.msk.msra.mxu0 %vm7473_vm5, %v5749_v42 }
 0x4cb   :  { %5294 = vmatmul.mubr.msk.f32.vlgmr.msra.gmra.mrb[0].mxu0 %vm600_vm4, %v7332_v52 }
 0x4cc   :  { %5296 = vmatprep.mubr.msk.f32.mxu0 %vm600_vm4, %v7339_v55 }
 0x4cf   :  { %5297 = vmatmul.mubr.msk.f32.gmra.mrb[2].mxu0 %vm600_vm4, %v7343_v57 }
 0x4d0   :  { %5299 = vmatprep.mubr.msk.f32.mxu0 %vm600_vm4, %v7351_v60 }
 0x4d3   :  { %5300 = vmatmul.mubr.msk.f32.gmra.mrb[4].mxu0 %vm600_vm4, %v7355_v62 }
 0x4d4   :  { %5335 = vmatprep.mubr.msk.f32.mxu0 %vm600_vm4, %v565_v11 }
 0x4f9   :  { %v6010_v43 = vpop.permute.xlu1 %6009 }
 0x4fa   :  { %v6012_v44 = vunpack.i.h.bf16 %v6010_v43  ;;  %v6011_v40 = vunpack.i.l.bf16 %v6010_v43 }
 0x4fc   :  { %v5755_v45 = vpack.c.bf16 %v6012_v44, %v6011_v40 }
 0x4fe   :  { %5757 = vmatprep.subr.msk.bf16.mxu1 %vm7473_vm5, %v5755_v45 }
 0x4ff   :  { %5760 = vmatpush3.bf16.xpose.msk.msra.mxu1 %vm7473_vm5, %v5755_v45 }
 0x503   :  { %v6020_v46 = vpop.permute.xlu1 %6019 }
 0x504   :  { %v6022_v47 = vunpack.i.h.bf16 %v6020_v46  ;;  %v6021_v48 = vunpack.i.l.bf16 %v6020_v46 }
 0x506   :  { %v5761_v49 = vpack.c.bf16 %v6022_v47, %v6021_v48 }
 0x508   :  { %5763 = vmatprep.subr.msk.bf16.mxu1 %vm7473_vm5, %v5761_v49 }
 0x509   :  { %5766 = vmatpush3.bf16.xpose.msk.msra.mxu1 %vm7473_vm5, %v5761_v49  ;;  %v6030_v50 = vpop.permute.xlu1 %6029  ;;  %v7587_v49 = vld [vmem:[#allocation6 + $0x10] sm:$0xff] }
 0x50a   :  { %v6032_v51 = vunpack.i.h.bf16 %v6030_v50  ;;  %v6031_v52 = vunpack.i.l.bf16 %v6030_v50 }
 0x50c   :  { %v5767_v53 = vpack.c.bf16 %v6032_v51, %v6031_v52 }
 0x50d   :  { %v6035_v54 = vpop.permute.xlu0 %6034 }
 0x50e   :  { %v6037_v55 = vunpack.i.h.bf16 %v6035_v54  ;;  %v6036_v56 = vunpack.i.l.bf16 %v6035_v54  ;;  %5769 = vmatprep.subr.msk.bf16.mxu1 %vm7473_vm5, %v5767_v53  ;;  %v7597_v54 = vld [vmem:[#allocation6 + $0x28] sm:$0xff] }
 0x510   :  { %v5773_v57 = vpack.c.bf16 %v6037_v55, %v6036_v56  ;;  %v7601_v56 = vld [vmem:[#allocation6 + $0x20] sm:$0xff] }
 0x511   :  { %5772 = vmatpush3.bf16.xpose.msk.msra.mxu1 %vm7473_vm5, %v5767_v53  ;;  %v6040_v58 = vpop.permute.xlu1 %6039 }
 0x512   :  { %v6042_v59 = vunpack.i.h.bf16 %v6040_v58  ;;  %v6041_v60 = vunpack.i.l.bf16 %v6040_v58  ;;  %5775 = vmatprep.subr.msk.bf16.mxu0 %vm7473_vm5, %v5773_v57 }
 0x513   :  { %5778 = vmatpush3.bf16.xpose.msk.msra.mxu0 %vm7473_vm5, %v5773_v57 }
 0x514   :  { %v5791_v61 = vpack.c.bf16 %v6042_v59, %v6041_v60 }
 0x515   :  { %v6045_v62 = vpop.permute.xlu0 %6044 }
 0x516   :  { %v6047_v63 = vunpack.i.h.bf16 %v6045_v62  ;;  %v6046_v1 = vunpack.i.l.bf16 %v6045_v62  ;;  %5793 = vmatprep.subr.msk.bf16.mxu1 %vm7473_vm5, %v5791_v61 }
 0x518   :  { %v5779_v3 = vpack.c.bf16 %v6047_v63, %v6046_v1  ;;  %5315 = vmatmul.mubr.msk.f32.vlgmr.msra.gmra.mrb[16].mxu1 %vm600_vm4, %v7392_v2 }
 0x519   :  { %5317 = vmatprep.mubr.msk.f32.mxu1 %vm600_vm4, %v7396_v4  ;;  %5796 = vmatpush3.bf16.xpose.msk.msra.mxu1 %vm7473_vm5, %v5791_v61  ;;  %v6050_v6 = vpop.permute.xlu1 %6049 }
 0x51a   :  { %v6052_v11 = vunpack.i.h.bf16 %v6050_v6  ;;  %v6051_v29 = vunpack.i.l.bf16 %v6050_v6  ;;  %5781 = vmatprep.subr.msk.bf16.mxu0 %vm7473_vm5, %v5779_v3 }
 0x51b   :  { %5784 = vmatpush3.bf16.xpose.msk.msra.mxu0 %vm7473_vm5, %v5779_v3 }
 0x51c   :  { %v5797_v30 = vpack.c.bf16 %v6052_v11, %v6051_v29  ;;  %5318 = vmatmul.mubr.msk.f32.gmra.mrb[18].mxu1 %vm600_vm4, %v7398_v5 }
 0x51d   :  { %5320 = vmatprep.mubr.msk.f32.mxu1 %vm600_vm4, %v7403_v7  ;;  %v6055_v2 = vpop.permute.xlu0 %6054 }
 0x51e   :  { %v6057_v4 = vunpack.i.h.bf16 %v6055_v2  ;;  %v6056_v31 = vunpack.i.l.bf16 %v6055_v2  ;;  %5799 = vmatprep.subr.msk.bf16.mxu1 %vm7473_vm5, %v5797_v30 }
 0x520   :  { %v5785_v33 = vpack.c.bf16 %v6057_v4, %v6056_v31  ;;  %5321 = vmatmul.mubr.msk.f32.gmra.mrb[20].mxu1 %vm600_vm4, %v7405_v9 }
 0x521   :  { %5802 = vmatpush3.bf16.xpose.msk.msra.mxu1 %vm7473_vm5, %v5797_v30  ;;  %5356 = vmatprep.mubr.msk.f32.mxu1 %vm600_vm4, %v7418_v14  ;;  %v6060_v5 = vpop.permute.xlu1 %6059  ;;  %v6070_v7 = vpop.permute.xlu0 %6069 }
 0x522   :  { %v6062_v34 = vunpack.i.h.bf16 %v6060_v5  ;;  %v6061_v35 = vunpack.i.l.bf16 %v6060_v5  ;;  %5787 = vmatprep.subr.msk.bf16.mxu0 %vm7473_vm5, %v5785_v33  ;;  %v6072_v38 = vunpack.i.h.bf16 %v6070_v7  ;;  %v6071_v37 = vunpack.i.l.bf16 %v6070_v7 }
 0x523   :  { %5790 = vmatpush3.bf16.xpose.msk.msra.mxu0 %vm7473_vm5, %v5785_v33 }
 0x524   :  { %v5803_v36 = vpack.c.bf16 %v6062_v34, %v6061_v35  ;;  %v5821_v43 = vpack.c.bf16 %v6072_v38, %v6071_v37 }
 0x525   :  { %v6065_v9 = vpop.permute.xlu1 %6064 }
 0x526   :  { %v6067_v39 = vunpack.i.h.bf16 %v6065_v9  ;;  %v6066_v41 = vunpack.i.l.bf16 %v6065_v9  ;;  %5805 = vmatprep.subr.msk.bf16.mxu1 %vm7473_vm5, %v5803_v36 }
 0x528   :  { %v5809_v14 = vpack.c.bf16 %v6067_v39, %v6066_v41 }
 0x529   :  { %v6075_v42 = vpop.permute.xlu1 %6074  ;;  %5808 = vmatpush3.bf16.xpose.msk.msra.mxu1 %vm7473_vm5, %v5803_v36 }
 0x52a   :  { %v6077_v44 = vunpack.i.h.bf16 %v6075_v42  ;;  %v6076_v40 = vunpack.i.l.bf16 %v6075_v42  ;;  %5336 = vmatmul.mubr.msk.f32.vlgmr.msra.gmra.mrb[6].mxu0 %vm600_vm4, %v7413_v12  ;;  %5810 = vmatprep.subr.bf16.mxu0 %v5809_v14 }
 0x52b   :  { %5822 = vmatprep.subr.bf16.mxu1 %v5821_v43  ;;  %5338 = vmatprep.mubr.msk.f32.mxu0 %vm600_vm4, %v7428_v17  ;;  %v7575_v17 = vld [vmem:[#allocation6] sm:$0xff] }
 0x52c   :  { %5812 = vmatpush3.bf16.msra.mxu0 %v5809_v14  ;;  %v5813_v45 = vpack.c.bf16 %v6077_v44, %v6076_v40 }
 0x52d   :  { %v6080_v46 = vpop.permute.xlu1 %6079 }
 0x52e   :  { %v6082_v47 = vunpack.i.h.bf16 %v6080_v46  ;;  %v6081_v48 = vunpack.i.l.bf16 %v6080_v46  ;;  %5339 = vmatmul.mubr.msk.f32.gmra.mrb[8].mxu0 %vm600_vm4, %v7432_v18  ;;  %5814 = vmatprep.subr.bf16.mxu0 %v5813_v45 }
 0x52f   :  { %5341 = vmatprep.mubr.msk.f32.mxu0 %vm600_vm4, %v7448_v23 }
 0x530   :  { %5816 = vmatpush3.bf16.msra.mxu0 %v5813_v45  ;;  %5357 = vmatmul.mubr.msk.f32.vlgmr.msra.gmra.mrb[22].mxu1 %vm600_vm4, %v7422_v15  ;;  %v5825_v12 = vpack.c.bf16 %v6082_v47, %v6081_v48  ;;  %v7573_v15 = vld [vmem:[#allocation6 + $0x8] sm:$0xff] }
 0x531   :  { %5359 = vmatprep.mubr.msk.f32.mxu1 %vm600_vm4, %v7438_v20  ;;  %5824 = vmatpush3.bf16.msra.mxu1 %v5821_v43 }
 0x532   :  { %5342 = vmatmul.mubr.msk.f32.gmra.mrb[10].mxu0 %vm600_vm4, %v7452_v24  ;;  %5826 = vmatprep.subr.bf16.mxu1 %v5825_v12 }
 0x534   :  { %5360 = vmatmul.mubr.msk.f32.gmra.mrb[24].mxu1 %vm600_vm4, %v7442_v21  ;;  %v7583_v21 = vld [vmem:[#allocation6 + $0x18] sm:$0xff] }
 0x535   :  { %5362 = vmatprep.mubr.msk.f32.mxu1 %vm600_vm4, %v7458_v26  ;;  %5828 = vmatpush3.bf16.msra.mxu1 %v5825_v12 }
 0x538   :  { %5363 = vmatmul.mubr.msk.f32.gmra.mrb[26].mxu1 %vm600_vm4, %v7462_v27 }
 0x59e   :  { %v5295_v18 = vpop.f32.mrb[0].mxu0 }
 0x59f   :  { %v7578_v20 = vadd.f32 %v5295_v18, %v7573_v15  ;;  %v691_v23 = vpop.f32.mrb[1].mxu0 }
 0x5a0   :  { %v7581_v24 = vadd.f32 %v691_v23, %v7575_v17 }
 0x5a1   :  { %v1117_v26 = vsel %vm1113_vm6, %v7578_v20, -inf }
 0x5a2   :  { %1118 = vmax.xlane.f32.xlu1 %v1117_v26  ;;  %v5298_v27 = vpop.f32.mrb[2].mxu0  ;;  %v1114_v50 = vsel %vm1113_vm6, %v7581_v24, -inf }
 0x5a3   :  { %v7592_v51 = vadd.f32 %v5298_v27, %v7583_v21  ;;  %v701_v52 = vpop.f32.mrb[3].mxu0  ;;  %1115 = vmax.xlane.f32.xlu0 %v1114_v50 }
 0x5a4   :  { %v7595_v53 = vadd.f32 %v701_v52, %v7587_v49 }
 0x5a5   :  { %v1123_v55 = vsel %vm1113_vm6, %v7592_v51, -inf }
 0x5a6   :  { %1124 = vmax.xlane.f32.xlu1 %v1123_v55  ;;  %v5301_v57 = vpop.f32.mrb[4].mxu0  ;;  %v1120_v58 = vsel %vm1113_vm6, %v7595_v53, -inf }
 0x5a7   :  { %v7606_v59 = vadd.f32 %v5301_v57, %v7597_v54  ;;  %v711_v60 = vpop.f32.mrb[5].mxu0  ;;  %1121 = vmax.xlane.f32.xlu0 %v1120_v58 }
 0x5a8   :  { %v7609_v61 = vadd.f32 %v711_v60, %v7601_v56 }
 0x5a9   :  { %v1129_v62 = vsel %vm1113_vm6, %v7606_v59, -inf }
 0x5aa   :  { %1130 = vmax.xlane.f32.xlu1 %v1129_v62  ;;  %v1126_v63 = vsel %vm1113_vm6, %v7609_v61, -inf }
 0x5ab   :  { %1127 = vmax.xlane.f32.xlu0 %v1126_v63 }
 0x5eb   :  { %v5316_v1 = vpop.f32.mrb[16].mxu1 }
 0x5ec   :  { %v7616_v3 = vadd.f32 %v5316_v1, %v7573_v15  ;;  %v822_v6 = vpop.f32.mrb[17].mxu1 }
 0x5ed   :  { %v7619_v11 = vadd.f32 %v822_v6, %v7575_v17 }
 0x5ee   :  { %v1135_v29 = vsel %vm1113_vm6, %v7616_v3, -inf }
 0x5ef   :  { %v5319_v30 = vpop.f32.mrb[18].mxu1  ;;  %1136 = vmax.xlane.f32.xlu0 %v1135_v29  ;;  %v1132_v4 = vsel %vm1113_vm6, %v7619_v11, -inf }
 0x5f0   :  { %v832_v2 = vpop.f32.mrb[19].mxu1  ;;  %v7632_v36 = vadd.f32 %v5319_v30, %v7583_v21 }
 0x5f1   :  { %v7637_v37 = vadd.f32 %v832_v2, %v7587_v49 }
 0x5f2   :  { %v1141_v44 = vsel %vm1113_vm6, %v7632_v36, -inf }
 0x5f3   :  { %v5322_v31 = vpop.f32.mrb[20].mxu1  ;;  %1133 = vmax.xlane.f32.xlu0 %v1132_v4  ;;  %v1138_v46 = vsel %vm1113_vm6, %v7637_v37, -inf }
 0x5f4   :  { %v842_v33 = vpop.f32.mrb[21].mxu1  ;;  %v7652_v12 = vadd.f32 %v5322_v31, %v7597_v54 }
 0x5f5   :  { %v7657_v26 = vadd.f32 %v842_v33, %v7601_v56 }
 0x5f6   :  { %v1147_v57 = vsel %vm1113_vm6, %v7652_v12, -inf }
 0x5f7   :  { %v1144_v60 = vsel %vm1113_vm6, %v7657_v26, -inf }
 0x5fd   :  { %v5337_v5 = vpop.f32.mrb[6].mxu0 }
 0x5fe   :  { %v7626_v34 = vadd.f32 %v5337_v5, %v7573_v15  ;;  %v953_v35 = vpop.f32.mrb[7].mxu0 }
 0x5ff   :  { %v7629_v7 = vadd.f32 %v953_v35, %v7575_v17 }
 0x600   :  { %v1153_v38 = vsel %vm1113_vm6, %v7626_v34, -inf }
 0x601   :  { %1154 = vmax.xlane.f32.xlu1 %v1153_v38  ;;  %v5340_v9 = vpop.f32.mrb[8].mxu0  ;;  %v1150_v39 = vsel %vm1113_vm6, %v7629_v7, -inf }
 0x602   :  { %v963_v41 = vpop.f32.mrb[9].mxu0  ;;  %1151 = vmax.xlane.f32.xlu0 %v1150_v39  ;;  %v7642_v42 = vadd.f32 %v5340_v9, %v7583_v21 }
 0x603   :  { %v5358_v14 = vpop.f32.mrb[22].mxu1  ;;  %v7647_v40 = vadd.f32 %v963_v41, %v7587_v49 }
 0x604   :  { %v1084_v43 = vpop.f32.mrb[23].mxu1  ;;  %v1159_v23 = vsel %vm1113_vm6, %v7642_v42, -inf  ;;  %v7672_v62 = vadd.f32 %v5358_v14, %v7573_v15 }
 0x605   :  { %1142 = vmax.xlane.f32.xlu1 %v1141_v44  ;;  %v5343_v45 = vpop.f32.mrb[10].mxu0  ;;  %v1156_v27 = vsel %vm1113_vm6, %v7647_v40, -inf  ;;  %v7677_v1 = vadd.f32 %v1084_v43, %v7575_v17 }
 0x606   :  { %v973_v47 = vpop.f32.mrb[11].mxu0  ;;  %1139 = vmax.xlane.f32.xlu0 %v1138_v46  ;;  %v7662_v52 = vadd.f32 %v5343_v45, %v7597_v54  ;;  %v1171_v30 = vsel %vm1113_vm6, %v7672_v62, -inf }
 0x607   :  { %v5361_v48 = vpop.f32.mrb[24].mxu1  ;;  %v7667_v58 = vadd.f32 %v973_v47, %v7601_v56  ;;  %v1168_v2 = vsel %vm1113_vm6, %v7677_v1, -inf }
 0x608   :  { %v1094_v18 = vpop.f32.mrb[25].mxu1  ;;  %v1165_v63 = vsel %vm1113_vm6, %v7662_v52, -inf  ;;  %v7682_v29 = vadd.f32 %v5361_v48, %v7583_v21 }
 0x609   :  { %1160 = vmax.xlane.f32.xlu1 %v1159_v23  ;;  %v1162_v6 = vsel %vm1113_vm6, %v7667_v58, -inf  ;;  %v7687_v15 = vadd.f32 %v1094_v18, %v7587_v49 }
 0x60a   :  { %1157 = vmax.xlane.f32.xlu0 %v1156_v27  ;;  %v1177_v4 = vsel %vm1113_vm6, %v7682_v29, -inf }
 0x60b   :  { %v5364_v50 = vpop.f32.mrb[26].mxu1  ;;  %v1174_v31 = vsel %vm1113_vm6, %v7687_v15, -inf }
 0x60c   :  { %v1104_v55 = vpop.f32.mrb[27].mxu1  ;;  %v7692_v17 = vadd.f32 %v5364_v50, %v7597_v54 }
 0x60d   :  { %1148 = vmax.xlane.f32.xlu1 %v1147_v57  ;;  %v7697_v21 = vadd.f32 %v1104_v55, %v7601_v56 }
 0x60e   :  { %1145 = vmax.xlane.f32.xlu0 %v1144_v60  ;;  %v1183_v49 = vsel %vm1113_vm6, %v7692_v17, -inf }
 0x60f   :  { %v1180_v33 = vsel %vm1113_vm6, %v7697_v21, -inf }
 0x611   :  { %1166 = vmax.xlane.f32.xlu1 %v1165_v63 }
 0x612   :  { %1163 = vmax.xlane.f32.xlu0 %v1162_v6 }
 0x615   :  { %1172 = vmax.xlane.f32.xlu1 %v1171_v30 }
 0x616   :  { %1169 = vmax.xlane.f32.xlu0 %v1168_v2 }
 0x619   :  { %1178 = vmax.xlane.f32.xlu1 %v1177_v4 }
 0x61a   :  { %1175 = vmax.xlane.f32.xlu0 %v1174_v31 }
 0x61d   :  { %1184 = vmax.xlane.f32.xlu1 %v1183_v49 }
 0x61e   :  { %1181 = vmax.xlane.f32.xlu0 %v1180_v33 }
 0x62e   :  { %6089 = vrot.lane.b32.xlu1 %v7409_v10, %s6943_s6 }
 0x62f   :  { %v1119_v56 = vpop.xlane.xlu1 %1118 }
 0x630   :  { %v1116_v54 = vpop.xlane.xlu0 %1115  ;;  %v1187_v9 = vsub.f32 %v7578_v20, %v1119_v56 }
 0x631   :  { %v1186_v35 = vsub.f32 %v7581_v24, %v1116_v54 }
 0x632   :  { %6094 = vrot.lane.b32.xlu1 %v7416_v13, %s6943_s6  ;;  %v1212_v43 = vmul.f32 1.442695, %v1187_v9 }
 0x633   :  { %v1125_v38 = vpop.xlane.xlu1 %1124  ;;  %v1210_v39 = vmul.f32 1.442695, %v1186_v35 }
 0x634   :  { %6084 = vrot.lane.b32.xlu0 %v7361_v0, %s6943_s6  ;;  %v1122_v5 = vpop.xlane.xlu0 %1121  ;;  %v1189_v10 = vsub.f32 %v7592_v51, %v1125_v38 }
 0x635   :  { %v1188_v41 = vsub.f32 %v7595_v53, %v1122_v5  ;;  %6342 = vpow2.f32 %v1210_v39 }
 0x636   :  { %6344 = vpow2.f32 %v1212_v43  ;;  %v1216_v45 = vmul.f32 1.442695, %v1189_v10 }
 0x637   :  { %v1214_v13 = vmul.f32 1.442695, %v1188_v41  ;;  %v1131_v44 = vpop.xlane.xlu1 %1130 }
 0x638   :  { %v1128_v14 = vpop.xlane.xlu0 %1127  ;;  %v1191_v46 = vsub.f32 %v7606_v59, %v1131_v44 }
 0x639   :  { %v1190_v0 = vsub.f32 %v7609_v61, %v1128_v14  ;;  %6346 = vpow2.f32 %v1214_v13 }
 0x63a   :  { %6348 = vpow2.f32 %v1216_v45  ;;  %v1220_v20 = vmul.f32 1.442695, %v1191_v46 }
 0x63b   :  { %v1218_v24 = vmul.f32 1.442695, %v1190_v0 }
 0x63d   :  { %6350 = vpow2.f32 %v1218_v24 }
 0x63e   :  { %6352 = vpow2.f32 %v1220_v20 }
 0x63f   :  { %v7717_v47 = vpop.eup %6342 }
 0x640   :  { %v7719_v53 = vpop.eup %6344  ;;  %v1258_v51 = vsel %vm1113_vm6, %v7717_v47, 0.0 }
 0x641   :  { %v1261_v61 = vsel %vm1113_vm6, %v7719_v53, 0.0 }
 0x643   :  { %v7723_v48 = vpop.eup %6346 }
 0x644   :  { %v7727_v59 = vpop.eup %6348  ;;  %v1264_v18 = vsel %vm1113_vm6, %v7723_v48, 0.0 }
 0x645   :  { %v1267_v27 = vsel %vm1113_vm6, %v7727_v59, 0.0 }
 0x647   :  { %v7731_v23 = vpop.eup %6350 }
 0x648   :  { %v7735_v50 = vpop.eup %6352  ;;  %v1270_v55 = vsel %vm1113_vm6, %v7731_v23, 0.0 }
 0x649   :  { %v1273_v57 = vsel %vm1113_vm6, %v7735_v50, 0.0 }
 0x653   :  { %1259 = vadd.xlane.f32.xlu0 %v1258_v51 }
 0x656   :  { %1262 = vadd.xlane.f32.xlu1 %v1261_v61 }
 0x657   :  { %1265 = vadd.xlane.f32.xlu0 %v1264_v18 }
 0x65a   :  { %1268 = vadd.xlane.f32.xlu1 %v1267_v27 }
 0x65b   :  { %1271 = vadd.xlane.f32.xlu0 %v1270_v55 }
 0x65e   :  { %1274 = vadd.xlane.f32.xlu1 %v1273_v57 }
 0x67c   :  { %v1137_v60 = vpop.xlane.xlu0 %1136 }
 0x67d   :  { %v1193_v63 = vsub.f32 %v7616_v3, %v1137_v60 }
 0x67f   :  { %v1224_v6 = vmul.f32 1.442695, %v1193_v63 }
 0x680   :  { %v1134_v30 = vpop.xlane.xlu0 %1133 }
 0x681   :  { %6354 = vpow2.f32 %v1224_v6  ;;  %v1192_v2 = vsub.f32 %v7619_v11, %v1134_v30 }
 0x683   :  { %v1222_v4 = vmul.f32 1.442695, %v1192_v2 }
 0x685   :  { %6356 = vpow2.f32 %v1222_v4 }
 0x68b   :  { %v7743_v31 = vpop.eup %6354 }
 0x68c   :  { %v1279_v49 = vsel %vm1113_vm6, %v7743_v31, 0.0 }
 0x68d   :  { %1280 = vadd.xlane.f32.xlu1 %v1279_v49 }
 0x68e   :  { %v1155_v33 = vpop.xlane.xlu1 %1154 }
 0x68f   :  { %v7747_v54 = vpop.eup %6356  ;;  %v1199_v56 = vsub.f32 %v7626_v34, %v1155_v33  ;;  %v1152_v5 = vpop.xlane.xlu0 %1151 }
 0x690   :  { %v1198_v3 = vsub.f32 %v7629_v7, %v1152_v5  ;;  %v1276_v35 = vsel %vm1113_vm6, %v7747_v54, 0.0 }
 0x691   :  { %v1236_v11 = vmul.f32 1.442695, %v1199_v56  ;;  %1277 = vadd.xlane.f32.xlu0 %v1276_v35 }
 0x692   :  { %v1234_v38 = vmul.f32 1.442695, %v1198_v3  ;;  %v1143_v9 = vpop.xlane.xlu1 %1142 }
 0x693   :  { %6358 = vpow2.f32 %v1236_v11  ;;  %v1195_v39 = vsub.f32 %v7632_v36, %v1143_v9  ;;  %v1140_v41 = vpop.xlane.xlu0 %1139 }
 0x694   :  { %6360 = vpow2.f32 %v1234_v38  ;;  %v1194_v14 = vsub.f32 %v7637_v37, %v1140_v41 }
 0x695   :  { %v1228_v43 = vmul.f32 1.442695, %v1195_v39 }
 0x696   :  { %v1226_v10 = vmul.f32 1.442695, %v1194_v14  ;;  %v1161_v34 = vpop.xlane.xlu1 %1160 }
 0x697   :  { %6362 = vpow2.f32 %v1228_v43  ;;  %v1201_v7 = vsub.f32 %v7642_v42, %v1161_v34  ;;  %v1158_v13 = vpop.xlane.xlu0 %1157 }
 0x698   :  { %6364 = vpow2.f32 %v1226_v10  ;;  %v1200_v44 = vsub.f32 %v7647_v40, %v1158_v13 }
 0x699   :  { %v1240_v0 = vmul.f32 1.442695, %v1201_v7 }
 0x69a   :  { %v1238_v45 = vmul.f32 1.442695, %v1200_v44  ;;  %v1149_v46 = vpop.xlane.xlu1 %1148 }
 0x69b   :  { %6366 = vpow2.f32 %v1240_v0  ;;  %v1197_v36 = vsub.f32 %v7652_v12, %v1149_v46  ;;  %v1146_v24 = vpop.xlane.xlu0 %1145 }
 0x69c   :  { %6368 = vpow2.f32 %v1238_v45  ;;  %v1196_v51 = vsub.f32 %v7657_v26, %v1146_v24 }
 0x69d   :  { %v7758_v20 = vpop.eup %6358  ;;  %v1232_v37 = vmul.f32 1.442695, %v1197_v36 }
 0x69e   :  { %v7761_v61 = vpop.eup %6360  ;;  %v1167_v42 = vpop.xlane.xlu1 %1166  ;;  %v1297_v18 = vsel %vm1113_vm6, %v7758_v20, 0.0  ;;  %v1230_v57 = vmul.f32 1.442695, %v1196_v51 }
 0x69f   :  { %6370 = vpow2.f32 %v1232_v37  ;;  %v1203_v40 = vsub.f32 %v7662_v52, %v1167_v42  ;;  %1298 = vadd.xlane.f32.xlu1 %v1297_v18  ;;  %v1164_v27 = vpop.xlane.xlu0 %1163  ;;  %v1294_v12 = vsel %vm1113_vm6, %v7761_v61, 0.0 }
 0x6a0   :  { %1295 = vadd.xlane.f32.xlu0 %v1294_v12  ;;  %v1202_v26 = vsub.f32 %v7667_v58, %v1164_v27 }
 0x6a1   :  { %v7768_v55 = vpop.eup %6362  ;;  %v1244_v60 = vmul.f32 1.442695, %v1203_v40 }
 0x6a2   :  { %v7771_v63 = vpop.eup %6364  ;;  %v1173_v6 = vpop.xlane.xlu1 %1172  ;;  %v1285_v30 = vsel %vm1113_vm6, %v7768_v55, 0.0  ;;  %v1242_v49 = vmul.f32 1.442695, %v1202_v26 }
 0x6a3   :  { %6372 = vpow2.f32 %v1244_v60  ;;  %1286 = vadd.xlane.f32.xlu1 %v1285_v30  ;;  %v1170_v52 = vpop.xlane.xlu0 %1169  ;;  %v1282_v2 = vsel %vm1113_vm6, %v7771_v63, 0.0  ;;  %v1205_v33 = vsub.f32 %v7672_v62, %v1173_v6 }
 0x6a4   :  { %1283 = vadd.xlane.f32.xlu0 %v1282_v2  ;;  %6374 = vpow2.f32 %v1230_v57  ;;  %v1204_v9 = vsub.f32 %v7677_v1, %v1170_v52 }
 0x6a5   :  { %v7777_v4 = vpop.eup %6366  ;;  %6376 = vpow2.f32 %v1242_v49  ;;  %v1248_v38 = vmul.f32 1.442695, %v1205_v33 }
 0x6a6   :  { %v7780_v58 = vpop.eup %6368  ;;  %v1179_v56 = vpop.xlane.xlu1 %1178  ;;  %v1303_v5 = vsel %vm1113_vm6, %v7777_v4, 0.0  ;;  %v1246_v43 = vmul.f32 1.442695, %v1204_v9 }
 0x6a7   :  { %1304 = vadd.xlane.f32.xlu1 %v1303_v5  ;;  %v1176_v3 = vpop.xlane.xlu0 %1175  ;;  %v1300_v35 = vsel %vm1113_vm6, %v7780_v58, 0.0  ;;  %6378 = vpow2.f32 %v1248_v38  ;;  %v1207_v10 = vsub.f32 %v7682_v29, %v1179_v56 }
 0x6a8   :  { %1301 = vadd.xlane.f32.xlu0 %v1300_v35  ;;  %6380 = vpow2.f32 %v1246_v43  ;;  %v1206_v24 = vsub.f32 %v7687_v15, %v1176_v3 }
 0x6a9   :  { %v7786_v11 = vpop.eup %6370  ;;  %v1252_v36 = vmul.f32 1.442695, %v1207_v10 }
 0x6aa   :  { %v1185_v39 = vpop.xlane.xlu1 %1184  ;;  %v1291_v62 = vsel %vm1113_vm6, %v7786_v11, 0.0  ;;  %v1250_v12 = vmul.f32 1.442695, %v1206_v24 }
 0x6ab   :  { %1292 = vadd.xlane.f32.xlu1 %v1291_v62  ;;  %v1182_v41 = vpop.xlane.xlu0 %1181  ;;  %6382 = vpow2.f32 %v1252_v36  ;;  %v1209_v57 = vsub.f32 %v7692_v17, %v1185_v39 }
 0x6ac   :  { %6384 = vpow2.f32 %v1250_v12 }
 0x6ad   :  { %v7791_v14 = vpop.eup %6372  ;;  %v1256_v6 = vmul.f32 1.442695, %v1209_v57 }
 0x6ae   :  { %v6090_v34 = vpop.permute.xlu1 %6089  ;;  %v1309_v7 = vsel %vm1113_vm6, %v7791_v14, 0.0  ;;  %v7796_v13 = vpop.eup %6374 }
 0x6af   :  { %v6092_v44 = vunpack.i.h.bf16 %v6090_v34  ;;  %v6091_v1 = vunpack.i.l.bf16 %v6090_v34  ;;  %1310 = vadd.xlane.f32.xlu0 %v1309_v7  ;;  %v6085_v0 = vpop.permute.xlu0 %6084  ;;  %v1288_v29 = vsel %vm1113_vm6, %v7796_v13, 0.0  ;;  %v7801_v18 = vpop.eup %6376  ;;  %6386 = vpow2.f32 %v1256_v6 }
 0x6b0   :  { %v6087_v45 = vunpack.i.h.bf16 %v6085_v0  ;;  %v6086_v46 = vunpack.i.l.bf16 %v6085_v0  ;;  %v1306_v60 = vsel %vm1113_vm6, %v7801_v18, 0.0 }
 0x6b1   :  { %v5829_v37 = vpack.c.bf16 %v6092_v44, %v6091_v1  ;;  %v7806_v26 = vpop.eup %6378 }
 0x6b2   :  { %v6095_v51 = vpop.permute.xlu1 %6094  ;;  %v5817_v42 = vpack.c.bf16 %v6087_v45, %v6086_v46  ;;  %v1315_v30 = vsel %vm1113_vm6, %v7806_v26, 0.0  ;;  %v7810_v52 = vpop.eup %6380 }
 0x6b3   :  { %v6097_v40 = vunpack.i.h.bf16 %v6095_v51  ;;  %v6096_v27 = vunpack.i.l.bf16 %v6095_v51  ;;  %5830 = vmatprep.subr.bf16.mxu1 %v5829_v37  ;;  %1289 = vadd.xlane.f32.xlu0 %v1288_v29  ;;  %v1312_v17 = vsel %vm1113_vm6, %v7810_v52, 0.0 }
 0x6b4   :  { %5818 = vmatprep.subr.bf16.mxu0 %v5817_v42  ;;  %5832 = vmatpush3.bf16.msra.mxu1 %v5829_v37 }
 0x6b5   :  { %5820 = vmatpush3.bf16.msra.mxu0 %v5817_v42  ;;  %v5833_v15 = vpack.c.bf16 %v6097_v40, %v6096_v27  ;;  %v7816_v2 = vpop.eup %6382 }
 0x6b6   :  { %v1321_v49 = vsel %vm1113_vm6, %v7816_v2, 0.0  ;;  %v7822_v33 = vpop.eup %6384 }
 0x6b7   :  { %1307 = vadd.xlane.f32.xlu0 %v1306_v60  ;;  %5834 = vmatprep.subr.bf16.mxu0 %v5833_v15 }
 0x6b9   :  { %v7828_v56 = vpop.eup %6386 }
 0x6ba   :  { %v1327_v5 = vsel %vm1113_vm6, %v7828_v56, 0.0 }
 0x6bb   :  { %1316 = vadd.xlane.f32.xlu0 %v1315_v30 }
 0x6bc   :  { %6104 = vrot.lane.b32.xlu1 %v7436_v19, %s6943_s6  ;;  %v1318_v19 = vsel %vm1113_vm6, %v7822_v33, 0.0 }
 0x6bf   :  { %1313 = vadd.xlane.f32.xlu0 %v1312_v17 }
 0x6c0   :  { %6109 = vrot.lane.b32.xlu1 %v7446_v22, %s6943_s6  ;;  %v1208_v22 = vsub.f32 %v7697_v21, %v1182_v41 }
 0x6c2   :  { %v1254_v3 = vmul.f32 1.442695, %v1208_v22 }
 0x6c3   :  { %1322 = vadd.xlane.f32.xlu0 %v1321_v49 }
 0x6c4   :  { %6114 = vrot.lane.b32.xlu1 %v7456_v25, %s6943_s6  ;;  %6388 = vpow2.f32 %v1254_v3 }
 0x6c7   :  { %1319 = vadd.xlane.f32.xlu0 %v1318_v19 }
 0x6cb   :  { %1328 = vadd.xlane.f32.xlu0 %v1327_v5 }
 0x6ce   :  { %v7835_v38 = vpop.eup %6388 }
 0x6cf   :  { %v1324_v62 = vsel %vm1113_vm6, %v7835_v38, 0.0 }
 0x6e0   :  { %v1260_v35 = vpop.xlane.xlu0 %1259 }
 0x6e1   :  { %6390 = vrcp.f32 %v1260_v35  ;;  %6099 = vrot.lane.b32.xlu0 %v7426_v16, %s6943_s6 }
 0x6e3   :  { %v1263_v25 = vpop.xlane.xlu1 %1262 }
 0x6e4   :  { %6392 = vrcp.f32 %v1263_v25  ;;  %v1266_v9 = vpop.xlane.xlu0 %1265 }
 0x6e5   :  { %6394 = vrcp.f32 %v1266_v9 }
 0x6e7   :  { %v1269_v39 = vpop.xlane.xlu1 %1268 }
 0x6e8   :  { %6396 = vrcp.f32 %v1269_v39  ;;  %1325 = vadd.xlane.f32.xlu1 %v1324_v62  ;;  %v1272_v21 = vpop.xlane.xlu0 %1271 }
 0x6e9   :  { %6398 = vrcp.f32 %v1272_v21 }
 0x6eb   :  { %v6391_v41 = vpop.eup %6390  ;;  %v1275_v43 = vpop.xlane.xlu1 %1274 }
 0x6ec   :  { %6400 = vrcp.f32 %v1275_v43  ;;  %v1354_v10 = vmul.f32 %v6391_v41, %v7717_v47 }
 0x6ee   :  { %v6393_v16 = vpop.eup %6392  ;;  %5377 = vmatprep.mubr.msk.f32.mxu0 %vm1113_vm6, %v1354_v10 }
 0x6ef   :  { %v6395_v34 = vpop.eup %6394  ;;  %v1355_v7 = vmul.f32 %v6393_v16, %v7719_v53 }
 0x6f0   :  { %v1356_v44 = vmul.f32 %v6395_v34, %v7723_v48 }
 0x6f1   :  { %5378 = vmatmul.mubr.msk.f32.vlgmr.msra.gmra.mrb[12].mxu0 %vm1113_vm6, %v1355_v7 }
 0x6f2   :  { %v6397_v1 = vpop.eup %6396  ;;  %5836 = vmatpush3.bf16.msra.mxu0 %v5833_v15  ;;  %5380 = vmatprep.mubr.msk.f32.mxu0 %vm1113_vm6, %v1356_v44 }
 0x6f3   :  { %v6399_v0 = vpop.eup %6398  ;;  %v1357_v45 = vmul.f32 %v6397_v1, %v7727_v59 }
 0x6f4   :  { %v1358_v46 = vmul.f32 %v6399_v0, %v7731_v23 }
 0x6f5   :  { %5381 = vmatmul.mubr.msk.f32.gmra.mrb[14].mxu0 %vm1113_vm6, %v1357_v45 }
 0x6f6   :  { %v6401_v47 = vpop.eup %6400  ;;  %5383 = vmatprep.mubr.msk.f32.mxu0 %vm1113_vm6, %v1358_v46 }
 0x6f7   :  { %v1359_v53 = vmul.f32 %v6401_v47, %v7735_v50 }
 0x6f9   :  { %6119 = vrot.lane.b32.xlu1 %v7466_v28, %s6943_s6  ;;  %5384 = vmatmul.mubr.msk.f32.gmra.mrb[16].mxu0 %vm1113_vm6, %v1359_v53 }
 0x71a   :  { %v1281_v48 = vpop.xlane.xlu1 %1280 }
 0x71b   :  { %6402 = vrcp.f32 %v1281_v48 }
 0x71e   :  { %v1278_v36 = vpop.xlane.xlu0 %1277 }
 0x71f   :  { %6404 = vrcp.f32 %v1278_v36 }
 0x725   :  { %v6403_v24 = vpop.eup %6402 }
 0x726   :  { %v1361_v37 = vmul.f32 %v6403_v24, %v7743_v31 }
 0x729   :  { %v6405_v59 = vpop.eup %6404 }
 0x72a   :  { %v1360_v23 = vmul.f32 %v6405_v59, %v7747_v54 }
 0x72c   :  { %v1299_v51 = vpop.xlane.xlu1 %1298  ;;  %5398 = vmatprep.mubr.msk.f32.mxu1 %vm1113_vm6, %v1360_v23 }
 0x72d   :  { %5399 = vmatmul.mubr.msk.f32.vlgmr.msra.gmra.mrb[28].mxu1 %vm1113_vm6, %v1361_v37  ;;  %v1296_v50 = vpop.xlane.xlu0 %1295 }
 0x72e   :  { %6406 = vrcp.f32 %v1296_v50 }
 0x730   :  { %v1287_v28 = vpop.xlane.xlu1 %1286 }
 0x731   :  { %6408 = vrcp.f32 %v1287_v28  ;;  %v1284_v29 = vpop.xlane.xlu0 %1283 }
 0x732   :  { %6410 = vrcp.f32 %v1284_v29 }
 0x733   :  { %6412 = vrcp.f32 %v1299_v51 }
 0x734   :  { %v1305_v42 = vpop.xlane.xlu1 %1304 }
 0x735   :  { %v1302_v27 = vpop.xlane.xlu0 %1301 }
 0x736   :  { %6414 = vrcp.f32 %v1302_v27 }
 0x738   :  { %v6407_v40 = vpop.eup %6406  ;;  %v1293_v12 = vpop.xlane.xlu1 %1292 }
 0x739   :  { %v1366_v57 = vmul.f32 %v6407_v40, %v7761_v61  ;;  %6416 = vrcp.f32 %v1293_v12 }
 0x73b   :  { %v6409_v54 = vpop.eup %6408  ;;  %5419 = vmatprep.mubr.msk.f32.mxu0 %vm1113_vm6, %v1366_v57 }
 0x73c   :  { %v6411_v31 = vpop.eup %6410  ;;  %v6105_v15 = vpop.permute.xlu1 %6104  ;;  %v1363_v49 = vmul.f32 %v6409_v54, %v7768_v55 }
 0x73d   :  { %v1311_v60 = vpop.xlane.xlu0 %1310  ;;  %v6107_v6 = vunpack.i.h.bf16 %v6105_v15  ;;  %v6106_v30 = vunpack.i.l.bf16 %v6105_v15  ;;  %v1362_v17 = vmul.f32 %v6411_v31, %v7771_v63  ;;  %v6413_v25 = vpop.eup %6412 }
 0x73e   :  { %v1367_v41 = vmul.f32 %v6413_v25, %v7758_v20 }
 0x73f   :  { %5401 = vmatprep.mubr.msk.f32.mxu1 %vm1113_vm6, %v1362_v17  ;;  %v5837_v19 = vpack.c.bf16 %v6107_v6, %v6106_v30 }
 0x740   :  { %v6110_v5 = vpop.permute.xlu1 %6109  ;;  %5402 = vmatmul.mubr.msk.f32.gmra.mrb[30].mxu1 %vm1113_vm6, %v1363_v49  ;;  %v6415_v39 = vpop.eup %6414 }
 0x741   :  { %v1290_v61 = vpop.xlane.xlu0 %1289  ;;  %5838 = vmatprep.subr.bf16.mxu0 %v5837_v19  ;;  %v1368_v34 = vmul.f32 %v6415_v39, %v7780_v58  ;;  %v6111_v53 = vunpack.i.l.bf16 %v6110_v5 }
 0x742   :  { %6418 = vrcp.f32 %v1290_v61  ;;  %5840 = vmatpush3.bf16.msra.mxu0 %v5837_v19 }
 0x743   :  { %6420 = vrcp.f32 %v1305_v42  ;;  %v6417_v62 = vpop.eup %6416 }
 0x744   :  { %v6115_v22 = vpop.permute.xlu1 %6114  ;;  %v1365_v7 = vmul.f32 %v6417_v62, %v7786_v11 }
 0x745   :  { %v1308_v3 = vpop.xlane.xlu0 %1307  ;;  %v6117_v35 = vunpack.i.h.bf16 %v6115_v22  ;;  %v6116_v63 = vunpack.i.l.bf16 %v6115_v22 }
 0x746   :  { %6422 = vrcp.f32 %v1308_v3 }
 0x747   :  { %6424 = vrcp.f32 %v1311_v60  ;;  %v5841_v55 = vpack.c.bf16 %v6117_v35, %v6116_v63 }
 0x749   :  { %v1317_v9 = vpop.xlane.xlu0 %1316  ;;  %5842 = vmatprep.subr.bf16.mxu0 %v5841_v55 }
 0x74a   :  { %5844 = vmatpush3.bf16.msra.mxu0 %v5841_v55 }
 0x74b   :  { %5449 = vmatprep.subr.bf16.mxu0 %v6953_v8 }
 0x74c   :  { %v6419_v21 = vpop.eup %6418 }
 0x74d   :  { %v6421_v43 = vpop.eup %6420  ;;  %v1314_v10 = vpop.xlane.xlu0 %1313  ;;  %v1364_v16 = vmul.f32 %v6419_v21, %v7796_v13  ;;  %5420 = vmatmul.mubr.msk.f32.vlgmr.msra.gmra.mrb[18].mxu0 %vm1113_vm6, %v1367_v41 }
 0x74e   :  { %6426 = vrcp.f32 %v1314_v10  ;;  %5422 = vmatprep.mubr.msk.f32.mxu0 %vm1113_vm6, %v1368_v34  ;;  %v1369_v20 = vmul.f32 %v6421_v43, %v7777_v4 }
 0x74f   :  { %5404 = vmatprep.mubr.msk.f32.mxu1 %vm1113_vm6, %v1364_v16  ;;  %6428 = vrcp.f32 %v1317_v9 }
 0x750   :  { %v6423_v44 = vpop.eup %6422  ;;  %5405 = vmatmul.mubr.msk.f32.gmra.mrb[32].mxu1 %vm1113_vm6, %v1365_v7 }
 0x751   :  { %v6425_v1 = vpop.eup %6424  ;;  %v1323_v0 = vpop.xlane.xlu0 %1322  ;;  %v1370_v13 = vmul.f32 %v6423_v44, %v7801_v18  ;;  %5423 = vmatmul.mubr.msk.f32.gmra.mrb[20].mxu0 %vm1113_vm6, %v1369_v20  ;;  %v6112_v18 = vunpack.i.h.bf16 %v6110_v5 }
 0x752   :  { %v1371_v58 = vmul.f32 %v6425_v1, %v7791_v14 }
 0x753   :  { %5425 = vmatprep.mubr.msk.f32.mxu0 %vm1113_vm6, %v1370_v13  ;;  %v5849_v14 = vpack.c.bf16 %v6112_v18, %v6111_v53 }
 0x755   :  { %v1320_v11 = vpop.xlane.xlu0 %1319  ;;  %5426 = vmatmul.mubr.msk.f32.gmra.mrb[22].mxu0 %vm1113_vm6, %v1371_v58 }
 0x756   :  { %5453 = vmatprep.mubr.msk.bf16.mxu0 %vm6954_vm3, %v6953_v8  ;;  %6430 = vrcp.f32 %v1320_v11  ;;  %v6314_v11 = vld [vmem:[#allocation15] sm:$0xff]  }
 0x757   :  { %6432 = vrcp.f32 %v1323_v0  ;;  %5450 = vmatpush3.bf16.msra.mxu0 %v6314_v11 }
 0x758   :  { %v6427_v45 = vpop.eup %6426  ;;  %5451 = vmatprep.subr.bf16.mxu0 %v6953_v8 }
 0x759   :  { %v1329_v46 = vpop.xlane.xlu0 %1328  ;;  %v1372_v4 = vmul.f32 %v6427_v45, %v7810_v52  ;;  %v6429_v50 = vpop.eup %6428 }
 0x75a   :  { %v1373_v29 = vmul.f32 %v6429_v50, %v7806_v26 }
 0x75b   :  { %5440 = vmatprep.mubr.msk.f32.mxu1 %vm1113_vm6, %v1372_v4 }
 0x75d   :  { %v6100_v47 = vpop.permute.xlu0 %6099 }
 0x75e   :  { %v6102_v48 = vunpack.i.h.bf16 %v6100_v47  ;;  %v6101_v36 = vunpack.i.l.bf16 %v6100_v47  ;;  %v6315_v47 = vld [vmem:[#allocation15 + $0x8] sm:$0xff]  }
 0x75f   :  { %5452 = vmatpush3.bf16.msra.mxu0 %v6315_v47 }
 0x760   :  { %v5845_v24 = vpack.c.bf16 %v6102_v48, %v6101_v36  ;;  %v6431_v28 = vpop.eup %6430  ;;  %5481 = vmatprep.subr.bf16.mxu0 %v6953_v8 }
 0x761   :  { %v6433_v42 = vpop.eup %6432  ;;  %v1374_v40 = vmul.f32 %v6431_v28, %v7822_v33  ;;  %v4889_v28 = vld [vmem:[#allocation17] ss:$0 sm:$0xff] }
 0x762   :  { %5846 = vmatprep.subr.bf16.mxu1 %v5845_v24  ;;  %v1375_v12 = vmul.f32 %v6433_v42, %v7816_v2 }
 0x763   :  { %5848 = vmatpush3.bf16.msra.mxu1 %v5845_v24 }
 0x764   :  { %5850 = vmatprep.subr.bf16.mxu1 %v5849_v14 }
 0x767   :  { %5852 = vmatpush3.bf16.msra.mxu1 %v5849_v14 }
 0x775   :  { %v1326_v59 = vpop.xlane.xlu1 %1325 }
 0x776   :  { %6434 = vrcp.f32 %v1326_v59 }
 0x777   :  { %6436 = vrcp.f32 %v1329_v46 }
 0x779   :  { %v6120_v23 = vpop.permute.xlu1 %6119 }
 0x77a   :  { %v6122_v52 = vunpack.i.h.bf16 %v6120_v23  ;;  %v6121_v37 = vunpack.i.l.bf16 %v6120_v23 }
 0x77c   :  { %v5853_v51 = vpack.c.bf16 %v6122_v52, %v6121_v37 }
 0x77e   :  { %5854 = vmatprep.subr.bf16.mxu1 %v5853_v51 }
 0x77f   :  { %5856 = vmatpush3.bf16.msra.mxu1 %v5853_v51 }
 0x780   :  { %5465 = vmatprep.subr.bf16.mxu1 %v6953_v8  ;;  %v6435_v27 = vpop.eup %6434 }
 0x781   :  { %v6437_v57 = vpop.eup %6436  ;;  %v1376_v54 = vmul.f32 %v6435_v27, %v7835_v38 }
 0x782   :  { %5441 = vmatmul.mubr.msk.f32.vlgmr.msra.gmra.mrb[34].mxu1 %vm1113_vm6, %v1373_v29  ;;  %v1377_v26 = vmul.f32 %v6437_v57, %v7828_v56 }
 0x783   :  { %5443 = vmatprep.mubr.msk.f32.mxu1 %vm1113_vm6, %v1374_v40 }
 0x786   :  { %5444 = vmatmul.mubr.msk.f32.gmra.mrb[36].mxu1 %vm1113_vm6, %v1375_v12  ;;  %v6598_v12 = vld [vmem:[#allocation2] sm:$0xff] }
 0x787   :  { %5446 = vmatprep.mubr.msk.f32.mxu1 %vm1113_vm6, %v1376_v54 }
 0x78a   :  { %5447 = vmatmul.mubr.msk.f32.gmra.mrb[38].mxu1 %vm1113_vm6, %v1377_v26 }
 0x78b   :  { %5469 = vmatprep.mubr.msk.bf16.mxu1 %vm6954_vm3, %v6953_v8 }
 0x7c4   :  { %v5379_v33 = vpop.f32.mrb[12].mxu0 }
 0x7c5   :  { %v1480_v31 = vpop.f32.mrb[13].mxu0 }
 0x7c8   :  { %v5382_v15 = vpop.f32.mrb[14].mxu0 }
 0x7c9   :  { %v1490_v60 = vpop.f32.mrb[15].mxu0 }
 0x7cc   :  { %v5385_v6 = vpop.f32.mrb[16].mxu0 }
 0x7cd   :  { %v1500_v2 = vpop.f32.mrb[17].mxu0 }
 0x800   :  { %v5400_v30 = vpop.f32.mrb[28].mxu1 }
 0x801   :  { %v6125_v17 = vpack.i.bf16 %v5400_v30, %v5379_v33  ;;  %v1611_v38 = vpop.f32.mrb[29].mxu1  ;;  %v6599_v33 = vld [vmem:[#allocation2 + $0x8] sm:$0xff] }
 0x802   :  { %v6123_v49 = vpack.i.bf16 %v1611_v38, %v1480_v31  ;;  %v6600_v38 = vld [vmem:[#allocation2 + $0x10] sm:$0xff] }
 0x804   :  { %6124 = vxpose.xlu1.b32.start [1/6] (short) (narrow) %v6123_v49, 8 }
 0x808   :  { %6126 = vxpose.xlu1.b32.cont [2/6] (short) (narrow) %v6125_v17, 8 }
 0x813   :  { %v5403_v19 = vpop.f32.mrb[30].mxu1 }
 0x814   :  { %v6129_v5 = vpack.i.bf16 %v5403_v19, %v5382_v15  ;;  %v1621_v56 = vpop.f32.mrb[31].mxu1 }
 0x815   :  { %v6127_v61 = vpack.i.bf16 %v1621_v56, %v1490_v60  ;;  %v6601_v56 = vld [vmem:[#allocation2 + $0x18] sm:$0xff] }
 0x817   :  { %6128 = vxpose.xlu1.b32.cont [3/6] (short) (narrow) %v6127_v61, 8 }
 0x81b   :  { %6130 = vxpose.xlu1.b32.cont [4/6] (short) (narrow) %v6129_v5, 8 }
 0x820   :  { %v5421_v22 = vpop.f32.mrb[18].mxu0 }
 0x821   :  { %v1742_v3 = vpop.f32.mrb[19].mxu0 }
 0x823   :  { %v5406_v35 = vpop.f32.mrb[32].mxu1 }
 0x824   :  { %v6133_v63 = vpack.i.bf16 %v5406_v35, %v5385_v6  ;;  %v1631_v55 = vpop.f32.mrb[33].mxu1  ;;  %v5424_v9 = vpop.f32.mrb[20].mxu0 }
 0x825   :  { %v6131_v25 = vpack.i.bf16 %v1631_v55, %v1500_v2  ;;  %v1752_v39 = vpop.f32.mrb[21].mxu0 }
 0x827   :  { %6132 = vxpose.xlu1.b32.cont [5/6] (short) (narrow) %v6131_v25, 8 }
 0x828   :  { %v5427_v62 = vpop.f32.mrb[22].mxu0 }
 0x829   :  { %v1762_v21 = vpop.f32.mrb[23].mxu0 }
 0x82b   :  { %6134 = vxpose.xlu1.b32.end [6/6] (short) (narrow) %v6133_v63, 8 }
 0x855   :  { %v5442_v41 = vpop.f32.mrb[34].mxu1 }
 0x856   :  { %v6142_v43 = vpack.i.bf16 %v5442_v41, %v5421_v22  ;;  %v1873_v10 = vpop.f32.mrb[35].mxu1  ;;  %v6603_v41 = vld [vmem:[#allocation2 + $0x28] sm:$0xff] }
 0x857   :  { %v6140_v16 = vpack.i.bf16 %v1873_v10, %v1742_v3 }
 0x859   :  { %v5445_v34 = vpop.f32.mrb[36].mxu1  ;;  %6141 = vxpose.xlu0.b32.start [1/6] (short) (narrow) %v6140_v16, 8 }
 0x85a   :  { %v6146_v7 = vpack.i.bf16 %v5445_v34, %v5424_v9  ;;  %v1883_v44 = vpop.f32.mrb[37].mxu1  ;;  %v6602_v9 = vld [vmem:[#allocation2 + $0x20] sm:$0xff] }
 0x85b   :  { %v6144_v20 = vpack.i.bf16 %v1883_v44, %v1752_v39 }
 0x85d   :  { %v5448_v1 = vpop.f32.mrb[38].mxu1  ;;  %6143 = vxpose.xlu0.b32.cont [2/6] (short) (narrow) %v6142_v43, 8 }
 0x85e   :  { %v6150_v0 = vpack.i.bf16 %v5448_v1, %v5427_v62  ;;  %v1893_v13 = vpop.f32.mrb[39].mxu1 }
 0x85f   :  { %v6148_v58 = vpack.i.bf16 %v1893_v13, %v1762_v21 }
 0x861   :  { %6145 = vxpose.xlu0.b32.cont [3/6] (short) (narrow) %v6144_v20, 8 }
 0x865   :  { %6147 = vxpose.xlu0.b32.cont [4/6] (short) (narrow) %v6146_v7, 8 }
 0x869   :  { %6149 = vxpose.xlu0.b32.cont [5/6] (short) (narrow) %v6148_v58, 8 }
 0x86d   :  { %6151 = vxpose.xlu0.b32.end [6/6] (short) (narrow) %v6150_v0, 8 }
 0x897   :  { %v6135_v45 = vpop.trf.xlu1 }
 0x898   :  { %v6136_v46 = vunpack.i.l.bf16 %v6135_v45  ;;  %v6139_v4 = vunpack.i.h.bf16 %v6135_v45 }
 0x89a   :  { %2030 = vxpose.xlu0.b32.start [1/4] (short) (narrow) %v6136_v46, 48 }
 0x89e   :  { %2031 = vxpose.xlu0.b32.cont [2/4] (short) (narrow) %v6139_v4, 48 }
 0x8d9   :  { %v6152_v18 = vpop.trf.xlu0 }
 0x8da   :  { %v6153_v53 = vunpack.i.l.bf16 %v6152_v18  ;;  %v6156_v48 = vunpack.i.h.bf16 %v6152_v18 }
 0x8dc   :  { %2032 = vxpose.xlu0.b32.cont [3/4] (short) (narrow) %v6153_v53, 48 }
 0x8e0   :  { %2033 = vxpose.xlu0.b32.end [4/4] (short) (narrow) %v6156_v48, 48 }
 0x954   :  { %v2046_v36 = vpop.trf.xlu0 }
 0x958   :  { %v2047_v24 = vpop.trf.xlu0 }
 0x959   :  { %v2062_v14 = vpack.c.bf16 %v2047_v24, %v2046_v36 }
 0x95b   :  { %5454 = vmatmul.mubr.msk.bf16.vlgmr.msra.gmra.mrb[24].mxu0 %vm337_vm2, %v2062_v14 }
 0x95c   :  { %v2048_v59 = vpop.trf.xlu0  ;;  %5457 = vmatprep.mubr.msk.bf16.mxu0 %vm6954_vm3, %v6953_v8 }
 0x960   :  { %v2049_v23 = vpop.trf.xlu0 }
 0x961   :  { %v2063_v52 = vpack.c.bf16 %v2049_v23, %v2048_v59 }
 0x963   :  { %5458 = vmatmul.mubr.msk.bf16.gmra.mrb[28].mxu0 %vm337_vm2, %v2063_v52 }
 0x964   :  { %v2050_v37 = vpop.trf.xlu0  ;;  %5461 = vmatprep.mubr.msk.bf16.mxu0 %vm6954_vm3, %v6953_v8 }
 0x968   :  { %v2051_v51 = vpop.trf.xlu0 }
 0x969   :  { %v2064_v50 = vpack.c.bf16 %v2051_v51, %v2050_v37 }
 0x96b   :  { %5462 = vmatmul.mubr.msk.bf16.gmra.mrb[32].mxu0 %vm337_vm2, %v2064_v50 }
 0x96c   :  { %5485 = vmatprep.mubr.msk.bf16.mxu0 %vm6954_vm3, %v6953_v8 }
 0xa2e   :  { %v2131_v29 = vpop.f32.mrb[24].mxu0 }
 0xa2f   :  { %v2132_v42 = vadd.f32 %v4889_v28, %v2131_v29  ;;  %v5455_v40 = vpop.f32.mrb[25].mxu0 }
 0xa30   :  { %v2134_v27 = vpop.f32.mrb[26].mxu0 }
 0xa31   :  { %v7906_v57 = vadd.f32 %v6598_v12, %v2132_v42  ;;  %v2135_v54 = vadd.f32 %v4889_v28, %v2134_v27  ;;  %v5456_v26 = vpop.f32.mrb[27].mxu0  ;;  %v6316_v12 = vld [vmem:[%s8754_s12] sm:$0xff]  }
 0xa32   :  { %5466 = vmatpush3.bf16.msra.mxu1 %v6316_v12 }
 0xa33   :  { %v7908_v31 = vadd.f32 %v6599_v33, %v2135_v54  ;;  %v2162_v15 = vsel %vm337_vm2, %v7906_v57, 0.0  ;;  %5467 = vmatprep.subr.bf16.mxu1 %v6953_v8  ;;  %v6317_v54 = vld [vmem:[%s8754_s12 + $0x8] sm:$0xff]  }
 0xa34   :  { %2163 = vadd.xlane.f32.xlu1 %v2162_v15 }
 0xa35   :  { %v2165_v60 = vsel %vm337_vm2, %v7908_v31, 0.0 }
 0xa36   :  { %2166 = vadd.xlane.f32.xlu0 %v2165_v60  ;;  %v2139_v6 = vpop.f32.mrb[28].mxu0  ;;  %5468 = vmatpush3.bf16.msra.mxu1 %v6317_v54 }
 0xa37   :  { %v2140_v2 = vadd.f32 %v4889_v28, %v2139_v6  ;;  %v5459_v30 = vpop.f32.mrb[29].mxu0  ;;  %5497 = vmatprep.subr.bf16.mxu1 %v6953_v8 }
 0xa38   :  { %v2142_v17 = vpop.f32.mrb[30].mxu0 }
 0xa39   :  { %v7914_v49 = vadd.f32 %v6600_v38, %v2140_v2  ;;  %v2143_v19 = vadd.f32 %v4889_v28, %v2142_v17  ;;  %v5460_v5 = vpop.f32.mrb[31].mxu0 }
 0xa3b   :  { %v7916_v61 = vadd.f32 %v6601_v56, %v2143_v19  ;;  %v2168_v22 = vsel %vm337_vm2, %v7914_v49, 0.0 }
 0xa3c   :  { %2169 = vadd.xlane.f32.xlu1 %v2168_v22 }
 0xa3d   :  { %v2171_v55 = vsel %vm337_vm2, %v7916_v61, 0.0 }
 0xa3e   :  { %v2147_v3 = vpop.f32.mrb[32].mxu0 }
 0xa3f   :  { %v2148_v35 = vadd.f32 %v4889_v28, %v2147_v3  ;;  %v5463_v63 = vpop.f32.mrb[33].mxu0 }
 0xa40   :  { %2172 = vadd.xlane.f32.xlu1 %v2171_v55  ;;  %v2150_v25 = vpop.f32.mrb[34].mxu0  ;;  %v4895_v63 = vld [vmem:[#allocation18] ss:$0 sm:$0xff] }
 0xa41   :  { %v7922_v39 = vadd.f32 %v6602_v9, %v2148_v35  ;;  %v2151_v62 = vadd.f32 %v4889_v28, %v2150_v25  ;;  %v5464_v21 = vpop.f32.mrb[35].mxu0 }
 0xa43   :  { %v7924_v43 = vadd.f32 %v6603_v41, %v2151_v62  ;;  %v2174_v10 = vsel %vm337_vm2, %v7922_v39, 0.0 }
 0xa44   :  { %2175 = vadd.xlane.f32.xlu1 %v2174_v10  ;;  %v4896_v10 = vld [vmem:[#allocation20] ss:$0 sm:$0xff] }
 0xa45   :  { %v2177_v16 = vsel %vm337_vm2, %v7924_v43, 0.0 }
 0xa48   :  { %2178 = vadd.xlane.f32.xlu1 %v2177_v16 }
 0xac1   :  { %v2164_v34 = vpop.xlane.xlu1 %2163 }
 0xac2   :  { %v2180_v7 = vmul.f32 0.03125, %v2164_v34 }
 0xac3   :  { %v2167_v44 = vpop.xlane.xlu0 %2166 }
 0xac4   :  { %v2186_v20 = vsub.f32 %v7906_v57, %v2180_v7  ;;  %v2181_v1 = vmul.f32 0.03125, %v2167_v44 }
 0xac6   :  { %v2187_v0 = vsub.f32 %v7908_v31, %v2181_v1  ;;  %v2192_v13 = vmul.f32 %v2186_v20, %v2186_v20 }
 0xac8   :  { %v2198_v58 = vsel %vm337_vm2, %v2192_v13, 0.0  ;;  %v2193_v11 = vmul.f32 %v2187_v0, %v2187_v0 }
 0xac9   :  { %v2170_v45 = vpop.xlane.xlu1 %2169  ;;  %2199 = vadd.xlane.f32.xlu1 %v2198_v58 }
 0xaca   :  { %v2182_v46 = vmul.f32 0.03125, %v2170_v45  ;;  %v2201_v47 = vsel %vm337_vm2, %v2193_v11, 0.0 }
 0xacc   :  { %v7934_v4 = vsub.f32 %v7914_v49, %v2182_v46 }
 0xacd   :  { %v2173_v18 = vpop.xlane.xlu1 %2172  ;;  %2202 = vadd.xlane.f32.xlu1 %v2201_v47 }
 0xace   :  { %v2183_v53 = vmul.f32 0.03125, %v2173_v18  ;;  %v2194_v48 = vmul.f32 %v7934_v4, %v7934_v4 }
 0xad0   :  { %v7940_v36 = vsub.f32 %v7916_v61, %v2183_v53  ;;  %v2204_v24 = vsel %vm337_vm2, %v2194_v48, 0.0 }
 0xad1   :  { %2205 = vadd.xlane.f32.xlu0 %v2204_v24  ;;  %v2176_v14 = vpop.xlane.xlu1 %2175 }
 0xad2   :  { %v2184_v59 = vmul.f32 0.03125, %v2176_v14  ;;  %v2195_v23 = vmul.f32 %v7940_v36, %v7940_v36 }
 0xad4   :  { %v7946_v52 = vsub.f32 %v7922_v39, %v2184_v59  ;;  %v2207_v37 = vsel %vm337_vm2, %v2195_v23, 0.0 }
 0xad5   :  { %v2179_v51 = vpop.xlane.xlu1 %2178  ;;  %2208 = vadd.xlane.f32.xlu1 %v2207_v37 }
 0xad6   :  { %v2185_v50 = vmul.f32 0.03125, %v2179_v51  ;;  %v2196_v28 = vmul.f32 %v7946_v52, %v7946_v52 }
 0xad8   :  { %v2191_v29 = vsub.f32 %v7924_v43, %v2185_v50  ;;  %v2210_v42 = vsel %vm337_vm2, %v2196_v28, 0.0  ;;  %v6318_v50 = vld [vmem:[#allocation23] sm:$0xff]   ;;  %v4897_v28 = vld [vmem:[#allocation21] ss:$0 sm:$0xff] }
 0xad9   :  { %2211 = vadd.xlane.f32.xlu0 %v2210_v42  ;;  %5482 = vmatpush3.bf16.msra.mxu0 %v6318_v50 }
 0xada   :  { %v2197_v40 = vmul.f32 %v2191_v29, %v2191_v29  ;;  %5483 = vmatprep.subr.bf16.mxu0 %v6953_v8 }
 0xadc   :  { %v2213_v27 = vsel %vm337_vm2, %v2197_v40, 0.0 }
 0xadd   :  { %2214 = vadd.xlane.f32.xlu1 %v2213_v27 }
 0xb56   :  { %v2200_v26 = vpop.xlane.xlu1 %2199 }
 0xb57   :  { %v2216_v33 = vmul.f32 0.03125, %v2200_v26 }
 0xb59   :  { %v2222_v15 = vadd.f32 1e-05, %v2216_v33 }
 0xb5a   :  { %v2203_v60 = vpop.xlane.xlu1 %2202 }
 0xb5b   :  { %6438 = vrsqrt.f32 %v2222_v15  ;;  %v2217_v6 = vmul.f32 0.03125, %v2203_v60 }
 0xb5d   :  { %v2223_v2 = vadd.f32 1e-05, %v2217_v6 }
 0xb5e   :  { %v2206_v30 = vpop.xlane.xlu0 %2205 }
 0xb5f   :  { %6440 = vrsqrt.f32 %v2223_v2  ;;  %v2218_v17 = vmul.f32 0.03125, %v2206_v30 }
 0xb61   :  { %v2224_v38 = vadd.f32 1e-05, %v2218_v17 }
 0xb62   :  { %v2209_v19 = vpop.xlane.xlu1 %2208 }
 0xb63   :  { %6442 = vrsqrt.f32 %v2224_v38  ;;  %v2219_v5 = vmul.f32 0.03125, %v2209_v19 }
 0xb65   :  { %v6439_v56 = vpop.eup %6438  ;;  %v2225_v22 = vadd.f32 1e-05, %v2219_v5 }
 0xb66   :  { %v2234_v3 = vmul.f32 %v6439_v56, %v2186_v20  ;;  %v2212_v35 = vpop.xlane.xlu0 %2211 }
 0xb67   :  { %6444 = vrsqrt.f32 %v2225_v22  ;;  %v2220_v55 = vmul.f32 0.03125, %v2212_v35 }
 0xb68   :  { %v2246_v62 = vmul.f32 %v4895_v63, %v2234_v3 }
 0xb69   :  { %v6441_v25 = vpop.eup %6440  ;;  %v2226_v9 = vadd.f32 1e-05, %v2220_v55 }
 0xb6a   :  { %v2235_v21 = vmul.f32 %v6441_v25, %v2187_v0  ;;  %v2215_v41 = vpop.xlane.xlu1 %2214  ;;  %v2258_v1 = vadd.f32 %v4896_v10, %v2246_v62 }
 0xb6b   :  { %6446 = vrsqrt.f32 %v2226_v9  ;;  %v2221_v16 = vmul.f32 0.03125, %v2215_v41 }
 0xb6c   :  { %v2247_v34 = vmul.f32 %v4895_v63, %v2235_v21 }
 0xb6d   :  { %v6443_v7 = vpop.eup %6442  ;;  %v2227_v44 = vadd.f32 1e-05, %v2221_v16 }
 0xb6e   :  { %v2259_v13 = vadd.f32 %v4896_v10, %v2247_v34  ;;  %v2236_v58 = vmul.f32 %v6443_v7, %v7934_v4 }
 0xb6f   :  { %6448 = vrsqrt.f32 %v2227_v44 }
 0xb70   :  { %v2264_v20 = vpack.c.bf16 %v2259_v13, %v2258_v1  ;;  %v2248_v46 = vmul.f32 %v4895_v63, %v2236_v58 }
 0xb71   :  { %v6445_v11 = vpop.eup %6444 }
 0xb72   :  { %5470 = vmatmul.mubr.msk.bf16.vlgmr.msra.gmra.mrb[40].mxu1 %vm337_vm2, %v2264_v20  ;;  %v2237_v45 = vmul.f32 %v6445_v11, %v7940_v36  ;;  %v2260_v18 = vadd.f32 %v4896_v10, %v2248_v46 }
 0xb73   :  { %5473 = vmatprep.mubr.msk.bf16.mxu1 %vm6954_vm3, %v6953_v8 }
 0xb74   :  { %v2249_v0 = vmul.f32 %v4895_v63, %v2237_v45 }
 0xb75   :  { %v6447_v47 = vpop.eup %6446 }
 0xb76   :  { %v2261_v53 = vadd.f32 %v4896_v10, %v2249_v0  ;;  %v2238_v48 = vmul.f32 %v6447_v47, %v7946_v52  ;;  %v6319_v52 = vld [vmem:[#allocation23 + $0x8] sm:$0xff]  }
 0xb77   :  { %5484 = vmatpush3.bf16.msra.mxu0 %v6319_v52 }
 0xb78   :  { %v2265_v24 = vpack.c.bf16 %v2261_v53, %v2260_v18  ;;  %v2250_v59 = vmul.f32 %v4895_v63, %v2238_v48 }
 0xb79   :  { %v6449_v14 = vpop.eup %6448 }
 0xb7a   :  { %5474 = vmatmul.mubr.msk.bf16.gmra.mrb[44].mxu1 %vm337_vm2, %v2265_v24  ;;  %v2239_v4 = vmul.f32 %v6449_v14, %v2191_v29  ;;  %v2262_v23 = vadd.f32 %v4896_v10, %v2250_v59 }
 0xb7b   :  { %5477 = vmatprep.mubr.msk.bf16.mxu1 %vm6954_vm3, %v6953_v8 }
 0xb7c   :  { %v2251_v36 = vmul.f32 %v4895_v63, %v2239_v4 }
 0xb7e   :  { %v2263_v37 = vadd.f32 %v4896_v10, %v2251_v36 }
 0xb80   :  { %v2266_v51 = vpack.c.bf16 %v2263_v37, %v2262_v23 }
 0xb82   :  { %5478 = vmatmul.mubr.msk.bf16.gmra.mrb[48].mxu1 %vm337_vm2, %v2266_v51 }
 0xb83   :  { %5501 = vmatprep.mubr.msk.bf16.mxu1 %vm6954_vm3, %v6953_v8 }
 0xc45   :  { %v2333_v29 = vpop.f32.mrb[40].mxu1 }
 0xc46   :  { %v2334_v42 = vadd.f32 %v4897_v28, %v2333_v29  ;;  %v5471_v40 = vpop.f32.mrb[41].mxu1 }
 0xc47   :  { %v2336_v27 = vpop.f32.mrb[42].mxu1 }
 0xc48   :  { %v2362_v12 = vmul.f32 0.044715, %v2334_v42  ;;  %v2337_v54 = vadd.f32 %v4897_v28, %v2336_v27  ;;  %v5472_v26 = vpop.f32.mrb[43].mxu1  ;;  %v2356_v59 = vmul.f32 0.5, %v2334_v42 }
 0xc4a   :  { %v2368_v33 = vmul.f32 %v2362_v12, %v2334_v42  ;;  %v2363_v15 = vmul.f32 0.044715, %v2337_v54  ;;  %v2357_v36 = vmul.f32 0.5, %v2337_v54 }
 0xc4c   :  { %v2374_v60 = vmul.f32 %v2368_v33, %v2334_v42  ;;  %v2369_v6 = vmul.f32 %v2363_v15, %v2337_v54 }
 0xc4d   :  { %v2341_v2 = vpop.f32.mrb[44].mxu1 }
 0xc4e   :  { %v2380_v30 = vadd.f32 %v2374_v60, %v2334_v42  ;;  %v2375_v17 = vmul.f32 %v2369_v6, %v2337_v54  ;;  %v2342_v38 = vadd.f32 %v4897_v28, %v2341_v2  ;;  %v5475_v19 = vpop.f32.mrb[45].mxu1 }
 0xc4f   :  { %v2344_v5 = vpop.f32.mrb[46].mxu1 }
 0xc50   :  { %v2386_v56 = vmul.f32 0.7978846, %v2380_v30  ;;  %v2381_v22 = vadd.f32 %v2375_v17, %v2337_v54  ;;  %v2364_v3 = vmul.f32 0.044715, %v2342_v38  ;;  %v2345_v35 = vadd.f32 %v4897_v28, %v2344_v5  ;;  %v5476_v63 = vpop.f32.mrb[47].mxu1 }
 0xc51   :  { %v2358_v26 = vmul.f32 0.5, %v2342_v38 }
 0xc52   :  { %6450 = vtanh.f32 %v2386_v56  ;;  %v2387_v55 = vmul.f32 0.7978846, %v2381_v22  ;;  %v2370_v25 = vmul.f32 %v2364_v3, %v2342_v38  ;;  %v2365_v9 = vmul.f32 0.044715, %v2345_v35 }
 0xc53   :  { %v2359_v42 = vmul.f32 0.5, %v2345_v35 }
 0xc54   :  { %6452 = vtanh.f32 %v2387_v55  ;;  %v2376_v62 = vmul.f32 %v2370_v25, %v2342_v38  ;;  %v2371_v21 = vmul.f32 %v2365_v9, %v2345_v35 }
 0xc55   :  { %v2349_v41 = vpop.f32.mrb[48].mxu1 }
 0xc56   :  { %v2382_v10 = vadd.f32 %v2376_v62, %v2342_v38  ;;  %v2377_v16 = vmul.f32 %v2371_v21, %v2345_v35  ;;  %v2350_v34 = vadd.f32 %v4897_v28, %v2349_v41  ;;  %v5479_v7 = vpop.f32.mrb[49].mxu1  ;;  %v4903_v38 = vld [vmem:[%s8757_s15] ss:$0 sm:$0xff] }
 0xc57   :  { %v2352_v44 = vpop.f32.mrb[50].mxu1 }
 0xc58   :  { %v2388_v1 = vmul.f32 0.7978846, %v2382_v10  ;;  %v2383_v13 = vadd.f32 %v2377_v16, %v2345_v35  ;;  %v2366_v58 = vmul.f32 0.044715, %v2350_v34  ;;  %v2353_v20 = vadd.f32 %v4897_v28, %v2352_v44  ;;  %v5480_v11 = vpop.f32.mrb[51].mxu1 }
 0xc59   :  { %v2360_v17 = vmul.f32 0.5, %v2350_v34 }
 0xc5a   :  { %6454 = vtanh.f32 %v2388_v1  ;;  %v2389_v45 = vmul.f32 0.7978846, %v2383_v13  ;;  %v2372_v46 = vmul.f32 %v2366_v58, %v2350_v34  ;;  %v2367_v0 = vmul.f32 0.044715, %v2353_v20 }
 0xc5b   :  { %v2361_v19 = vmul.f32 0.5, %v2353_v20 }
 0xc5c   :  { %v6451_v47 = vpop.eup %6450  ;;  %6456 = vtanh.f32 %v2389_v45  ;;  %v2378_v18 = vmul.f32 %v2372_v46, %v2350_v34  ;;  %v2373_v53 = vmul.f32 %v2367_v0, %v2353_v20 }
 0xc5d   :  { %v2398_v48 = vadd.f32 1.0, %v6451_v47 }
 0xc5e   :  { %v6453_v24 = vpop.eup %6452  ;;  %v2384_v14 = vadd.f32 %v2378_v18, %v2350_v34  ;;  %v2379_v4 = vmul.f32 %v2373_v53, %v2353_v20 }
 0xc5f   :  { %v2399_v23 = vadd.f32 1.0, %v6453_v24  ;;  %v2404_v50 = vmul.f32 %v2398_v48, %v2356_v59 }
 0xc60   :  { %v2390_v37 = vmul.f32 0.7978846, %v2384_v14  ;;  %v2385_v51 = vadd.f32 %v2379_v4, %v2353_v20 }
 0xc61   :  { %v2405_v52 = vmul.f32 %v2399_v23, %v2357_v36 }
 0xc62   :  { %6458 = vtanh.f32 %v2390_v37  ;;  %v2391_v28 = vmul.f32 0.7978846, %v2385_v51 }
 0xc63   :  { %v2410_v29 = vpack.c.bf16 %v2405_v52, %v2404_v50 }
 0xc64   :  { %v6455_v40 = vpop.eup %6454  ;;  %6460 = vtanh.f32 %v2391_v28 }
 0xc65   :  { %5486 = vmatmul.mubr.msk.bf16.vlgmr.msra.gmra.mrb[36].mxu0 %vm337_vm2, %v2410_v29  ;;  %v2400_v27 = vadd.f32 1.0, %v6455_v40 }
 0xc66   :  { %v6457_v12 = vpop.eup %6456  ;;  %5489 = vmatprep.mubr.msk.bf16.mxu0 %vm6954_vm3, %v6953_v8 }
 0xc67   :  { %v2401_v54 = vadd.f32 1.0, %v6457_v12  ;;  %v2406_v33 = vmul.f32 %v2400_v27, %v2358_v26 }
 0xc69   :  { %v2407_v15 = vmul.f32 %v2401_v54, %v2359_v42 }
 0xc6b   :  { %v2411_v60 = vpack.c.bf16 %v2407_v15, %v2406_v33 }
 0xc6c   :  { %v6459_v6 = vpop.eup %6458 }
 0xc6d   :  { %5490 = vmatmul.mubr.msk.bf16.gmra.mrb[40].mxu0 %vm337_vm2, %v2411_v60  ;;  %v2402_v2 = vadd.f32 1.0, %v6459_v6 }
 0xc6e   :  { %v6461_v30 = vpop.eup %6460  ;;  %5493 = vmatprep.mubr.msk.bf16.mxu0 %vm6954_vm3, %v6953_v8 }
 0xc6f   :  { %v2403_v5 = vadd.f32 1.0, %v6461_v30  ;;  %v2408_v56 = vmul.f32 %v2402_v2, %v2360_v17 }
 0xc71   :  { %v2409_v22 = vmul.f32 %v2403_v5, %v2361_v19 }
 0xc73   :  { %v2412_v3 = vpack.c.bf16 %v2409_v22, %v2408_v56 }
 0xc75   :  { %5494 = vmatmul.mubr.msk.bf16.gmra.mrb[44].mxu0 %vm337_vm2, %v2412_v3  ;;  %v6320_v3 = vld [vmem:[#allocation14 + $0x10] sm:$0xff]  }
 0xc76   :  { %5498 = vmatpush3.bf16.msra.mxu1 %v6320_v3 }
 0xc77   :  { %5499 = vmatprep.subr.bf16.mxu1 %v6953_v8 }
 0xd38   :  { %v2479_v35 = vpop.f32.mrb[36].mxu0 }
 0xd39   :  { %v2480_v63 = vadd.f32 %v4903_v38, %v2479_v35  ;;  %v5487_v55 = vpop.f32.mrb[37].mxu0 }
 0xd3a   :  { %v2482_v25 = vpop.f32.mrb[38].mxu0 }
 0xd3b   :  { %v7986_v9 = vadd.f32 %v2480_v63, %v7906_v57  ;;  %v2483_v62 = vadd.f32 %v4903_v38, %v2482_v25  ;;  %v5488_v21 = vpop.f32.mrb[39].mxu0 }
 0xd3d   :  { %v7989_v41 = vadd.f32 %v2483_v62, %v7908_v31  ;;  %v2512_v10 = vsel %vm337_vm2, %v7986_v9, 0.0 }
 0xd3e   :  { %2513 = vadd.xlane.f32.xlu0 %v2512_v10 }
 0xd3f   :  { %v2515_v16 = vsel %vm337_vm2, %v7989_v41, 0.0 }
 0xd40   :  { %2516 = vadd.xlane.f32.xlu1 %v2515_v16  ;;  %v2487_v34 = vpop.f32.mrb[40].mxu0 }
 0xd41   :  { %v2488_v7 = vadd.f32 %v4903_v38, %v2487_v34  ;;  %v5491_v44 = vpop.f32.mrb[41].mxu0 }
 0xd42   :  { %v2490_v1 = vpop.f32.mrb[42].mxu0 }
 0xd43   :  { %v7996_v57 = vadd.f32 %v2488_v7, %v7914_v49  ;;  %v2491_v13 = vadd.f32 %v4903_v38, %v2490_v1  ;;  %v5492_v58 = vpop.f32.mrb[43].mxu0 }
 0xd44   :  { %v4909_v58 = vld [vmem:[#allocation11 + $0x1] ss:$0 sm:$0xff] }
 0xd45   :  { %v7999_v31 = vadd.f32 %v2491_v13, %v7916_v61  ;;  %v2518_v20 = vsel %vm337_vm2, %v7996_v57, 0.0 }
 0xd46   :  { %2519 = vadd.xlane.f32.xlu0 %v2518_v20 }
 0xd47   :  { %v2521_v11 = vsel %vm337_vm2, %v7999_v31, 0.0 }
 0xd48   :  { %2522 = vadd.xlane.f32.xlu1 %v2521_v11  ;;  %v2495_v45 = vpop.f32.mrb[44].mxu0 }
 0xd49   :  { %v2496_v46 = vadd.f32 %v4903_v38, %v2495_v45  ;;  %v5495_v0 = vpop.f32.mrb[45].mxu0 }
 0xd4a   :  { %v2498_v47 = vpop.f32.mrb[46].mxu0 }
 0xd4b   :  { %v8006_v49 = vadd.f32 %v2496_v46, %v7922_v39  ;;  %v2499_v18 = vadd.f32 %v4903_v38, %v2498_v47  ;;  %v5496_v53 = vpop.f32.mrb[47].mxu0  ;;  %v6321_v38 = vld [vmem:[#allocation14 + $0x18] sm:$0xff]  }
 0xd4c   :  { %5500 = vmatpush3.bf16.msra.mxu1 %v6321_v38  ;;  %v4910_v53 = vld [vmem:[#allocation12 + $0x1] ss:$0 sm:$0xff] }
 0xd4d   :  { %v8009_v61 = vadd.f32 %v2499_v18, %v7924_v43  ;;  %v2524_v48 = vsel %vm337_vm2, %v8006_v49, 0.0 }
 0xd4e   :  { %2525 = vadd.xlane.f32.xlu0 %v2524_v48 }
 0xd4f   :  { %v2527_v24 = vsel %vm337_vm2, %v8009_v61, 0.0 }
 0xd50   :  { %2528 = vadd.xlane.f32.xlu1 %v2527_v24 }
 0xdcb   :  { %v2514_v14 = vpop.xlane.xlu0 %2513 }
 0xdcc   :  { %v2530_v4 = vmul.f32 0.03125, %v2514_v14 }
 0xdcd   :  { %v2517_v59 = vpop.xlane.xlu1 %2516 }
 0xdce   :  { %v2536_v36 = vsub.f32 %v7986_v9, %v2530_v4  ;;  %v2531_v39 = vmul.f32 0.03125, %v2517_v59 }
 0xdd0   :  { %v2537_v23 = vsub.f32 %v7989_v41, %v2531_v39  ;;  %v2542_v37 = vmul.f32 %v2536_v36, %v2536_v36 }
 0xdd2   :  { %v2548_v43 = vsel %vm337_vm2, %v2542_v37, 0.0  ;;  %v2543_v51 = vmul.f32 %v2537_v23, %v2537_v23 }
 0xdd3   :  { %2549 = vadd.xlane.f32.xlu0 %v2548_v43  ;;  %v2520_v50 = vpop.xlane.xlu0 %2519 }
 0xdd4   :  { %v2532_v52 = vmul.f32 0.03125, %v2520_v50  ;;  %v2551_v28 = vsel %vm337_vm2, %v2543_v51, 0.0 }
 0xdd5   :  { %v2523_v29 = vpop.xlane.xlu1 %2522  ;;  %2552 = vadd.xlane.f32.xlu1 %v2551_v28 }
 0xdd6   :  { %v2538_v40 = vsub.f32 %v7996_v57, %v2532_v52  ;;  %v2533_v27 = vmul.f32 0.03125, %v2523_v29 }
 0xdd8   :  { %v8021_v12 = vsub.f32 %v7999_v31, %v2533_v27  ;;  %v2544_v26 = vmul.f32 %v2538_v40, %v2538_v40 }
 0xdda   :  { %v2554_v42 = vsel %vm337_vm2, %v2544_v26, 0.0  ;;  %v2545_v54 = vmul.f32 %v8021_v12, %v8021_v12 }
 0xddb   :  { %2555 = vadd.xlane.f32.xlu0 %v2554_v42  ;;  %v2526_v33 = vpop.xlane.xlu0 %2525 }
 0xddc   :  { %v2534_v15 = vmul.f32 0.03125, %v2526_v33  ;;  %v2557_v60 = vsel %vm337_vm2, %v2545_v54, 0.0 }
 0xddd   :  { %2558 = vadd.xlane.f32.xlu1 %v2557_v60  ;;  %v2529_v6 = vpop.xlane.xlu1 %2528 }
 0xdde   :  { %v2540_v2 = vsub.f32 %v8006_v49, %v2534_v15  ;;  %v2535_v30 = vmul.f32 0.03125, %v2529_v6 }
 0xde0   :  { %v2541_v17 = vsub.f32 %v8009_v61, %v2535_v30  ;;  %v2546_v19 = vmul.f32 %v2540_v2, %v2540_v2 }
 0xde2   :  { %v2560_v5 = vsel %vm337_vm2, %v2546_v19, 0.0  ;;  %v2547_v56 = vmul.f32 %v2541_v17, %v2541_v17 }
 0xde3   :  { %2561 = vadd.xlane.f32.xlu0 %v2560_v5 }
 0xde4   :  { %v2563_v22 = vsel %vm337_vm2, %v2547_v56, 0.0 }
 0xde5   :  { %2564 = vadd.xlane.f32.xlu1 %v2563_v22 }
 0xe60   :  { %v2550_v35 = vpop.xlane.xlu0 %2549 }
 0xe61   :  { %v2566_v63 = vmul.f32 0.03125, %v2550_v35 }
 0xe62   :  { %v2553_v55 = vpop.xlane.xlu1 %2552 }
 0xe63   :  { %v2572_v25 = vadd.f32 1e-05, %v2566_v63  ;;  %v2567_v62 = vmul.f32 0.03125, %v2553_v55 }
 0xe65   :  { %6462 = vrsqrt.f32 %v2572_v25  ;;  %v2573_v21 = vadd.f32 1e-05, %v2567_v62 }
 0xe67   :  { %6464 = vrsqrt.f32 %v2573_v21 }
 0xe68   :  { %v2556_v10 = vpop.xlane.xlu0 %2555 }
 0xe69   :  { %v2568_v16 = vmul.f32 0.03125, %v2556_v10 }
 0xe6a   :  { %v2559_v34 = vpop.xlane.xlu1 %2558 }
 0xe6b   :  { %v2574_v7 = vadd.f32 1e-05, %v2568_v16  ;;  %v2569_v44 = vmul.f32 0.03125, %v2559_v34 }
 0xe6d   :  { %6466 = vrsqrt.f32 %v2574_v7  ;;  %v2575_v1 = vadd.f32 1e-05, %v2569_v44 }
 0xe6f   :  { %v6463_v13 = vpop.eup %6462  ;;  %6468 = vrsqrt.f32 %v2575_v1 }
 0xe70   :  { %v2584_v20 = vmul.f32 %v6463_v13, %v2536_v36  ;;  %v2562_v11 = vpop.xlane.xlu0 %2561 }
 0xe71   :  { %v6465_v45 = vpop.eup %6464  ;;  %v2570_v46 = vmul.f32 0.03125, %v2562_v11 }
 0xe72   :  { %v2596_v0 = vmul.f32 %v4909_v58, %v2584_v20  ;;  %v2585_v47 = vmul.f32 %v6465_v45, %v2537_v23  ;;  %v2565_v18 = vpop.xlane.xlu1 %2564 }
 0xe73   :  { %v2576_v48 = vadd.f32 1e-05, %v2570_v46  ;;  %v2571_v24 = vmul.f32 0.03125, %v2565_v18 }
 0xe74   :  { %v2597_v14 = vmul.f32 %v4909_v58, %v2585_v47  ;;  %v2608_v59 = vadd.f32 %v4910_v53, %v2596_v0 }
 0xe75   :  { %6470 = vrsqrt.f32 %v2576_v48  ;;  %v2577_v4 = vadd.f32 1e-05, %v2571_v24 }
 0xe76   :  { %v2609_v39 = vadd.f32 %v4910_v53, %v2597_v14 }
 0xe77   :  { %v6467_v37 = vpop.eup %6466  ;;  %6472 = vrsqrt.f32 %v2577_v4 }
 0xe78   :  { %v2586_v43 = vmul.f32 %v6467_v37, %v2538_v40  ;;  %v2614_v51 = vpack.c.bf16 %v2609_v39, %v2608_v59 }
 0xe79   :  { %v6469_v50 = vpop.eup %6468 }
 0xe7a   :  { %5502 = vmatmul.mubr.msk.bf16.vlgmr.msra.gmra.mrb[52].mxu1 %vm337_vm2, %v2614_v51  ;;  %v2587_v36 = vmul.f32 %v6469_v50, %v8021_v12  ;;  %v2598_v52 = vmul.f32 %v4909_v58, %v2586_v43 }
 0xe7b   :  { %5505 = vmatprep.mubr.msk.bf16.mxu1 %vm6954_vm3, %v6953_v8 }
 0xe7c   :  { %v2599_v23 = vmul.f32 %v4909_v58, %v2587_v36  ;;  %v2610_v28 = vadd.f32 %v4910_v53, %v2598_v52 }
 0xe7e   :  { %v2611_v29 = vadd.f32 %v4910_v53, %v2599_v23 }
 0xe7f   :  { %v6471_v27 = vpop.eup %6470 }
 0xe80   :  { %v2588_v26 = vmul.f32 %v6471_v27, %v2540_v2  ;;  %v2615_v42 = vpack.c.bf16 %v2611_v29, %v2610_v28 }
 0xe81   :  { %v6473_v54 = vpop.eup %6472 }
 0xe82   :  { %5506 = vmatmul.mubr.msk.bf16.gmra.mrb[56].mxu1 %vm337_vm2, %v2615_v42  ;;  %v2589_v40 = vmul.f32 %v6473_v54, %v2541_v17  ;;  %v2600_v33 = vmul.f32 %v4909_v58, %v2588_v26 }
 0xe83   :  { %5509 = vmatprep.mubr.msk.bf16.mxu1 %vm6954_vm3, %v6953_v8 }
 0xe84   :  { %v2601_v15 = vmul.f32 %v4909_v58, %v2589_v40  ;;  %v2612_v12 = vadd.f32 %v4910_v53, %v2600_v33 }
 0xe86   :  { %v2613_v60 = vadd.f32 %v4910_v53, %v2601_v15 }
 0xe88   :  { %v2616_v6 = vpack.c.bf16 %v2613_v60, %v2612_v12 }
 0xe8a   :  { %5510 = vmatmul.mubr.msk.bf16.gmra.mrb[60].mxu1 %vm337_vm2, %v2616_v6 }
 0xf4d   :  { %v2677_v30 = vpop.f32.mrb[52].mxu1 }
 0xf4e   :  { %2706 = vrot.lane.b32.xlu0 %v2677_v30, %s6955_s4  ;;  %v5503_v19 = vpop.f32.mrb[53].mxu1  ;;  %5525 = vmatprep.mubr.msk.f32.mxu0 %vm600_vm4, %v2677_v30 }
 0xf4f   :  { %v8042_v2 = vpop.f32.mrb[54].mxu1 }
 0xf50   :  { %2708 = vrot.lane.b32.xlu1 %v8042_v2, %s6955_s4  ;;  %v5504_v17 = vpop.f32.mrb[55].mxu1  ;;  %v8047_v5 = vpack.i.bf16 %v8042_v2, %v2677_v30 }
 0xf55   :  { %v8049_v56 = vpop.f32.mrb[56].mxu1 }
 0xf56   :  { %2710 = vrot.lane.b32.xlu1 %v8049_v56, %s6955_s4  ;;  %v5507_v22 = vpop.f32.mrb[57].mxu1 }
 0xf57   :  { %v8053_v3 = vpop.f32.mrb[58].mxu1 }
 0xf58   :  { %v5508_v38 = vpop.f32.mrb[59].mxu1  ;;  %v8057_v35 = vpack.i.bf16 %v8053_v3, %v8049_v56 }
 0xf5a   :  { %2712 = vrot.lane.b32.xlu1 %v8053_v3, %s6955_s4 }
 0xf5d   :  { %v8061_v63 = vpop.f32.mrb[60].mxu1 }
 0xf5e   :  { %2714 = vrot.lane.b32.xlu0 %v8061_v63, %s6955_s4  ;;  %v5511_v55 = vpop.f32.mrb[61].mxu1 }
 0xf5f   :  { %v8065_v25 = vpop.f32.mrb[62].mxu1 }
 0xf60   :  { %2716 = vrot.lane.b32.xlu1 %v8065_v25, %s6955_s4  ;;  %v5512_v62 = vpop.f32.mrb[63].mxu1  ;;  %v8071_v21 = vpack.i.bf16 %v8065_v25, %v8061_v63  ;;  %s8800_s4 = sld [smem:[#allocation40_spill]] }
 0xf62   :  { %2718 = vrot.lane.b32.xlu0 %v2677_v30, %s6956_s0 }
 0xf64   :  { %2720 = vrot.lane.b32.xlu1 %v8042_v2, %s6956_s0 }
 0xf66   :  { %2730 = vrot.lane.b32.xlu0 %v2677_v30, %s6957_s26 }
 0xf68   :  { %2732 = vrot.lane.b32.xlu1 %v8042_v2, %s6957_s26 }
 0xf6a   :  { %2722 = vrot.lane.b32.xlu0 %v8049_v56, %s6956_s0 }
 0xf6c   :  { %2724 = vrot.lane.b32.xlu1 %v8053_v3, %s6956_s0 }
 0xf6e   :  { %2734 = vrot.lane.b32.xlu0 %v8049_v56, %s6957_s26 }
 0xf70   :  { %2736 = vrot.lane.b32.xlu1 %v8053_v3, %s6957_s26 }
 0xf72   :  { %2726 = vrot.lane.b32.xlu0 %v8061_v63, %s6956_s0 }
 0xf74   :  { %2728 = vrot.lane.b32.xlu1 %v8065_v25, %s6956_s0  ;;  %s6959_s0 = smov [#allocation24]  }
 0xf76   :  { %2738 = vrot.lane.b32.xlu0 %v8061_v63, %s6957_s26 }
 0xf78   :  { %2740 = vrot.lane.b32.xlu1 %v8065_v25, %s6957_s26  ;;  %s4790_s26 = sshll.u32 %s6959_s0, 4  ;;  %s4791_s26 = int_to_ptr.vmem [resolvable:$true] %s4790_s26 }
 0xf79   :  { %p6901_p7 = scmp.lt.s32.totalorder %s4791_s26, %s4791_s26 }
 0xf7a   :  { %6158 = vrot.lane.b32.xlu0 %v8047_v5, %s6958_s27 }
 0xf7e   :  { %6168 = vrot.lane.b32.xlu0 %v8057_v35, %s6958_s27 }
 0xf82   :  { %6178 = vrot.lane.b32.xlu0 %v8071_v21, %s6958_s27 }
 0xfc0   :  { %v2707_v10 = vpop.permute.xlu0 %2706 }
 0xfc1   :  { %5546 = vmatprep.mubr.msk.f32.mxu1 %vm600_vm4, %v2707_v10 }
 0xfc2   :  { %v8102_v16 = vpop.permute.xlu1 %2708 }
 0xfc3   :  { %v6162_v34 = vpack.i.bf16 %v8102_v16, %v2707_v10 }
 0xfc5   :  { %6163 = vrot.lane.b32.xlu1 %v6162_v34, %s6958_s27 }
 0xfc8   :  { %v8106_v7 = vpop.permute.xlu1 %2710 }
 0xfcc   :  { %v8108_v44 = vpop.permute.xlu1 %2712 }
 0xfcd   :  { %v6172_v1 = vpack.i.bf16 %v8108_v44, %v8106_v7 }
 0xfcf   :  { %6173 = vrot.lane.b32.xlu1 %v6172_v1, %s6958_s27 }
 0xfd0   :  { %v8113_v13 = vpop.permute.xlu0 %2714 }
 0xfd2   :  { %v8115_v58 = vpop.permute.xlu1 %2716 }
 0xfd3   :  { %v8119_v20 = vpack.i.bf16 %v8115_v58, %v8113_v13 }
 0xfd4   :  { %v2719_v11 = vpop.permute.xlu0 %2718 }
 0xfd5   :  { %6183 = vrot.lane.b32.xlu1 %v8119_v20, %s6958_s27 }
 0xfd6   :  { %v8123_v45 = vpop.permute.xlu1 %2720 }
 0xfd7   :  { %v8126_v46 = vpack.i.bf16 %v8123_v45, %v2719_v11 }
 0xfd8   :  { %v8128_v0 = vpop.permute.xlu0 %2730 }
 0xfd9   :  { %6188 = vrot.lane.b32.xlu0 %v8126_v46, %s6958_s27 }
 0xfda   :  { %v8132_v47 = vpop.permute.xlu1 %2732 }
 0xfdb   :  { %v8136_v18 = vpack.i.bf16 %v8132_v47, %v8128_v0 }
 0xfdc   :  { %v8138_v53 = vpop.permute.xlu0 %2722 }
 0xfdd   :  { %6193 = vrot.lane.b32.xlu1 %v8136_v18, %s6958_s27 }
 0xfde   :  { %v8142_v48 = vpop.permute.xlu1 %2724 }
 0xfdf   :  { %v8146_v24 = vpack.i.bf16 %v8142_v48, %v8138_v53 }
 0xfe0   :  { %v8148_v14 = vpop.permute.xlu0 %2734 }
 0xfe1   :  { %6198 = vrot.lane.b32.xlu0 %v8146_v24, %s6958_s27 }
 0xfe2   :  { %v8152_v4 = vpop.permute.xlu1 %2736 }
 0xfe3   :  { %v8156_v59 = vpack.i.bf16 %v8152_v4, %v8148_v14 }
 0xfe4   :  { %v8158_v39 = vpop.permute.xlu0 %2726 }
 0xfe5   :  { %6203 = vrot.lane.b32.xlu1 %v8156_v59, %s6958_s27 }
 0xfe6   :  { %v8162_v37 = vpop.permute.xlu1 %2728 }
 0xfe7   :  { %v8166_v43 = vpack.i.bf16 %v8162_v37, %v8158_v39 }
 0xfe8   :  { %v8168_v51 = vpop.permute.xlu0 %2738 }
 0xfe9   :  { %6208 = vrot.lane.b32.xlu0 %v8166_v43, %s6958_s27 }
 0xfea   :  { %v8172_v50 = vpop.permute.xlu1 %2740 }
 0xfeb   :  { %v8176_v36 = vpack.i.bf16 %v8172_v50, %v8168_v51 }
 0xfec   :  { %v6159_v52 = vpop.permute.xlu0 %6158 }
 0xfed   :  { %v6161_v23 = vunpack.i.h.bf16 %v6159_v52  ;;  %v6160_v28 = vunpack.i.l.bf16 %v6159_v52  ;;  %6223 = vrot.lane.b32.xlu0 %v6162_v34, %s6943_s6  ;;  %6213 = vrot.lane.b32.xlu1 %v8176_v36, %s6958_s27 }
 0xfef   :  { %v5857_v29 = vpack.c.bf16 %v6161_v23, %v6160_v28 }
 0xff0   :  { %v6169_v27 = vpop.permute.xlu0 %6168 }
 0xff1   :  { %v6171_v26 = vunpack.i.h.bf16 %v6169_v27  ;;  %v6170_v42 = vunpack.i.l.bf16 %v6169_v27  ;;  %6218 = vrot.lane.b32.xlu1 %v8047_v5, %s6943_s6  ;;  %5859 = vmatprep.subr.msk.bf16.mxu0 %vm7473_vm5, %v5857_v29 }
 0xff2   :  { %5862 = vmatpush3.bf16.xpose.msk.msra.mxu0 %vm7473_vm5, %v5857_v29 }
 0xff3   :  { %v5863_v54 = vpack.c.bf16 %v6171_v26, %v6170_v42 }
 0xff4   :  { %v6179_v40 = vpop.permute.xlu0 %6178 }
 0xff5   :  { %v6181_v33 = vunpack.i.h.bf16 %v6179_v40  ;;  %v6180_v15 = vunpack.i.l.bf16 %v6179_v40  ;;  %6228 = vrot.lane.b32.xlu1 %v8057_v35, %s6943_s6  ;;  %5865 = vmatprep.subr.msk.bf16.mxu0 %vm7473_vm5, %v5863_v54 }
 0xff7   :  { %v5869_v12 = vpack.c.bf16 %v6181_v33, %v6180_v15 }
 0xff9   :  { %6233 = vrot.lane.b32.xlu1 %v6172_v1, %s6943_s6 }
 0xffa   :  { %5868 = vmatpush3.bf16.xpose.msk.msra.mxu0 %vm7473_vm5, %v5863_v54 }
 0xffb   :  { %5871 = vmatprep.subr.msk.bf16.mxu0 %vm7473_vm5, %v5869_v12 }
0x1002   :  { %5874 = vmatpush3.bf16.xpose.msk.msra.mxu0 %vm7473_vm5, %v5869_v12 }
0x1009   :  { %5526 = vmatmul.mubr.msk.f32.vlgmr.msra.gmra.mrb[48].mxu0 %vm600_vm4, %v8042_v2 }
0x100a   :  { %5528 = vmatprep.mubr.msk.f32.mxu0 %vm600_vm4, %v8049_v56 }
0x100d   :  { %5529 = vmatmul.mubr.msk.f32.gmra.mrb[50].mxu0 %vm600_vm4, %v8053_v3 }
0x100e   :  { %5531 = vmatprep.mubr.msk.f32.mxu0 %vm600_vm4, %v8061_v63 }
0x1011   :  { %5532 = vmatmul.mubr.msk.f32.gmra.mrb[52].mxu0 %vm600_vm4, %v8065_v25 }
0x1012   :  { %5567 = vmatprep.mubr.msk.f32.mxu0 %vm600_vm4, %v2719_v11 }
0x1037   :  { %v6164_v60 = vpop.permute.xlu1 %6163 }
0x1038   :  { %v6166_v6 = vunpack.i.h.bf16 %v6164_v60  ;;  %v6165_v30 = vunpack.i.l.bf16 %v6164_v60 }
0x103a   :  { %v5875_v19 = vpack.c.bf16 %v6166_v6, %v6165_v30 }
0x103c   :  { %5877 = vmatprep.subr.msk.bf16.mxu1 %vm7473_vm5, %v5875_v19 }
0x103d   :  { %5880 = vmatpush3.bf16.xpose.msk.msra.mxu1 %vm7473_vm5, %v5875_v19 }
0x1041   :  { %v6174_v2 = vpop.permute.xlu1 %6173 }
0x1042   :  { %v6176_v17 = vunpack.i.h.bf16 %v6174_v2  ;;  %v6175_v5 = vunpack.i.l.bf16 %v6174_v2 }
0x1044   :  { %v5881_v56 = vpack.c.bf16 %v6176_v17, %v6175_v5 }
0x1046   :  { %5883 = vmatprep.subr.msk.bf16.mxu1 %vm7473_vm5, %v5881_v56 }
0x1047   :  { %5886 = vmatpush3.bf16.xpose.msk.msra.mxu1 %vm7473_vm5, %v5881_v56  ;;  %v6184_v22 = vpop.permute.xlu1 %6183 }
0x1048   :  { %v6186_v3 = vunpack.i.h.bf16 %v6184_v22  ;;  %v6185_v38 = vunpack.i.l.bf16 %v6184_v22 }
0x104a   :  { %v5887_v35 = vpack.c.bf16 %v6186_v3, %v6185_v38 }
0x104b   :  { %v6189_v63 = vpop.permute.xlu0 %6188 }
0x104c   :  { %v6191_v55 = vunpack.i.h.bf16 %v6189_v63  ;;  %v6190_v25 = vunpack.i.l.bf16 %v6189_v63  ;;  %5889 = vmatprep.subr.msk.bf16.mxu1 %vm7473_vm5, %v5887_v35 }
0x104e   :  { %v5893_v62 = vpack.c.bf16 %v6191_v55, %v6190_v25 }
0x104f   :  { %5892 = vmatpush3.bf16.xpose.msk.msra.mxu1 %vm7473_vm5, %v5887_v35  ;;  %v6194_v10 = vpop.permute.xlu1 %6193 }
0x1050   :  { %v6196_v34 = vunpack.i.h.bf16 %v6194_v10  ;;  %v6195_v1 = vunpack.i.l.bf16 %v6194_v10  ;;  %5895 = vmatprep.subr.msk.bf16.mxu0 %vm7473_vm5, %v5893_v62 }
0x1051   :  { %5898 = vmatpush3.bf16.xpose.msk.msra.mxu0 %vm7473_vm5, %v5893_v62  ;;  %v8296_v62 = vld [vmem:[#allocation6 + $0x10] sm:$0xff] }
0x1052   :  { %v5911_v11 = vpack.c.bf16 %v6196_v34, %v6195_v1 }
0x1053   :  { %v6199_v52 = vpop.permute.xlu0 %6198 }
0x1054   :  { %v6201_v23 = vunpack.i.h.bf16 %v6199_v52  ;;  %v6200_v28 = vunpack.i.l.bf16 %v6199_v52  ;;  %5913 = vmatprep.subr.msk.bf16.mxu1 %vm7473_vm5, %v5911_v11  ;;  %v8305_v52 = vld [vmem:[#allocation6 + $0x28] sm:$0xff] }
0x1056   :  { %v5899_v29 = vpack.c.bf16 %v6201_v23, %v6200_v28  ;;  %5547 = vmatmul.mubr.msk.f32.vlgmr.msra.gmra.mrb[64].mxu1 %vm600_vm4, %v8102_v16 }
0x1057   :  { %5549 = vmatprep.mubr.msk.f32.mxu1 %vm600_vm4, %v8106_v7  ;;  %5916 = vmatpush3.bf16.xpose.msk.msra.mxu1 %vm7473_vm5, %v5911_v11  ;;  %v6204_v27 = vpop.permute.xlu1 %6203 }
0x1058   :  { %v6206_v26 = vunpack.i.h.bf16 %v6204_v27  ;;  %v6205_v42 = vunpack.i.l.bf16 %v6204_v27  ;;  %5901 = vmatprep.subr.msk.bf16.mxu0 %vm7473_vm5, %v5899_v29 }
0x1059   :  { %5904 = vmatpush3.bf16.xpose.msk.msra.mxu0 %vm7473_vm5, %v5899_v29  ;;  %v8310_v29 = vld [vmem:[#allocation6 + $0x20] sm:$0xff] }
0x105a   :  { %v5917_v54 = vpack.c.bf16 %v6206_v26, %v6205_v42  ;;  %5550 = vmatmul.mubr.msk.f32.gmra.mrb[66].mxu1 %vm600_vm4, %v8108_v44 }
0x105b   :  { %5552 = vmatprep.mubr.msk.f32.mxu1 %vm600_vm4, %v8113_v13  ;;  %v6209_v16 = vpop.permute.xlu0 %6208 }
0x105c   :  { %v6211_v7 = vunpack.i.h.bf16 %v6209_v16  ;;  %v6210_v40 = vunpack.i.l.bf16 %v6209_v16  ;;  %5919 = vmatprep.subr.msk.bf16.mxu1 %vm7473_vm5, %v5917_v54 }
0x105e   :  { %v5905_v33 = vpack.c.bf16 %v6211_v7, %v6210_v40  ;;  %5553 = vmatmul.mubr.msk.f32.gmra.mrb[68].mxu1 %vm600_vm4, %v8115_v58 }
0x105f   :  { %5922 = vmatpush3.bf16.xpose.msk.msra.mxu1 %vm7473_vm5, %v5917_v54  ;;  %5588 = vmatprep.mubr.msk.f32.mxu1 %vm600_vm4, %v8128_v0  ;;  %v6214_v44 = vpop.permute.xlu1 %6213  ;;  %v6224_v13 = vpop.permute.xlu0 %6223 }
0x1060   :  { %v6216_v15 = vunpack.i.h.bf16 %v6214_v44  ;;  %v6215_v12 = vunpack.i.l.bf16 %v6214_v44  ;;  %5907 = vmatprep.subr.msk.bf16.mxu0 %vm7473_vm5, %v5905_v33  ;;  %v6226_v6 = vunpack.i.h.bf16 %v6224_v13  ;;  %v6225_v30 = vunpack.i.l.bf16 %v6224_v13 }
0x1061   :  { %5910 = vmatpush3.bf16.xpose.msk.msra.mxu0 %vm7473_vm5, %v5905_v33 }
0x1062   :  { %v5923_v60 = vpack.c.bf16 %v6216_v15, %v6215_v12  ;;  %v5941_v17 = vpack.c.bf16 %v6226_v6, %v6225_v30 }
0x1063   :  { %v6219_v58 = vpop.permute.xlu1 %6218 }
0x1064   :  { %v6221_v19 = vunpack.i.h.bf16 %v6219_v58  ;;  %v6220_v2 = vunpack.i.l.bf16 %v6219_v58  ;;  %5925 = vmatprep.subr.msk.bf16.mxu1 %vm7473_vm5, %v5923_v60 }
0x1066   :  { %v5929_v0 = vpack.c.bf16 %v6221_v19, %v6220_v2 }
0x1067   :  { %v6229_v5 = vpop.permute.xlu1 %6228  ;;  %5928 = vmatpush3.bf16.xpose.msk.msra.mxu1 %vm7473_vm5, %v5923_v60 }
0x1068   :  { %v6231_v56 = vunpack.i.h.bf16 %v6229_v5  ;;  %v6230_v22 = vunpack.i.l.bf16 %v6229_v5  ;;  %5568 = vmatmul.mubr.msk.f32.vlgmr.msra.gmra.mrb[54].mxu0 %vm600_vm4, %v8123_v45  ;;  %5930 = vmatprep.subr.bf16.mxu0 %v5929_v0 }
0x1069   :  { %5942 = vmatprep.subr.bf16.mxu1 %v5941_v17  ;;  %5570 = vmatprep.mubr.msk.f32.mxu0 %vm600_vm4, %v8138_v53 }
0x106a   :  { %v5933_v3 = vpack.c.bf16 %v6231_v56, %v6230_v22  ;;  %5932 = vmatpush3.bf16.msra.mxu0 %v5929_v0 }
0x106b   :  { %v6234_v38 = vpop.permute.xlu1 %6233 }
0x106c   :  { %v6236_v35 = vunpack.i.h.bf16 %v6234_v38  ;;  %v6235_v63 = vunpack.i.l.bf16 %v6234_v38  ;;  %5571 = vmatmul.mubr.msk.f32.gmra.mrb[56].mxu0 %vm600_vm4, %v8142_v48  ;;  %5934 = vmatprep.subr.bf16.mxu0 %v5933_v3 }
0x106d   :  { %5573 = vmatprep.mubr.msk.f32.mxu0 %vm600_vm4, %v8158_v39 }
0x106e   :  { %v5945_v32 = vpack.c.bf16 %v6236_v35, %v6235_v63  ;;  %5936 = vmatpush3.bf16.msra.mxu0 %v5933_v3  ;;  %5589 = vmatmul.mubr.msk.f32.vlgmr.msra.gmra.mrb[70].mxu1 %vm600_vm4, %v8132_v47  ;;  %v8277_v47 = vld [vmem:[#allocation6 + $0x8] sm:$0xff] }
0x106f   :  { %5591 = vmatprep.mubr.msk.f32.mxu1 %vm600_vm4, %v8148_v14  ;;  %5944 = vmatpush3.bf16.msra.mxu1 %v5941_v17  ;;  %v8282_v14 = vld [vmem:[#allocation6] sm:$0xff] }
0x1070   :  { %5574 = vmatmul.mubr.msk.f32.gmra.mrb[58].mxu0 %vm600_vm4, %v8162_v37  ;;  %5946 = vmatprep.subr.bf16.mxu1 %v5945_v32 }
0x1072   :  { %5592 = vmatmul.mubr.msk.f32.gmra.mrb[72].mxu1 %vm600_vm4, %v8152_v4 }
0x1073   :  { %5594 = vmatprep.mubr.msk.f32.mxu1 %vm600_vm4, %v8168_v51  ;;  %5948 = vmatpush3.bf16.msra.mxu1 %v5945_v32 }
0x1076   :  { %5595 = vmatmul.mubr.msk.f32.gmra.mrb[74].mxu1 %vm600_vm4, %v8172_v50  ;;  %v8291_v50 = vld [vmem:[#allocation6 + $0x18] sm:$0xff] }
0x10dc   :  { %v5527_v45 = vpop.f32.mrb[48].mxu0 }
0x10dd   :  { %v8280_v53 = vadd.f32 %v8277_v47, %v5527_v45  ;;  %v2844_v48 = vpop.f32.mrb[49].mxu0 }
0x10de   :  { %v8285_v39 = vadd.f32 %v8282_v14, %v2844_v48 }
0x10df   :  { %v3269_v4 = vsel %vm1113_vm6, %v8280_v53, -inf }
0x10e0   :  { %3270 = vmax.xlane.f32.xlu1 %v3269_v4  ;;  %v5530_v37 = vpop.f32.mrb[50].mxu0  ;;  %v3266_v51 = vsel %vm1113_vm6, %v8285_v39, -inf }
0x10e1   :  { %v8294_v55 = vadd.f32 %v8291_v50, %v5530_v37  ;;  %v2854_v25 = vpop.f32.mrb[51].mxu0  ;;  %3267 = vmax.xlane.f32.xlu0 %v3266_v51 }
0x10e2   :  { %v8299_v10 = vadd.f32 %v8296_v62, %v2854_v25 }
0x10e3   :  { %v3275_v34 = vsel %vm1113_vm6, %v8294_v55, -inf }
0x10e4   :  { %3276 = vmax.xlane.f32.xlu1 %v3275_v34  ;;  %v5533_v1 = vpop.f32.mrb[52].mxu0  ;;  %v3272_v11 = vsel %vm1113_vm6, %v8299_v10, -inf }
0x10e5   :  { %v8308_v23 = vadd.f32 %v8305_v52, %v5533_v1  ;;  %v2864_v28 = vpop.f32.mrb[53].mxu0  ;;  %3273 = vmax.xlane.f32.xlu0 %v3272_v11 }
0x10e6   :  { %v8313_v27 = vadd.f32 %v8310_v29, %v2864_v28 }
0x10e7   :  { %v3281_v26 = vsel %vm1113_vm6, %v8308_v23, -inf }
0x10e8   :  { %3282 = vmax.xlane.f32.xlu1 %v3281_v26  ;;  %v3278_v42 = vsel %vm1113_vm6, %v8313_v27, -inf }
0x10e9   :  { %3279 = vmax.xlane.f32.xlu0 %v3278_v42 }
0x1129   :  { %v5548_v54 = vpop.f32.mrb[64].mxu1 }
0x112a   :  { %v8320_v16 = vadd.f32 %v8277_v47, %v5548_v54  ;;  %v2975_v7 = vpop.f32.mrb[65].mxu1 }
0x112b   :  { %v8323_v40 = vadd.f32 %v8282_v14, %v2975_v7 }
0x112c   :  { %v3287_v33 = vsel %vm1113_vm6, %v8320_v16, -inf }
0x112d   :  { %v5551_v44 = vpop.f32.mrb[66].mxu1  ;;  %3288 = vmax.xlane.f32.xlu0 %v3287_v33  ;;  %v3284_v12 = vsel %vm1113_vm6, %v8323_v40, -inf }
0x112e   :  { %v2985_v15 = vpop.f32.mrb[67].mxu1  ;;  %v8336_v2 = vadd.f32 %v8291_v50, %v5551_v44 }
0x112f   :  { %v8341_v17 = vadd.f32 %v8296_v62, %v2985_v15 }
0x1130   :  { %v3293_v63 = vsel %vm1113_vm6, %v8336_v2, -inf }
0x1131   :  { %v5554_v13 = vpop.f32.mrb[68].mxu1  ;;  %3285 = vmax.xlane.f32.xlu0 %v3284_v12  ;;  %v3290_v48 = vsel %vm1113_vm6, %v8341_v17, -inf }
0x1132   :  { %v2995_v60 = vpop.f32.mrb[69].mxu1  ;;  %v8356_v51 = vadd.f32 %v8305_v52, %v5554_v13 }
0x1133   :  { %v8361_v1 = vadd.f32 %v8310_v29, %v2995_v60 }
0x1134   :  { %v3299_v54 = vsel %vm1113_vm6, %v8356_v51, -inf }
0x1135   :  { %v3296_v33 = vsel %vm1113_vm6, %v8361_v1, -inf }
0x113b   :  { %v5569_v6 = vpop.f32.mrb[54].mxu0 }
0x113c   :  { %v8330_v30 = vadd.f32 %v8277_v47, %v5569_v6  ;;  %v3106_v58 = vpop.f32.mrb[55].mxu0 }
0x113d   :  { %v8333_v19 = vadd.f32 %v8282_v14, %v3106_v58 }
0x113e   :  { %v3305_v0 = vsel %vm1113_vm6, %v8330_v30, -inf }
0x113f   :  { %3306 = vmax.xlane.f32.xlu1 %v3305_v0  ;;  %v5572_v5 = vpop.f32.mrb[56].mxu0  ;;  %v3302_v56 = vsel %vm1113_vm6, %v8333_v19, -inf }
0x1140   :  { %v3116_v22 = vpop.f32.mrb[57].mxu0  ;;  %3303 = vmax.xlane.f32.xlu0 %v3302_v56  ;;  %v8346_v38 = vadd.f32 %v8291_v50, %v5572_v5 }
0x1141   :  { %v5590_v3 = vpop.f32.mrb[70].mxu1  ;;  %v8351_v32 = vadd.f32 %v8296_v62, %v3116_v22 }
0x1142   :  { %v3237_v35 = vpop.f32.mrb[71].mxu1  ;;  %v3311_v34 = vsel %vm1113_vm6, %v8346_v38, -inf  ;;  %v8376_v44 = vadd.f32 %v8277_v47, %v5590_v3 }
0x1143   :  { %3294 = vmax.xlane.f32.xlu1 %v3293_v63  ;;  %v5575_v45 = vpop.f32.mrb[58].mxu0  ;;  %v3308_v11 = vsel %vm1113_vm6, %v8351_v32, -inf  ;;  %v8381_v12 = vadd.f32 %v8282_v14, %v3237_v35 }
0x1144   :  { %v3126_v4 = vpop.f32.mrb[59].mxu0  ;;  %3291 = vmax.xlane.f32.xlu0 %v3290_v48  ;;  %v8366_v26 = vadd.f32 %v8305_v52, %v5575_v45  ;;  %v3323_v6 = vsel %vm1113_vm6, %v8376_v44, -inf }
0x1145   :  { %v5593_v37 = vpop.f32.mrb[72].mxu1  ;;  %v8371_v7 = vadd.f32 %v8310_v29, %v3126_v4  ;;  %v3320_v58 = vsel %vm1113_vm6, %v8381_v12, -inf }
0x1146   :  { %v3247_v25 = vpop.f32.mrb[73].mxu1  ;;  %v3317_v15 = vsel %vm1113_vm6, %v8366_v26, -inf  ;;  %v8386_v60 = vadd.f32 %v8291_v50, %v5593_v37 }
0x1147   :  { %3312 = vmax.xlane.f32.xlu1 %v3311_v34  ;;  %v3314_v13 = vsel %vm1113_vm6, %v8371_v7, -inf  ;;  %v8391_v47 = vadd.f32 %v8296_v62, %v3247_v25 }
0x1148   :  { %3309 = vmax.xlane.f32.xlu0 %v3308_v11  ;;  %v3329_v0 = vsel %vm1113_vm6, %v8386_v60, -inf }
0x1149   :  { %v5596_v28 = vpop.f32.mrb[74].mxu1  ;;  %v3326_v5 = vsel %vm1113_vm6, %v8391_v47, -inf }
0x114a   :  { %v3257_v42 = vpop.f32.mrb[75].mxu1  ;;  %v8396_v14 = vadd.f32 %v8305_v52, %v5596_v28 }
0x114b   :  { %3300 = vmax.xlane.f32.xlu1 %v3299_v54  ;;  %v8401_v50 = vadd.f32 %v8310_v29, %v3257_v42 }
0x114c   :  { %3297 = vmax.xlane.f32.xlu0 %v3296_v33  ;;  %v3335_v62 = vsel %vm1113_vm6, %v8396_v14, -inf }
0x114d   :  { %v3332_v56 = vsel %vm1113_vm6, %v8401_v50, -inf }
0x114f   :  { %3318 = vmax.xlane.f32.xlu1 %v3317_v15 }
0x1150   :  { %3315 = vmax.xlane.f32.xlu0 %v3314_v13 }
0x1153   :  { %3324 = vmax.xlane.f32.xlu1 %v3323_v6 }
0x1154   :  { %3321 = vmax.xlane.f32.xlu0 %v3320_v58 }
0x1157   :  { %3330 = vmax.xlane.f32.xlu1 %v3329_v0 }
0x1158   :  { %3327 = vmax.xlane.f32.xlu0 %v3326_v5 }
0x115b   :  { %3336 = vmax.xlane.f32.xlu1 %v3335_v62 }
0x115c   :  { %3333 = vmax.xlane.f32.xlu0 %v3332_v56 }
0x116c   :  { %6243 = vrot.lane.b32.xlu1 %v8119_v20, %s6943_s6 }
0x116d   :  { %v3271_v29 = vpop.xlane.xlu1 %3270 }
0x116e   :  { %v3268_v52 = vpop.xlane.xlu0 %3267  ;;  %v3339_v63 = vsub.f32 %v8280_v53, %v3271_v29 }
0x116f   :  { %v3338_v3 = vsub.f32 %v8285_v39, %v3268_v52 }
0x1170   :  { %6248 = vrot.lane.b32.xlu1 %v8126_v46, %s6943_s6  ;;  %v3364_v37 = vmul.f32 1.442695, %v3339_v63 }
0x1171   :  { %v3277_v35 = vpop.xlane.xlu1 %3276  ;;  %v3362_v45 = vmul.f32 1.442695, %v3338_v3 }
0x1172   :  { %6238 = vrot.lane.b32.xlu0 %v8071_v21, %s6943_s6  ;;  %v3274_v22 = vpop.xlane.xlu0 %3273  ;;  %v3341_v20 = vsub.f32 %v8294_v55, %v3277_v35 }
0x1173   :  { %v3340_v48 = vsub.f32 %v8299_v10, %v3274_v22  ;;  %6474 = vpow2.f32 %v3362_v45 }
0x1174   :  { %6476 = vpow2.f32 %v3364_v37  ;;  %v3368_v34 = vmul.f32 1.442695, %v3341_v20 }
0x1175   :  { %v3366_v46 = vmul.f32 1.442695, %v3340_v48  ;;  %v3283_v25 = vpop.xlane.xlu1 %3282 }
0x1176   :  { %v3280_v4 = vpop.xlane.xlu0 %3279  ;;  %v3343_v11 = vsub.f32 %v8308_v23, %v3283_v25 }
0x1177   :  { %v3342_v21 = vsub.f32 %v8313_v27, %v3280_v4  ;;  %6478 = vpow2.f32 %v3366_v46 }
0x1178   :  { %6480 = vpow2.f32 %v3368_v34  ;;  %v3372_v53 = vmul.f32 1.442695, %v3343_v11 }
0x1179   :  { %v3370_v39 = vmul.f32 1.442695, %v3342_v21 }
0x117b   :  { %6482 = vpow2.f32 %v3370_v39 }
0x117c   :  { %6484 = vpow2.f32 %v3372_v53 }
0x117d   :  { %v8421_v28 = vpop.eup %6474 }
0x117e   :  { %v8423_v10 = vpop.eup %6476  ;;  %v3410_v55 = vsel %vm1113_vm6, %v8421_v28, 0.0 }
0x117f   :  { %v3413_v27 = vsel %vm1113_vm6, %v8423_v10, 0.0 }
0x1181   :  { %v8427_v42 = vpop.eup %6478 }
0x1182   :  { %v8431_v23 = vpop.eup %6480  ;;  %v3416_v54 = vsel %vm1113_vm6, %v8427_v42, 0.0 }
0x1183   :  { %v3419_v15 = vsel %vm1113_vm6, %v8431_v23, 0.0 }
0x1185   :  { %v8435_v33 = vpop.eup %6482 }
0x1186   :  { %v8439_v13 = vpop.eup %6484  ;;  %v3422_v6 = vsel %vm1113_vm6, %v8435_v33, 0.0 }
0x1187   :  { %v3425_v58 = vsel %vm1113_vm6, %v8439_v13, 0.0 }
0x1191   :  { %3411 = vadd.xlane.f32.xlu0 %v3410_v55 }
0x1194   :  { %3414 = vadd.xlane.f32.xlu1 %v3413_v27 }
0x1195   :  { %3417 = vadd.xlane.f32.xlu0 %v3416_v54 }
0x1198   :  { %3420 = vadd.xlane.f32.xlu1 %v3419_v15 }
0x1199   :  { %3423 = vadd.xlane.f32.xlu0 %v3422_v6 }
0x119c   :  { %3426 = vadd.xlane.f32.xlu1 %v3425_v58 }
0x11ba   :  { %v3289_v0 = vpop.xlane.xlu0 %3288 }
0x11bb   :  { %v3345_v5 = vsub.f32 %v8320_v16, %v3289_v0 }
0x11bd   :  { %v3376_v62 = vmul.f32 1.442695, %v3345_v5 }
0x11be   :  { %v3286_v56 = vpop.xlane.xlu0 %3285 }
0x11bf   :  { %6486 = vpow2.f32 %v3376_v62  ;;  %v3344_v52 = vsub.f32 %v8323_v40, %v3286_v56 }
0x11c1   :  { %v3374_v29 = vmul.f32 1.442695, %v3344_v52 }
0x11c3   :  { %6488 = vpow2.f32 %v3374_v29 }
0x11c9   :  { %v8447_v22 = vpop.eup %6486 }
0x11ca   :  { %v3431_v3 = vsel %vm1113_vm6, %v8447_v22, 0.0 }
0x11cb   :  { %3432 = vadd.xlane.f32.xlu1 %v3431_v3 }
0x11cc   :  { %v3307_v35 = vpop.xlane.xlu1 %3306 }
0x11cd   :  { %v8451_v63 = vpop.eup %6488  ;;  %v3351_v45 = vsub.f32 %v8330_v30, %v3307_v35  ;;  %v3304_v48 = vpop.xlane.xlu0 %3303 }
0x11ce   :  { %v3350_v16 = vsub.f32 %v8333_v19, %v3304_v48  ;;  %v3428_v4 = vsel %vm1113_vm6, %v8451_v63, 0.0 }
0x11cf   :  { %v3388_v40 = vmul.f32 1.442695, %v3351_v45  ;;  %3429 = vadd.xlane.f32.xlu0 %v3428_v4 }
0x11d0   :  { %v3386_v37 = vmul.f32 1.442695, %v3350_v16  ;;  %v3295_v20 = vpop.xlane.xlu1 %3294 }
0x11d1   :  { %6490 = vpow2.f32 %v3388_v40  ;;  %v3347_v46 = vsub.f32 %v8336_v2, %v3295_v20  ;;  %v3292_v25 = vpop.xlane.xlu0 %3291 }
0x11d2   :  { %6492 = vpow2.f32 %v3386_v37  ;;  %v3346_v21 = vsub.f32 %v8341_v17, %v3292_v25 }
0x11d3   :  { %v3380_v34 = vmul.f32 1.442695, %v3347_v46 }
0x11d4   :  { %v3378_v11 = vmul.f32 1.442695, %v3346_v21  ;;  %v3313_v30 = vpop.xlane.xlu1 %3312 }
0x11d5   :  { %6494 = vpow2.f32 %v3380_v34  ;;  %v3353_v19 = vsub.f32 %v8346_v38, %v3313_v30  ;;  %v3310_v39 = vpop.xlane.xlu0 %3309 }
0x11d6   :  { %6496 = vpow2.f32 %v3378_v11  ;;  %v3352_v53 = vsub.f32 %v8351_v32, %v3310_v39 }
0x11d7   :  { %v3392_v55 = vmul.f32 1.442695, %v3353_v19 }
0x11d8   :  { %v3390_v27 = vmul.f32 1.442695, %v3352_v53  ;;  %v3301_v54 = vpop.xlane.xlu1 %3300 }
0x11d9   :  { %6498 = vpow2.f32 %v3392_v55  ;;  %v3349_v2 = vsub.f32 %v8356_v51, %v3301_v54  ;;  %v3298_v15 = vpop.xlane.xlu0 %3297 }
0x11da   :  { %6500 = vpow2.f32 %v3390_v27  ;;  %v3348_v58 = vsub.f32 %v8361_v1, %v3298_v15 }
0x11db   :  { %v8462_v6 = vpop.eup %6490  ;;  %v3384_v17 = vmul.f32 1.442695, %v3349_v2 }
0x11dc   :  { %v8465_v0 = vpop.eup %6492  ;;  %v3319_v38 = vpop.xlane.xlu1 %3318  ;;  %v3449_v5 = vsel %vm1113_vm6, %v8462_v6, 0.0  ;;  %v3382_v52 = vmul.f32 1.442695, %v3348_v58 }
0x11dd   :  { %6502 = vpow2.f32 %v3384_v17  ;;  %v3355_v32 = vsub.f32 %v8366_v26, %v3319_v38  ;;  %3450 = vadd.xlane.f32.xlu1 %v3449_v5  ;;  %v3316_v62 = vpop.xlane.xlu0 %3315  ;;  %v3446_v51 = vsel %vm1113_vm6, %v8465_v0, 0.0 }
0x11de   :  { %3447 = vadd.xlane.f32.xlu0 %v3446_v51  ;;  %v3354_v1 = vsub.f32 %v8371_v7, %v3316_v62 }
0x11df   :  { %v8472_v56 = vpop.eup %6494  ;;  %v3396_v29 = vmul.f32 1.442695, %v3355_v32 }
0x11e0   :  { %v8475_v3 = vpop.eup %6496  ;;  %v3325_v35 = vpop.xlane.xlu1 %3324  ;;  %v3437_v45 = vsel %vm1113_vm6, %v8472_v56, 0.0  ;;  %v3394_v4 = vmul.f32 1.442695, %v3354_v1 }
0x11e1   :  { %6504 = vpow2.f32 %v3396_v29  ;;  %3438 = vadd.xlane.f32.xlu1 %v3437_v45  ;;  %v3322_v26 = vpop.xlane.xlu0 %3321  ;;  %v3434_v48 = vsel %vm1113_vm6, %v8475_v3, 0.0  ;;  %v3357_v40 = vsub.f32 %v8376_v44, %v3325_v35 }
0x11e2   :  { %3435 = vadd.xlane.f32.xlu0 %v3434_v48  ;;  %6506 = vpow2.f32 %v3382_v52  ;;  %v3356_v11 = vsub.f32 %v8381_v12, %v3322_v26 }
0x11e3   :  { %v8481_v16 = vpop.eup %6498  ;;  %6508 = vpow2.f32 %v3394_v4  ;;  %v3400_v34 = vmul.f32 1.442695, %v3357_v40 }
0x11e4   :  { %v8484_v7 = vpop.eup %6500  ;;  %v3331_v37 = vpop.xlane.xlu1 %3330  ;;  %v3455_v20 = vsel %vm1113_vm6, %v8481_v16, 0.0  ;;  %v3398_v53 = vmul.f32 1.442695, %v3356_v11 }
0x11e5   :  { %3456 = vadd.xlane.f32.xlu1 %v3455_v20  ;;  %v3328_v46 = vpop.xlane.xlu0 %3327  ;;  %v3452_v25 = vsel %vm1113_vm6, %v8484_v7, 0.0  ;;  %6510 = vpow2.f32 %v3400_v34  ;;  %v3359_v55 = vsub.f32 %v8386_v60, %v3331_v37 }
0x11e6   :  { %3453 = vadd.xlane.f32.xlu0 %v3452_v25  ;;  %6512 = vpow2.f32 %v3398_v53  ;;  %v3358_v32 = vsub.f32 %v8391_v47, %v3328_v46 }
0x11e7   :  { %v8490_v21 = vpop.eup %6502  ;;  %v3404_v5 = vmul.f32 1.442695, %v3359_v55 }
0x11e8   :  { %v3337_v30 = vpop.xlane.xlu1 %3336  ;;  %v3443_v44 = vsel %vm1113_vm6, %v8490_v21, 0.0  ;;  %v3402_v45 = vmul.f32 1.442695, %v3358_v32 }
0x11e9   :  { %3444 = vadd.xlane.f32.xlu1 %v3443_v44  ;;  %v3334_v19 = vpop.xlane.xlu0 %3333  ;;  %6514 = vpow2.f32 %v3404_v5  ;;  %v3361_v26 = vsub.f32 %v8396_v14, %v3337_v30 }
0x11ea   :  { %6516 = vpow2.f32 %v3402_v45 }
0x11eb   :  { %v8495_v39 = vpop.eup %6504  ;;  %v3408_v40 = vmul.f32 1.442695, %v3361_v26 }
0x11ec   :  { %v6244_v27 = vpop.permute.xlu1 %6243  ;;  %v3461_v54 = vsel %vm1113_vm6, %v8495_v39, 0.0  ;;  %v8500_v2 = vpop.eup %6506 }
0x11ed   :  { %v6246_v15 = vunpack.i.h.bf16 %v6244_v27  ;;  %v6245_v12 = vunpack.i.l.bf16 %v6244_v27  ;;  %3462 = vadd.xlane.f32.xlu0 %v3461_v54  ;;  %v6239_v17 = vpop.permute.xlu0 %6238  ;;  %v3440_v60 = vsel %vm1113_vm6, %v8500_v2, 0.0  ;;  %v8505_v29 = vpop.eup %6508  ;;  %6518 = vpow2.f32 %v3408_v40 }
0x11ee   :  { %v6241_v58 = vunpack.i.h.bf16 %v6239_v17  ;;  %v6240_v38 = vunpack.i.l.bf16 %v6239_v17  ;;  %v3458_v47 = vsel %vm1113_vm6, %v8505_v29, 0.0 }
0x11ef   :  { %v5949_v62 = vpack.c.bf16 %v6246_v15, %v6245_v12  ;;  %v8510_v4 = vpop.eup %6510 }
0x11f0   :  { %v5937_v51 = vpack.c.bf16 %v6241_v58, %v6240_v38  ;;  %v6249_v52 = vpop.permute.xlu1 %6248  ;;  %v3467_v37 = vsel %vm1113_vm6, %v8510_v4, 0.0  ;;  %v8514_v20 = vpop.eup %6512 }
0x11f1   :  { %v6251_v1 = vunpack.i.h.bf16 %v6249_v52  ;;  %v6250_v35 = vunpack.i.l.bf16 %v6249_v52  ;;  %5950 = vmatprep.subr.bf16.mxu1 %v5949_v62  ;;  %3441 = vadd.xlane.f32.xlu0 %v3440_v60  ;;  %v3464_v14 = vsel %vm1113_vm6, %v8514_v20, 0.0 }
0x11f2   :  { %5938 = vmatprep.subr.bf16.mxu0 %v5937_v51  ;;  %5952 = vmatpush3.bf16.msra.mxu1 %v5949_v62 }
0x11f3   :  { %v5953_v48 = vpack.c.bf16 %v6251_v1, %v6250_v35  ;;  %5940 = vmatpush3.bf16.msra.mxu0 %v5937_v51  ;;  %v8520_v46 = vpop.eup %6514 }
0x11f4   :  { %v3473_v25 = vsel %vm1113_vm6, %v8520_v46, 0.0  ;;  %v8526_v34 = vpop.eup %6516 }
0x11f5   :  { %3459 = vadd.xlane.f32.xlu0 %v3458_v47  ;;  %5954 = vmatprep.subr.bf16.mxu0 %v5953_v48 }
0x11f7   :  { %v8532_v11 = vpop.eup %6518 }
0x11f8   :  { %v3479_v30 = vsel %vm1113_vm6, %v8532_v11, 0.0 }
0x11f9   :  { %3468 = vadd.xlane.f32.xlu0 %v3467_v37 }
0x11fa   :  { %6258 = vrot.lane.b32.xlu1 %v8146_v24, %s6943_s6  ;;  %v3470_v24 = vsel %vm1113_vm6, %v8526_v34, 0.0 }
0x11fd   :  { %3465 = vadd.xlane.f32.xlu0 %v3464_v14 }
0x11fe   :  { %6263 = vrot.lane.b32.xlu1 %v8156_v59, %s6943_s6  ;;  %v3360_v59 = vsub.f32 %v8401_v50, %v3334_v19 }
0x1200   :  { %v3406_v44 = vmul.f32 1.442695, %v3360_v59 }
0x1201   :  { %3474 = vadd.xlane.f32.xlu0 %v3473_v25 }
0x1202   :  { %6268 = vrot.lane.b32.xlu1 %v8166_v43, %s6943_s6  ;;  %6520 = vpow2.f32 %v3406_v44 }
0x1205   :  { %3471 = vadd.xlane.f32.xlu0 %v3470_v24 }
0x1209   :  { %3480 = vadd.xlane.f32.xlu0 %v3479_v30 }
0x120c   :  { %v8539_v55 = vpop.eup %6520 }
0x120d   :  { %v3476_v15 = vsel %vm1113_vm6, %v8539_v55, 0.0 }
0x121e   :  { %v3412_v53 = vpop.xlane.xlu0 %3411 }
0x121f   :  { %6522 = vrcp.f32 %v3412_v53  ;;  %6253 = vrot.lane.b32.xlu0 %v8136_v18, %s6943_s6 }
0x1221   :  { %v3415_v43 = vpop.xlane.xlu1 %3414 }
0x1222   :  { %6524 = vrcp.f32 %v3415_v43  ;;  %v3418_v27 = vpop.xlane.xlu0 %3417 }
0x1223   :  { %6526 = vrcp.f32 %v3418_v27 }
0x1225   :  { %v3421_v54 = vpop.xlane.xlu1 %3420 }
0x1226   :  { %6528 = vrcp.f32 %v3421_v54  ;;  %3477 = vadd.xlane.f32.xlu1 %v3476_v15  ;;  %v3424_v50 = vpop.xlane.xlu0 %3423 }
0x1227   :  { %6530 = vrcp.f32 %v3424_v50 }
0x1229   :  { %v6523_v19 = vpop.eup %6522  ;;  %v3427_v12 = vpop.xlane.xlu1 %3426 }
0x122a   :  { %6532 = vrcp.f32 %v3427_v12  ;;  %v3506_v17 = vmul.f32 %v6523_v19, %v8421_v28 }
0x122c   :  { %v6525_v18 = vpop.eup %6524  ;;  %5609 = vmatprep.mubr.msk.f32.mxu0 %vm1113_vm6, %v3506_v17 }
0x122d   :  { %v6527_v58 = vpop.eup %6526  ;;  %v3507_v38 = vmul.f32 %v6525_v18, %v8423_v10 }
0x122e   :  { %v3508_v5 = vmul.f32 %v6527_v58, %v8427_v42 }
0x122f   :  { %5610 = vmatmul.mubr.msk.f32.vlgmr.msra.gmra.mrb[60].mxu0 %vm1113_vm6, %v3507_v38 }
0x1230   :  { %v6529_v32 = vpop.eup %6528  ;;  %5956 = vmatpush3.bf16.msra.mxu0 %v5953_v48  ;;  %5612 = vmatprep.mubr.msk.f32.mxu0 %vm1113_vm6, %v3508_v5 }
0x1231   :  { %v6531_v62 = vpop.eup %6530  ;;  %v3509_v51 = vmul.f32 %v6529_v32, %v8431_v23 }
0x1232   :  { %v3510_v52 = vmul.f32 %v6531_v62, %v8435_v33 }
0x1233   :  { %5613 = vmatmul.mubr.msk.f32.gmra.mrb[62].mxu0 %vm1113_vm6, %v3509_v51 }
0x1234   :  { %v6533_v28 = vpop.eup %6532  ;;  %5615 = vmatprep.mubr.msk.f32.mxu0 %vm1113_vm6, %v3510_v52 }
0x1235   :  { %v3511_v10 = vmul.f32 %v6533_v28, %v8439_v13 }
0x1237   :  { %6273 = vrot.lane.b32.xlu1 %v8176_v36, %s6943_s6  ;;  %5616 = vmatmul.mubr.msk.f32.gmra.mrb[64].mxu0 %vm1113_vm6, %v3511_v10 }
0x1258   :  { %v3433_v42 = vpop.xlane.xlu1 %3432 }
0x1259   :  { %6534 = vrcp.f32 %v3433_v42 }
0x125c   :  { %v3430_v60 = vpop.xlane.xlu0 %3429 }
0x125d   :  { %6536 = vrcp.f32 %v3430_v60 }
0x1263   :  { %v6535_v1 = vpop.eup %6534 }
0x1264   :  { %v3513_v35 = vmul.f32 %v6535_v1, %v8447_v22 }
0x1267   :  { %v6537_v23 = vpop.eup %6536 }
0x1268   :  { %v3512_v33 = vmul.f32 %v6537_v23, %v8451_v63 }
0x126a   :  { %v3451_v45 = vpop.xlane.xlu1 %3450  ;;  %5630 = vmatprep.mubr.msk.f32.mxu1 %vm1113_vm6, %v3512_v33 }
0x126b   :  { %5631 = vmatmul.mubr.msk.f32.vlgmr.msra.gmra.mrb[76].mxu1 %vm1113_vm6, %v3513_v35  ;;  %v3448_v13 = vpop.xlane.xlu0 %3447 }
0x126c   :  { %6538 = vrcp.f32 %v3448_v13 }
0x126e   :  { %v3439_v36 = vpop.xlane.xlu1 %3438 }
0x126f   :  { %6540 = vrcp.f32 %v3439_v36  ;;  %v3436_v26 = vpop.xlane.xlu0 %3435 }
0x1270   :  { %6542 = vrcp.f32 %v3436_v26 }
0x1271   :  { %6544 = vrcp.f32 %v3451_v45 }
0x1272   :  { %v3457_v48 = vpop.xlane.xlu1 %3456 }
0x1273   :  { %v3454_v40 = vpop.xlane.xlu0 %3453 }
0x1274   :  { %6546 = vrcp.f32 %v3454_v40 }
0x1276   :  { %v6539_v47 = vpop.eup %6538  ;;  %v3445_v37 = vpop.xlane.xlu1 %3444 }
0x1277   :  { %v3518_v14 = vmul.f32 %v6539_v47, %v8465_v0  ;;  %6548 = vrcp.f32 %v3445_v37 }
0x1279   :  { %v6541_v63 = vpop.eup %6540  ;;  %5651 = vmatprep.mubr.msk.f32.mxu0 %vm1113_vm6, %v3518_v14 }
0x127a   :  { %v6543_v22 = vpop.eup %6542  ;;  %v6259_v25 = vpop.permute.xlu1 %6258  ;;  %v3515_v53 = vmul.f32 %v6541_v63, %v8472_v56 }
0x127b   :  { %v3463_v24 = vpop.xlane.xlu0 %3462  ;;  %v6261_v30 = vunpack.i.h.bf16 %v6259_v25  ;;  %v6260_v59 = vunpack.i.l.bf16 %v6259_v25  ;;  %v3514_v44 = vmul.f32 %v6543_v22, %v8475_v3  ;;  %v6545_v19 = vpop.eup %6544 }
0x127c   :  { %v3519_v38 = vmul.f32 %v6545_v19, %v8462_v6 }
0x127d   :  { %v5957_v43 = vpack.c.bf16 %v6261_v30, %v6260_v59  ;;  %5633 = vmatprep.mubr.msk.f32.mxu1 %vm1113_vm6, %v3514_v44 }
0x127e   :  { %v6264_v27 = vpop.permute.xlu1 %6263  ;;  %5634 = vmatmul.mubr.msk.f32.gmra.mrb[78].mxu1 %vm1113_vm6, %v3515_v53  ;;  %v6547_v17 = vpop.eup %6546 }
0x127f   :  { %v3442_v0 = vpop.xlane.xlu0 %3441  ;;  %5958 = vmatprep.subr.bf16.mxu0 %v5957_v43  ;;  %v3520_v51 = vmul.f32 %v6547_v17, %v8484_v7  ;;  %v6265_v33 = vunpack.i.l.bf16 %v6264_v27 }
0x1280   :  { %6550 = vrcp.f32 %v3442_v0  ;;  %5960 = vmatpush3.bf16.msra.mxu0 %v5957_v43 }
0x1281   :  { %6552 = vrcp.f32 %v3457_v48  ;;  %v6549_v18 = vpop.eup %6548 }
0x1282   :  { %v6269_v54 = vpop.permute.xlu1 %6268  ;;  %v3517_v52 = vmul.f32 %v6549_v18, %v8490_v21 }
0x1283   :  { %v3460_v15 = vpop.xlane.xlu0 %3459  ;;  %v6271_v50 = vunpack.i.h.bf16 %v6269_v54  ;;  %v6270_v3 = vunpack.i.l.bf16 %v6269_v54 }
0x1284   :  { %6554 = vrcp.f32 %v3460_v15 }
0x1285   :  { %6556 = vrcp.f32 %v3463_v24  ;;  %v5961_v56 = vpack.c.bf16 %v6271_v50, %v6270_v3 }
0x1287   :  { %v3469_v12 = vpop.xlane.xlu0 %3468  ;;  %5962 = vmatprep.subr.bf16.mxu0 %v5961_v56 }
0x1288   :  { %5964 = vmatpush3.bf16.msra.mxu0 %v5961_v56 }
0x1289   :  { %5681 = vmatprep.subr.bf16.mxu0 %v6953_v8 }
0x128a   :  { %v6551_v58 = vpop.eup %6550 }
0x128b   :  { %v6553_v5 = vpop.eup %6552  ;;  %v3466_v32 = vpop.xlane.xlu0 %3465  ;;  %v3516_v62 = vmul.f32 %v6551_v58, %v8500_v2  ;;  %5652 = vmatmul.mubr.msk.f32.vlgmr.msra.gmra.mrb[66].mxu0 %vm1113_vm6, %v3519_v38 }
0x128c   :  { %6558 = vrcp.f32 %v3466_v32  ;;  %5654 = vmatprep.mubr.msk.f32.mxu0 %vm1113_vm6, %v3520_v51  ;;  %v3521_v6 = vmul.f32 %v6553_v5, %v8481_v16 }
0x128d   :  { %5636 = vmatprep.mubr.msk.f32.mxu1 %vm1113_vm6, %v3516_v62  ;;  %6560 = vrcp.f32 %v3469_v12 }
0x128e   :  { %v6555_v28 = vpop.eup %6554  ;;  %5637 = vmatmul.mubr.msk.f32.gmra.mrb[80].mxu1 %vm1113_vm6, %v3517_v52 }
0x128f   :  { %v6557_v10 = vpop.eup %6556  ;;  %v3475_v42 = vpop.xlane.xlu0 %3474  ;;  %v3522_v2 = vmul.f32 %v6555_v28, %v8505_v29  ;;  %5655 = vmatmul.mubr.msk.f32.gmra.mrb[68].mxu0 %vm1113_vm6, %v3521_v6  ;;  %v6266_v29 = vunpack.i.h.bf16 %v6264_v27 }
0x1290   :  { %v3523_v7 = vmul.f32 %v6557_v10, %v8495_v39 }
0x1291   :  { %5657 = vmatprep.mubr.msk.f32.mxu0 %vm1113_vm6, %v3522_v2  ;;  %v5969_v36 = vpack.c.bf16 %v6266_v29, %v6265_v33  ;;  %v6322_v29 = vld [vmem:[#allocation15 + $0x10] sm:$0xff]  }
0x1292   :  { %5682 = vmatpush3.bf16.msra.mxu0 %v6322_v29 }
0x1293   :  { %v3472_v21 = vpop.xlane.xlu0 %3471  ;;  %5658 = vmatmul.mubr.msk.f32.gmra.mrb[70].mxu0 %vm1113_vm6, %v3523_v7  ;;  %5683 = vmatprep.subr.bf16.mxu0 %v6953_v8 }
0x1294   :  { %5685 = vmatprep.mubr.msk.bf16.mxu0 %vm6954_vm3, %v6953_v8  ;;  %6562 = vrcp.f32 %v3472_v21 }
0x1295   :  { %6564 = vrcp.f32 %v3475_v42 }
0x1296   :  { %v6559_v60 = vpop.eup %6558 }
0x1297   :  { %v3481_v1 = vpop.xlane.xlu0 %3480  ;;  %v3524_v16 = vmul.f32 %v6559_v60, %v8514_v20  ;;  %v6561_v40 = vpop.eup %6560 }
0x1298   :  { %v3525_v14 = vmul.f32 %v6561_v40, %v8510_v4 }
0x1299   :  { %5672 = vmatprep.mubr.msk.f32.mxu1 %vm1113_vm6, %v3524_v16 }
0x129b   :  { %v6254_v23 = vpop.permute.xlu0 %6253 }
0x129c   :  { %v6256_v35 = vunpack.i.h.bf16 %v6254_v23  ;;  %v6255_v45 = vunpack.i.l.bf16 %v6254_v23 }
0x129e   :  { %v5965_v13 = vpack.c.bf16 %v6256_v35, %v6255_v45  ;;  %v6563_v37 = vpop.eup %6562 }
0x129f   :  { %v6565_v63 = vpop.eup %6564  ;;  %v3526_v22 = vmul.f32 %v6563_v37, %v8526_v34 }
0x12a0   :  { %5966 = vmatprep.subr.bf16.mxu1 %v5965_v13  ;;  %v3527_v24 = vmul.f32 %v6565_v63, %v8520_v46 }
0x12a1   :  { %5968 = vmatpush3.bf16.msra.mxu1 %v5965_v13  ;;  %v6323_v13 = vld [vmem:[#allocation15 + $0x18] sm:$0xff]  }
0x12a2   :  { %5970 = vmatprep.subr.bf16.mxu1 %v5969_v36  ;;  %5684 = vmatpush3.bf16.msra.mxu0 %v6323_v13 }
0x12a3   :  { %5713 = vmatprep.subr.bf16.mxu0 %v6953_v8 }
0x12a5   :  { %5972 = vmatpush3.bf16.msra.mxu1 %v5969_v36 }
0x12b3   :  { %v3478_v39 = vpop.xlane.xlu1 %3477 }
0x12b4   :  { %6566 = vrcp.f32 %v3478_v39 }
0x12b5   :  { %6568 = vrcp.f32 %v3481_v1 }
0x12b7   :  { %v6274_v26 = vpop.permute.xlu1 %6273 }
0x12b8   :  { %v6276_v20 = vunpack.i.h.bf16 %v6274_v26  ;;  %v6275_v48 = vunpack.i.l.bf16 %v6274_v26 }
0x12ba   :  { %v5973_v47 = vpack.c.bf16 %v6276_v20, %v6275_v48 }
0x12bc   :  { %5974 = vmatprep.subr.bf16.mxu1 %v5973_v47 }
0x12bd   :  { %5976 = vmatpush3.bf16.msra.mxu1 %v5973_v47 }
0x12be   :  { %5697 = vmatprep.subr.bf16.mxu1 %v6953_v8  ;;  %v6567_v25 = vpop.eup %6566 }
0x12bf   :  { %v6569_v30 = vpop.eup %6568  ;;  %v3528_v59 = vmul.f32 %v6567_v25, %v8539_v55 }
0x12c0   :  { %5673 = vmatmul.mubr.msk.f32.vlgmr.msra.gmra.mrb[82].mxu1 %vm1113_vm6, %v3525_v14  ;;  %v3529_v4 = vmul.f32 %v6569_v30, %v8532_v11 }
0x12c1   :  { %5675 = vmatprep.mubr.msk.f32.mxu1 %vm1113_vm6, %v3526_v22 }
0x12c4   :  { %5676 = vmatmul.mubr.msk.f32.gmra.mrb[84].mxu1 %vm1113_vm6, %v3527_v24  ;;  %v4988_v24 = vld [vmem:[#allocation17 + $0x1] ss:$0 sm:$0xff] }
0x12c5   :  { %5678 = vmatprep.mubr.msk.f32.mxu1 %vm1113_vm6, %v3528_v59 }
0x12c8   :  { %5679 = vmatmul.mubr.msk.f32.gmra.mrb[86].mxu1 %vm1113_vm6, %v3529_v4 }
0x12c9   :  { %5701 = vmatprep.mubr.msk.bf16.mxu1 %vm6954_vm3, %v6953_v8 }
0x1302   :  { %v5611_v34 = vpop.f32.mrb[60].mxu0 }
0x1303   :  { %v3632_v44 = vpop.f32.mrb[61].mxu0 }
0x1306   :  { %v5614_v53 = vpop.f32.mrb[62].mxu0 }
0x1307   :  { %v3642_v43 = vpop.f32.mrb[63].mxu0 }
0x130a   :  { %v5617_v27 = vpop.f32.mrb[64].mxu0 }
0x130b   :  { %v3652_v46 = vpop.f32.mrb[65].mxu0 }
0x133e   :  { %v5632_v0 = vpop.f32.mrb[76].mxu1 }
0x133f   :  { %v6279_v54 = vpack.i.bf16 %v5632_v0, %v5611_v34  ;;  %v3763_v55 = vpop.f32.mrb[77].mxu1 }
0x1340   :  { %v6277_v15 = vpack.i.bf16 %v3763_v55, %v3632_v44 }
0x1342   :  { %6278 = vxpose.xlu1.b32.start [1/6] (short) (narrow) %v6277_v15, 8 }
0x1346   :  { %6280 = vxpose.xlu1.b32.cont [2/6] (short) (narrow) %v6279_v54, 8 }
0x1351   :  { %v5635_v50 = vpop.f32.mrb[78].mxu1 }
0x1352   :  { %v6283_v3 = vpack.i.bf16 %v5635_v50, %v5614_v53  ;;  %v3773_v11 = vpop.f32.mrb[79].mxu1 }
0x1353   :  { %v6281_v56 = vpack.i.bf16 %v3773_v11, %v3642_v43 }
0x1355   :  { %6282 = vxpose.xlu1.b32.cont [3/6] (short) (narrow) %v6281_v56, 8 }
0x1359   :  { %6284 = vxpose.xlu1.b32.cont [4/6] (short) (narrow) %v6283_v3, 8 }
0x135e   :  { %v5653_v19 = vpop.f32.mrb[66].mxu0 }
0x135f   :  { %v3894_v12 = vpop.f32.mrb[67].mxu0 }
0x1361   :  { %v5638_v17 = vpop.f32.mrb[80].mxu1 }
0x1362   :  { %v6287_v18 = vpack.i.bf16 %v5638_v17, %v5617_v27  ;;  %v3783_v58 = vpop.f32.mrb[81].mxu1  ;;  %v5656_v5 = vpop.f32.mrb[68].mxu0 }
0x1363   :  { %v6285_v38 = vpack.i.bf16 %v3783_v58, %v3652_v46  ;;  %v3904_v32 = vpop.f32.mrb[69].mxu0 }
0x1365   :  { %6286 = vxpose.xlu1.b32.cont [5/6] (short) (narrow) %v6285_v38, 8 }
0x1366   :  { %v5659_v62 = vpop.f32.mrb[70].mxu0 }
0x1367   :  { %v3914_v51 = vpop.f32.mrb[71].mxu0 }
0x1369   :  { %6288 = vxpose.xlu1.b32.end [6/6] (short) (narrow) %v6287_v18, 8 }
0x1393   :  { %v5674_v52 = vpop.f32.mrb[82].mxu1 }
0x1394   :  { %v6296_v28 = vpack.i.bf16 %v5674_v52, %v5653_v19  ;;  %v4025_v6 = vpop.f32.mrb[83].mxu1 }
0x1395   :  { %v6294_v10 = vpack.i.bf16 %v4025_v6, %v3894_v12 }
0x1397   :  { %v5677_v42 = vpop.f32.mrb[84].mxu1  ;;  %6295 = vxpose.xlu0.b32.start [1/6] (short) (narrow) %v6294_v10, 8 }
0x1398   :  { %v6300_v2 = vpack.i.bf16 %v5677_v42, %v5656_v5  ;;  %v4035_v7 = vpop.f32.mrb[85].mxu1 }
0x1399   :  { %v6298_v21 = vpack.i.bf16 %v4035_v7, %v3904_v32 }
0x139b   :  { %v5680_v60 = vpop.f32.mrb[86].mxu1  ;;  %6297 = vxpose.xlu0.b32.cont [2/6] (short) (narrow) %v6296_v28, 8 }
0x139c   :  { %v6304_v1 = vpack.i.bf16 %v5680_v60, %v5659_v62  ;;  %v4045_v16 = vpop.f32.mrb[87].mxu1 }
0x139d   :  { %v6302_v23 = vpack.i.bf16 %v4045_v16, %v3914_v51 }
0x139f   :  { %6299 = vxpose.xlu0.b32.cont [3/6] (short) (narrow) %v6298_v21, 8 }
0x13a3   :  { %6301 = vxpose.xlu0.b32.cont [4/6] (short) (narrow) %v6300_v2, 8 }
0x13a7   :  { %6303 = vxpose.xlu0.b32.cont [5/6] (short) (narrow) %v6302_v23, 8 }
0x13ab   :  { %6305 = vxpose.xlu0.b32.end [6/6] (short) (narrow) %v6304_v1, 8 }
0x13d5   :  { %v6289_v33 = vpop.trf.xlu1 }
0x13d6   :  { %v6290_v35 = vunpack.i.l.bf16 %v6289_v33  ;;  %v6293_v45 = vunpack.i.h.bf16 %v6289_v33 }
0x13d8   :  { %4182 = vxpose.xlu0.b32.start [1/4] (short) (narrow) %v6290_v35, 48 }
0x13dc   :  { %4183 = vxpose.xlu0.b32.cont [2/4] (short) (narrow) %v6293_v45, 48 }
0x1417   :  { %v6306_v36 = vpop.trf.xlu0 }
0x1418   :  { %v6307_v39 = vunpack.i.l.bf16 %v6306_v36  ;;  %v6310_v26 = vunpack.i.h.bf16 %v6306_v36 }
0x141a   :  { %4184 = vxpose.xlu0.b32.cont [3/4] (short) (narrow) %v6307_v39, 48 }
0x141e   :  { %4185 = vxpose.xlu0.b32.end [4/4] (short) (narrow) %v6310_v26, 48 }
0x1492   :  { %v4198_v20 = vpop.trf.xlu0 }
0x1496   :  { %v4199_v48 = vpop.trf.xlu0 }
0x1497   :  { %v4214_v47 = vpack.c.bf16 %v4199_v48, %v4198_v20 }
0x1499   :  { %5686 = vmatmul.mubr.msk.bf16.vlgmr.msra.gmra.mrb[72].mxu0 %vm337_vm2, %v4214_v47 }
0x149a   :  { %v4200_v40 = vpop.trf.xlu0  ;;  %5689 = vmatprep.mubr.msk.bf16.mxu0 %vm6954_vm3, %v6953_v8 }
0x149e   :  { %v4201_v37 = vpop.trf.xlu0 }
0x149f   :  { %v4215_v14 = vpack.c.bf16 %v4201_v37, %v4200_v40  ;;  %v8647_v37 = vld [vmem:[#allocation18 + $0x1] ss:$0 sm:$0xff] }
0x14a1   :  { %5690 = vmatmul.mubr.msk.bf16.gmra.mrb[76].mxu0 %vm337_vm2, %v4215_v14 }
0x14a2   :  { %v4202_v63 = vpop.trf.xlu0  ;;  %5693 = vmatprep.mubr.msk.bf16.mxu0 %vm6954_vm3, %v6953_v8 }
0x14a6   :  { %v4203_v22 = vpop.trf.xlu0 }
0x14a7   :  { %v4216_v25 = vpack.c.bf16 %v4203_v22, %v4202_v63 }
0x14a9   :  { %5694 = vmatmul.mubr.msk.bf16.gmra.mrb[80].mxu0 %vm337_vm2, %v4216_v25 }
0x14aa   :  { %5717 = vmatprep.mubr.msk.bf16.mxu0 %vm6954_vm3, %v6953_v8 }
0x156c   :  { %v4285_v30 = vpop.f32.mrb[72].mxu0 }
0x156d   :  { %v4286_v59 = vadd.f32 %v4988_v24, %v4285_v30  ;;  %v5687_v4 = vpop.f32.mrb[73].mxu0  ;;  %v8652_v30 = vld [vmem:[#allocation20 + $0x1] ss:$0 sm:$0xff] }
0x156e   :  { %v4288_v34 = vpop.f32.mrb[74].mxu0 }
0x156f   :  { %v8611_v44 = vadd.f32 %v4286_v59, %v7986_v9  ;;  %v4289_v53 = vadd.f32 %v4988_v24, %v4288_v34  ;;  %v5688_v43 = vpop.f32.mrb[75].mxu0 }
0x1571   :  { %v4309_v27 = vadd.f32 %v4289_v53, %v7989_v41  ;;  %v4318_v46 = vsel %vm337_vm2, %v8611_v44, 0.0 }
0x1572   :  { %4319 = vadd.xlane.f32.xlu1 %v4318_v46  ;;  %v6326_v46 = vld [vmem:[#allocation23 + $0x10] sm:$0xff]  }
0x1573   :  { %v4321_v0 = vsel %vm337_vm2, %v4309_v27, 0.0  ;;  %5714 = vmatpush3.bf16.msra.mxu0 %v6326_v46 }
0x1574   :  { %4322 = vadd.xlane.f32.xlu0 %v4321_v0  ;;  %v4293_v54 = vpop.f32.mrb[76].mxu0  ;;  %5715 = vmatprep.subr.bf16.mxu0 %v6953_v8  ;;  %v6327_v0 = vld [vmem:[#allocation23 + $0x18] sm:$0xff]  }
0x1575   :  { %v4294_v55 = vadd.f32 %v4988_v24, %v4293_v54  ;;  %v5691_v15 = vpop.f32.mrb[77].mxu0  ;;  %v8664_v54 = vld [vmem:[#allocation21 + $0x1] ss:$0 sm:$0xff] }
0x1576   :  { %v4296_v50 = vpop.f32.mrb[78].mxu0 }
0x1577   :  { %v4297_v3 = vadd.f32 %v4988_v24, %v4296_v50  ;;  %v5692_v11 = vpop.f32.mrb[79].mxu0  ;;  %v4310_v6 = vadd.f32 %v4294_v55, %v7996_v57  ;;  %5716 = vmatpush3.bf16.msra.mxu0 %v6327_v0 }
0x1579   :  { %v8622_v42 = vadd.f32 %v4297_v3, %v7999_v31  ;;  %v4324_v2 = vsel %vm337_vm2, %v4310_v6, 0.0  ;;  %v6324_v31 = vld [vmem:[%s8754_s12 + $0x10] sm:$0xff]  }
0x157a   :  { %5698 = vmatpush3.bf16.msra.mxu1 %v6324_v31  ;;  %v5007_v31 = vld [vmem:[%s8757_s15 + $0x1] ss:$0 sm:$0xff] }
0x157b   :  { %v4327_v21 = vsel %vm337_vm2, %v8622_v42, 0.0  ;;  %5699 = vmatprep.subr.bf16.mxu1 %v6953_v8 }
0x157c   :  { %v4301_v56 = vpop.f32.mrb[80].mxu0 }
0x157d   :  { %v4302_v9 = vadd.f32 %v4988_v24, %v4301_v56  ;;  %v5695_v19 = vpop.f32.mrb[81].mxu0 }
0x157e   :  { %v4304_v12 = vpop.f32.mrb[82].mxu0 }
0x157f   :  { %v4305_v17 = vadd.f32 %v4988_v24, %v4304_v12  ;;  %v5696_v18 = vpop.f32.mrb[83].mxu0  ;;  %v4312_v7 = vadd.f32 %v4302_v9, %v8006_v49  ;;  %v6325_v49 = vld [vmem:[%s8754_s12 + $0x18] sm:$0xff]  }
0x1580   :  { %5700 = vmatpush3.bf16.msra.mxu1 %v6325_v49 }
0x1581   :  { %v8629_v60 = vadd.f32 %v4305_v17, %v8009_v61  ;;  %v4330_v57 = vsel %vm337_vm2, %v4312_v7, 0.0  ;;  %5729 = vmatprep.subr.bf16.mxu1 %v6953_v8 }
0x1583   :  { %v4333_v1 = vsel %vm337_vm2, %v8629_v60, 0.0 }
0x15ff   :  { %v4320_v41 = vpop.xlane.xlu1 %4319 }
0x1600   :  { %v4336_v58 = vmul.f32 0.03125, %v4320_v41 }
0x1601   :  { %v4323_v38 = vpop.xlane.xlu0 %4322 }
0x1602   :  { %v4342_v5 = vsub.f32 %v8611_v44, %v4336_v58  ;;  %v4337_v32 = vmul.f32 0.03125, %v4323_v38 }
0x1604   :  { %v4343_v62 = vsub.f32 %v4309_v27, %v4337_v32  ;;  %v4348_v51 = vmul.f32 %v4342_v5, %v4342_v5 }
0x1606   :  { %v4354_v52 = vsel %vm337_vm2, %v4348_v51, 0.0  ;;  %v4349_v28 = vmul.f32 %v4343_v62, %v4343_v62 }
0x1607   :  { %4355 = vadd.xlane.f32.xlu1 %v4354_v52 }
0x1608   :  { %v4357_v10 = vsel %vm337_vm2, %v4349_v28, 0.0 }
0x160b   :  { %4358 = vadd.xlane.f32.xlu1 %v4357_v10 }
0x160f   :  { %4325 = vadd.xlane.f32.xlu1 %v4324_v2 }
0x1613   :  { %4328 = vadd.xlane.f32.xlu1 %v4327_v21 }
0x1617   :  { %4331 = vadd.xlane.f32.xlu1 %v4330_v57 }
0x161b   :  { %4334 = vadd.xlane.f32.xlu1 %v4333_v1 }
0x1694   :  { %v4356_v61 = vpop.xlane.xlu1 %4355 }
0x1695   :  { %v4372_v16 = vmul.f32 0.03125, %v4356_v61 }
0x1697   :  { %v4378_v23 = vadd.f32 1e-05, %v4372_v16 }
0x1698   :  { %v4359_v29 = vpop.xlane.xlu1 %4358 }
0x1699   :  { %6570 = vrsqrt.f32 %v4378_v23  ;;  %v4373_v33 = vmul.f32 0.03125, %v4359_v29 }
0x169b   :  { %v4379_v35 = vadd.f32 1e-05, %v4373_v33 }
0x169c   :  { %v4326_v45 = vpop.xlane.xlu1 %4325 }
0x169d   :  { %6572 = vrsqrt.f32 %v4379_v35  ;;  %v4338_v13 = vmul.f32 0.03125, %v4326_v45 }
0x169f   :  { %v8642_v36 = vsub.f32 %v4310_v6, %v4338_v13 }
0x16a0   :  { %v4329_v39 = vpop.xlane.xlu1 %4328 }
0x16a1   :  { %v4350_v26 = vmul.f32 %v8642_v36, %v8642_v36  ;;  %v4339_v57 = vmul.f32 0.03125, %v4329_v39 }
0x16a3   :  { %v6571_v20 = vpop.eup %6570  ;;  %v4360_v48 = vsel %vm337_vm2, %v4350_v26, 0.0  ;;  %v4345_v61 = vsub.f32 %v8622_v42, %v4339_v57 }
0x16a4   :  { %v4390_v47 = vmul.f32 %v6571_v20, %v4342_v5  ;;  %4361 = vadd.xlane.f32.xlu1 %v4360_v48  ;;  %v4332_v40 = vpop.xlane.xlu1 %4331 }
0x16a5   :  { %v4340_v14 = vmul.f32 0.03125, %v4332_v40  ;;  %v4351_v39 = vmul.f32 %v4345_v61, %v4345_v61 }
0x16a6   :  { %v4402_v25 = vmul.f32 %v8647_v37, %v4390_v47 }
0x16a7   :  { %v6573_v63 = vpop.eup %6572  ;;  %v8649_v22 = vsub.f32 %v4312_v7, %v4340_v14  ;;  %v4363_v20 = vsel %vm337_vm2, %v4351_v39, 0.0 }
0x16a8   :  { %v4391_v24 = vmul.f32 %v6573_v63, %v4343_v62  ;;  %v4414_v53 = vadd.f32 %v8652_v30, %v4402_v25  ;;  %v4335_v1 = vpop.xlane.xlu1 %4334 }
0x16a9   :  { %v4352_v59 = vmul.f32 %v8649_v22, %v8649_v22  ;;  %v4341_v16 = vmul.f32 0.03125, %v4335_v1 }
0x16aa   :  { %v4403_v4 = vmul.f32 %v8647_v37, %v4391_v24 }
0x16ab   :  { %v4366_v34 = vsel %vm337_vm2, %v4352_v59, 0.0  ;;  %v4347_v13 = vsub.f32 %v8629_v60, %v4341_v16 }
0x16ac   :  { %v4415_v43 = vadd.f32 %v8652_v30, %v4403_v4  ;;  %4367 = vadd.xlane.f32.xlu1 %v4366_v34 }
0x16ad   :  { %v4353_v48 = vmul.f32 %v4347_v13, %v4347_v13 }
0x16ae   :  { %v4420_v27 = vpack.c.bf16 %v4415_v43, %v4414_v53 }
0x16af   :  { %v4369_v47 = vsel %vm337_vm2, %v4353_v48, 0.0 }
0x16b0   :  { %5702 = vmatmul.mubr.msk.bf16.vlgmr.msra.gmra.mrb[88].mxu1 %vm337_vm2, %v4420_v27 }
0x16b1   :  { %5705 = vmatprep.mubr.msk.bf16.mxu1 %vm6954_vm3, %v6953_v8 }
0x1731   :  { %v4362_v42 = vpop.xlane.xlu1 %4361 }
0x1732   :  { %v4374_v40 = vmul.f32 0.03125, %v4362_v42 }
0x1734   :  { %v4380_v14 = vadd.f32 1e-05, %v4374_v40 }
0x1739   :  { %v4368_v63 = vpop.xlane.xlu1 %4367 }
0x173a   :  { %v4376_v24 = vmul.f32 0.03125, %v4368_v63 }
0x173c   :  { %v4382_v53 = vadd.f32 1e-05, %v4376_v24 }
0x1783   :  { %v4491_v55 = vpop.f32.mrb[88].mxu1 }
0x1784   :  { %v4492_v15 = vadd.f32 %v8664_v54, %v4491_v55  ;;  %v5703_v50 = vpop.f32.mrb[89].mxu1 }
0x1785   :  { %v4494_v3 = vpop.f32.mrb[90].mxu1 }
0x1786   :  { %v4520_v11 = vmul.f32 0.044715, %v4492_v15  ;;  %v4495_v56 = vadd.f32 %v8664_v54, %v4494_v3  ;;  %v5704_v9 = vpop.f32.mrb[91].mxu1  ;;  %v4514_v28 = vmul.f32 0.5, %v4492_v15 }
0x1788   :  { %v4526_v19 = vmul.f32 %v4520_v11, %v4492_v15  ;;  %v4521_v12 = vmul.f32 0.044715, %v4495_v56  ;;  %v4515_v6 = vmul.f32 0.5, %v4495_v56 }
0x178a   :  { %v4532_v17 = vmul.f32 %v4526_v19, %v4492_v15  ;;  %v4527_v18 = vmul.f32 %v4521_v12, %v4495_v56 }
0x178c   :  { %v4538_v41 = vadd.f32 %v4532_v17, %v4492_v15  ;;  %v4533_v58 = vmul.f32 %v4527_v18, %v4495_v56 }
0x178e   :  { %v4544_v38 = vmul.f32 0.7978846, %v4538_v41  ;;  %v4539_v5 = vadd.f32 %v4533_v58, %v4495_v56 }
0x1790   :  { %6574 = vtanh.f32 %v4544_v38  ;;  %v4545_v32 = vmul.f32 0.7978846, %v4539_v5 }
0x1792   :  { %6576 = vtanh.f32 %v4545_v32 }
0x1793   :  { %6578 = vrsqrt.f32 %v4380_v14 }
0x179a   :  { %v6575_v62 = vpop.eup %6574 }
0x179b   :  { %v4556_v51 = vadd.f32 1.0, %v6575_v62 }
0x179c   :  { %v6577_v52 = vpop.eup %6576 }
0x179d   :  { %v4557_v10 = vadd.f32 1.0, %v6577_v52  ;;  %v4562_v2 = vmul.f32 %v4556_v51, %v4514_v28  ;;  %v6579_v15 = vpop.eup %6578 }
0x179e   :  { %v4392_v50 = vmul.f32 %v6579_v15, %v8642_v36 }
0x179f   :  { %v4563_v7 = vmul.f32 %v4557_v10, %v4515_v6 }
0x17a0   :  { %v4404_v56 = vmul.f32 %v8647_v37, %v4392_v50 }
0x17a1   :  { %v4568_v21 = vpack.c.bf16 %v4563_v7, %v4562_v2 }
0x17a2   :  { %v4416_v41 = vadd.f32 %v8652_v30, %v4404_v56 }
0x17a3   :  { %5718 = vmatmul.mubr.msk.bf16.vlgmr.msra.gmra.mrb[84].mxu0 %vm337_vm2, %v4568_v21 }
0x17a4   :  { %5721 = vmatprep.mubr.msk.bf16.mxu0 %vm6954_vm3, %v6953_v8 }
0x1876   :  { %v4639_v49 = vpop.f32.mrb[84].mxu0 }
0x1877   :  { %v4640_v23 = vadd.f32 %v5007_v31, %v4639_v49  ;;  %v5719_v29 = vpop.f32.mrb[85].mxu0 }
0x1878   :  { %v4642_v33 = vpop.f32.mrb[86].mxu0 }
0x1879   :  { %v4657_v35 = vadd.f32 %v4640_v23, %v8611_v44  ;;  %v5720_v45 = vpop.f32.mrb[87].mxu0 }
0x187b   :  { %v4660_v26 = vsel %vm335_vm1, %v4657_v35, 0.0 }
0x187c   :  { %4661 = vadd.xlane.f32.xlu0 %v4660_v26 }
0x1880   :  { %4364 = vadd.xlane.f32.xlu0 %v4363_v20 }
0x1884   :  { %4370 = vadd.xlane.f32.xlu0 %v4369_v47 }
0x1909   :  { %v4662_v25 = vpop.xlane.xlu0 %4661 }
0x190a   :  { %v4663_v44 = vmul.f32 0.03125, %v4662_v25 }
0x190c   :  { %v4664_v60 = vsub.f32 %v4657_v35, %v4663_v44 }
0x190d   :  { %v4365_v59 = vpop.xlane.xlu0 %4364 }
0x190e   :  { %v4375_v4 = vmul.f32 0.03125, %v4365_v59  ;;  %v4665_v34 = vmul.f32 %v4664_v60, %v4664_v60 }
0x1910   :  { %v4381_v43 = vadd.f32 1e-05, %v4375_v4  ;;  %v4666_v27 = vsel %vm335_vm1, %v4665_v34, 0.0 }
0x1911   :  { %4667 = vadd.xlane.f32.xlu1 %v4666_v27  ;;  %v4371_v46 = vpop.xlane.xlu0 %4370 }
0x1912   :  { %6580 = vrsqrt.f32 %v4381_v43  ;;  %v4377_v0 = vmul.f32 0.03125, %v4371_v46 }
0x1913   :  { %6582 = vrsqrt.f32 %v4382_v53 }
0x1914   :  { %v4383_v55 = vadd.f32 1e-05, %v4377_v0 }
0x1916   :  { %6584 = vrsqrt.f32 %v4383_v55 }
0x191c   :  { %v6581_v3 = vpop.eup %6580 }
0x191d   :  { %v4393_v11 = vmul.f32 %v6581_v3, %v4345_v61  ;;  %v6583_v9 = vpop.eup %6582 }
0x191e   :  { %v4394_v17 = vmul.f32 %v6583_v9, %v8649_v22 }
0x191f   :  { %v4405_v19 = vmul.f32 %v8647_v37, %v4393_v11 }
0x1920   :  { %v6585_v12 = vpop.eup %6584  ;;  %v4406_v36 = vmul.f32 %v8647_v37, %v4394_v17 }
0x1921   :  { %v4395_v18 = vmul.f32 %v6585_v12, %v4347_v13  ;;  %v4417_v58 = vadd.f32 %v8652_v30, %v4405_v19 }
0x1922   :  { %v4418_v62 = vadd.f32 %v8652_v30, %v4406_v36 }
0x1923   :  { %v4421_v38 = vpack.c.bf16 %v4417_v58, %v4416_v41  ;;  %v4407_v5 = vmul.f32 %v8647_v37, %v4395_v18  ;;  %v5013_v37 = vld [vmem:[%s8758_s16] ss:$0 sm:$0xff] }
0x1925   :  { %5706 = vmatmul.mubr.msk.bf16.gmra.mrb[92].mxu1 %vm337_vm2, %v4421_v38  ;;  %v4419_v32 = vadd.f32 %v8652_v30, %v4407_v5  ;;  %v5014_v30 = vld [vmem:[%s8759_s17] ss:$0 sm:$0xff] }
0x1926   :  { %5709 = vmatprep.mubr.msk.bf16.mxu1 %vm6954_vm3, %v6953_v8 }
0x1927   :  { %v4422_v22 = vpack.c.bf16 %v4419_v32, %v4418_v62 }
0x192d   :  { %5710 = vmatmul.mubr.msk.bf16.gmra.mrb[96].mxu1 %vm337_vm2, %v4422_v22 }
0x192e   :  { %5733 = vmatprep.mubr.msk.bf16.mxu1 %vm6954_vm3, %v6953_v8 }
0x199e   :  { %v4668_v51 = vpop.xlane.xlu1 %4667 }
0x199f   :  { %v4669_v52 = vmul.f32 0.03125, %v4668_v51 }
0x19a1   :  { %v4670_v28 = vadd.f32 1e-05, %v4669_v52 }
0x19a3   :  { %6586 = vrsqrt.f32 %v4670_v28  ;;  %v6328_v28 = vld [vmem:[%s8762_s20] sm:$0xff]  }
0x19a4   :  { %5730 = vmatpush3.bf16.msra.mxu1 %v6328_v28 }
0x19a5   :  { %5731 = vmatprep.subr.bf16.mxu1 %v6953_v8 }
0x19ad   :  { %v6587_v6 = vpop.eup %6586 }
0x19ae   :  { %v4672_v10 = vmul.f32 %v6587_v6, %v4664_v60  ;;  %v6329_v6 = vld [vmem:[%s8762_s20 + $0x8] sm:$0xff]  }
0x19af   :  { %5732 = vmatpush3.bf16.msra.mxu1 %v6329_v6 }
0x19b0   :  { %v4679_v2 = vmul.f32 %v5013_v37, %v4672_v10 }
0x19b2   :  { %v4686_v7 = vadd.f32 %v5014_v30, %v4679_v2 }
0x19b4   :  { %v4689_v21 = vsel %vm335_vm1, %v4686_v7, 0.0 }
0x19b5   :  { %4690 = vadd.xlane.f32.xlu0 %v4689_v21 }
0x19f8   :  { %v4499_v57 = vpop.f32.mrb[92].mxu1 }
0x19f9   :  { %v4500_v1 = vadd.f32 %v8664_v54, %v4499_v57  ;;  %v5707_v31 = vpop.f32.mrb[93].mxu1  ;;  %v5016_v57 = vld [vmem:[%s8761_s19] ss:$0 sm:$0xff]  ;;  %s6896_s19 = scalar_lea.vmem %s4791_s26, 64 }
0x19fa   :  { %v4502_v49 = vpop.f32.mrb[94].mxu1  ;;  %p6897_p6 = scmp.ne.s32.totalorder %s4791_s26, %s6896_s19  ;;  %p6902_p8 = scmp.lt.s32.totalorder %s6896_s19, %s6896_s19 }
0x19fb   :  { %v4522_v61 = vmul.f32 0.044715, %v4500_v1  ;;  %v4503_v16 = vadd.f32 %v8664_v54, %v4502_v49  ;;  %v5708_v23 = vpop.f32.mrb[95].mxu1  ;;  %v4516_v50 = vmul.f32 0.5, %v4500_v1 }
0x19fc   :  { %p6903_p9 = por %p6902_p8, %p6901_p7 }
0x19fd   :  { %v4528_v29 = vmul.f32 %v4522_v61, %v4500_v1  ;;  %v4523_v33 = vmul.f32 0.044715, %v4503_v16 }
0x19fe   :  { %p6904_p10 = pnand %p6903_p9, %p6897_p6 }
0x19ff   :  { %v4534_v35 = vmul.f32 %v4528_v29, %v4500_v1  ;;  %v4529_v45 = vmul.f32 %v4523_v33, %v4503_v16 }
0x1a00   :  { %v4507_v13 = vpop.f32.mrb[96].mxu1 }
0x1a01   :  { %v4540_v26 = vadd.f32 %v4534_v35, %v4500_v1  ;;  %v4535_v39 = vmul.f32 %v4529_v45, %v4503_v16  ;;  %v4508_v20 = vadd.f32 %v8664_v54, %v4507_v13  ;;  %v5711_v48 = vpop.f32.mrb[97].mxu1  ;;  %v5017_v13 = vld [vmem:[%s8800_s4] ss:$0 sm:$0xff] }
0x1a02   :  { %v4510_v47 = vpop.f32.mrb[98].mxu1 }
0x1a03   :  { %v4546_v42 = vmul.f32 0.7978846, %v4540_v26  ;;  %v4541_v40 = vadd.f32 %v4535_v39, %v4503_v16  ;;  %v4524_v14 = vmul.f32 0.044715, %v4508_v20  ;;  %v4511_v63 = vadd.f32 %v8664_v54, %v4510_v47  ;;  %v5712_v25 = vpop.f32.mrb[99].mxu1 }
0x1a04   :  { %v4517_v54 = vmul.f32 0.5, %v4503_v16  ;;  %v4518_v18 = vmul.f32 0.5, %v4508_v20 }
0x1a05   :  { %6588 = vtanh.f32 %v4546_v42  ;;  %v4547_v44 = vmul.f32 0.7978846, %v4541_v40  ;;  %v4530_v24 = vmul.f32 %v4524_v14, %v4508_v20  ;;  %v4525_v60 = vmul.f32 0.044715, %v4511_v63 }
0x1a06   :  { %v4519_v41 = vmul.f32 0.5, %v4511_v63 }
0x1a07   :  { %6590 = vtanh.f32 %v4547_v44  ;;  %v4536_v59 = vmul.f32 %v4530_v24, %v4508_v20  ;;  %v4531_v4 = vmul.f32 %v4525_v60, %v4511_v63 }
0x1a09   :  { %v4542_v34 = vadd.f32 %v4536_v59, %v4508_v20  ;;  %v4537_v53 = vmul.f32 %v4531_v4, %v4511_v63 }
0x1a0b   :  { %v4548_v43 = vmul.f32 0.7978846, %v4542_v34  ;;  %v4543_v27 = vadd.f32 %v4537_v53, %v4511_v63 }
0x1a0d   :  { %6592 = vtanh.f32 %v4548_v43  ;;  %v4549_v46 = vmul.f32 0.7978846, %v4543_v27 }
0x1a0f   :  { %v6589_v0 = vpop.eup %6588  ;;  %6594 = vtanh.f32 %v4549_v46 }
0x1a10   :  { %v4558_v55 = vadd.f32 1.0, %v6589_v0 }
0x1a11   :  { %v6591_v15 = vpop.eup %6590 }
0x1a12   :  { %v4559_v3 = vadd.f32 1.0, %v6591_v15  ;;  %v4564_v11 = vmul.f32 %v4558_v55, %v4516_v50 }
0x1a14   :  { %v4565_v56 = vmul.f32 %v4559_v3, %v4517_v54 }
0x1a16   :  { %v4569_v9 = vpack.c.bf16 %v4565_v56, %v4564_v11 }
0x1a17   :  { %v6593_v19 = vpop.eup %6592 }
0x1a18   :  { %5722 = vmatmul.mubr.msk.bf16.gmra.mrb[88].mxu0 %vm337_vm2, %v4569_v9  ;;  %v4560_v12 = vadd.f32 1.0, %v6593_v19 }
0x1a19   :  { %v6595_v17 = vpop.eup %6594  ;;  %5725 = vmatprep.mubr.msk.bf16.mxu0 %vm6954_vm3, %v6953_v8 }
0x1a1a   :  { %v4561_v58 = vadd.f32 1.0, %v6595_v17  ;;  %v4566_v38 = vmul.f32 %v4560_v12, %v4518_v18 }
0x1a1c   :  { %v4567_v5 = vmul.f32 %v4561_v58, %v4519_v41 }
0x1a1e   :  { %v4570_v36 = vpack.c.bf16 %v4567_v5, %v4566_v38 }
0x1a20   :  { %5726 = vmatmul.mubr.msk.bf16.gmra.mrb[92].mxu0 %vm337_vm2, %v4570_v36 }
0x1a42   :  { %v4691_v32 = vpop.xlane.xlu0 %4690 }
0x1a43   :  { %v4692_v62 = vmul.f32 0.03125, %v4691_v32 }
0x1a45   :  { %v4693_v22 = vsub.f32 %v4686_v7, %v4692_v62  ;;  %v5015_v7 = vld [vmem:[%s8760_s18] ss:$0 sm:$0xff] }
0x1a47   :  { %v4694_v51 = vmul.f32 %v4693_v22, %v4693_v22 }
0x1a49   :  { %v4695_v52 = vsel %vm335_vm1, %v4694_v51, 0.0 }
0x1a4a   :  { %4696 = vadd.xlane.f32.xlu1 %v4695_v52 }
0x1ad7   :  { %v4697_v37 = vpop.xlane.xlu1 %4696 }
0x1ad8   :  { %v4698_v10 = vmul.f32 0.03125, %v4697_v37 }
0x1ada   :  { %v4699_v30 = vadd.f32 1e-05, %v4698_v10 }
0x1adc   :  { %6596 = vrsqrt.f32 %v4699_v30 }
0x1ae6   :  { %v6597_v2 = vpop.eup %6596 }
0x1ae7   :  { %v4701_v21 = vmul.f32 %v6597_v2, %v4693_v22 }
0x1ae9   :  { %v4708_v8 = vmul.f32 %v5015_v7, %v4701_v21 }
0x1aeb   :  { %v4715_v1 = vadd.f32 %v5016_v57, %v4708_v8  ;;  %v4646_v31 = vpop.f32.mrb[88].mxu0 }
0x1aec   :  { %v5723_v49 = vpop.f32.mrb[89].mxu0 }
0x1aed   :  { %v4716_v61 = vpack.c.bf16 %v4715_v1, %v4715_v1  ;;  %v4648_v16 = vpop.f32.mrb[90].mxu0 }
0x1aee   :  { %v5724_v23 = vpop.f32.mrb[91].mxu0 }
0x1aef   :  { %5734 = vmatmul.mubr.msk.bf16.vlgmr.msra.gmra.mrb[100].mxu1 %vm337_vm2, %v4716_v61 }
0x1af3   :  { %v4652_v29 = vpop.f32.mrb[92].mxu0 }
0x1af4   :  { %v5727_v33 = vpop.f32.mrb[93].mxu0 }
0x1af5   :  { %v4654_v35 = vpop.f32.mrb[94].mxu0 }
0x1af6   :  { %v5728_v45 = vpop.f32.mrb[95].mxu0 }
0x1bc2   :  { %v4777_v26 = vpop.f32.mrb[100].mxu1 }
0x1bc3   :  { %v4778_v39 = vadd.f32 %v5017_v13, %v4777_v26  ;;  %v5735_v20 = vpop.f32.mrb[101].mxu1 }
0x1bc4   :  { %v4780_v48 = vpop.f32.mrb[102].mxu1 }
0x1bc5   :  { %4783 = vst [vmem:[#allocation24] sm:$0xf] %v4778_v39  ;;  %v5736_v47 = vpop.f32.mrb[103].mxu1 }
0x1bc6   :  { %6907 = shalt.err (!%p6904_p10)
}
0x1bc7   :  { %s8801_s29 = sld [smem:[#allocation41_spill]] }
0x1bcd   :  { %s6908_s23 = scalar_lea.hbm %s8801_s29, 64 }
0x1bce   :  { %p6909_p11 = scmp.ne.s32.totalorder %s8801_s29, %s6908_s23  ;;  %p6912_p12 = scmp.lt.u32.totalorder %s6908_s23, %s8801_s29 }
0x1bd0   :  { %p6914_p13 = pnand %p6912_p12, %p6909_p11 }
0x1bd2   :  { %6917 = shalt.err (!%p6914_p13)
}
0x1bd3   :  { %4793 = dma.vmem_to_hbm [thread:$0]  %s4791_s26, 64, %s8801_s29, [#allocation5]  }
0x1bd4   :  { %6932 = dma.done.wait [#allocation5], 64  }
0x1bd5   :  { %6933 = vsyncadd [#allocation5], 4294967232 }
0x1bd6   :  { %4797 = vsyncpa [#allocation4], 1 }
0x1bd7   :  { %4798 = vsyncpa [#allocation7], 1 }
0x1bd8   :  { %4799 = vsyncpa [#allocation10], 1 }
0x1bd9   :  { %4800 = vsyncpa [#allocation13], 1 }
0x1bda   :  { %4801 = vsyncpa [#allocation16], 1 }
0x1bdb   :  { %4802 = vsyncpa [#allocation19], 1 }
0x1bdc   :  { %4803 = vsyncpa [#allocation22], 1 }
0x1bdd   :  { %4804 = vsyncpa [#allocation5], 1 }

</bundles_post_ra>
